<compile_context>
chip_gen: v7x
topology: tpu7x:2x2x1
jax: 0.10.0
libtpu: 0.0.40
codegen_flags: <defaults>
</compile_context>

<pallas_src>
import math

import jax
import jax.numpy as jnp
from jax.experimental import pallas as pl
from jax.experimental.pallas import tpu as pltpu  # noqa: F401  (TPU backend)

# ---- model hyper-parameters (small, consistent with the module) -------------
B = 2          # batch
S = 8          # sequence length (real_src and gt_src share it)
D = 32         # d_model
H = 4          # nhead
HD = D // H    # head dim
FF = 64        # dim_feedforward
NUM_LAYERS = 2
EPS = 1e-5     # LayerNorm eps (PyTorch default)

N = B * S      # flattened (batch, seq) rows
G = H * B      # flattened (head, batch) groups for attention


# ---------------------------------------------------------------------------
# Fused kernel: all layers + optional final LayerNorm, whole batch, no grid.
#   per layer:
#     q = (x + pos) Wq ; k = (gt + pos) Wk ; v = gt Wv        (K/V hoisted)
#     attn = softmax(q k^T / sqrt(hd)) v  Wo
#     x = LN1(x + attn)
#     x = LN2(x + W2 relu(W1 x))
# ---------------------------------------------------------------------------
def _make_stack_kernel(num_layers, apply_final_norm):
    scale = 1.0 / math.sqrt(HD)
    f32 = jnp.float32

    def _layernorm(x, gamma, beta):
        # one-pass variance: E[x^2] - mu^2 (two independent reduces)
        mu = jnp.mean(x, axis=-1, keepdims=True)
        ex2 = jnp.mean(x * x, axis=-1, keepdims=True)
        var = ex2 - mu * mu
        return (x - mu) * jax.lax.rsqrt(var + EPS) * gamma + beta

    def kernel(acts_ref, wqkv_ref, bqkv_ref, wo_ref, w1_ref, w2_ref,
               bf1_ref, vec_ref, out_ref):
        # lane-dense (N, D) slabs, f32 throughout
        x = acts_ref[0].astype(f32)      # real_src
        g = acts_ref[1].astype(f32)      # gt_src
        p = acts_ref[2].astype(f32)      # pos
        gp = g + p                       # layer-invariant key input

        # ---- K / V projections hoisted out of the layer loop --------------
        # (gp and g do not change across layers; per-head weights avoid any
        #  in-kernel lane slicing of a 32-lane vreg)
        k_layers, v_layers = [], []
        for l in range(num_layers):
            kh = [jnp.dot(gp, wqkv_ref[1, l, h], preferred_element_type=f32)
                  + bqkv_ref[1, l, h] for h in range(H)]
            vh = [jnp.dot(g, wqkv_ref[2, l, h], preferred_element_type=f32)
                  + bqkv_ref[2, l, h] for h in range(H)]
            k_layers.append(jnp.stack(kh).reshape(G, S, HD))   # (H*B, S, HD)
            v_layers.append(jnp.stack(vh).reshape(G, S, HD))

        # ---- layer loop (static unroll, L is small) ------------------------
        for l in range(num_layers):
            base = 6 * l
            bo = vec_ref[base + 0]
            g1 = vec_ref[base + 1]
            be1 = vec_ref[base + 2]
            bf2 = vec_ref[base + 3]
            g2 = vec_ref[base + 4]
            be2 = vec_ref[base + 5]
            bf1 = bf1_ref[l]

            # Q projection: per-head weights, no lane extraction
            xq = x + p
            qh = [jnp.dot(xq, wqkv_ref[0, l, h], preferred_element_type=f32)
                  + bqkv_ref[0, l, h] for h in range(H)]
            q = jnp.stack(qh).reshape(G, S, HD)                 # (H*B, S, HD)

            k = k_layers[l]
            v = v_layers[l]

            # attention scores / softmax batched over all (head, batch) groups
            s = jnp.einsum('gqd,gkd->gqk', q, k,
                           preferred_element_type=f32) * scale   # (G, S, S)
            s = s - jnp.max(s, axis=-1, keepdims=True)
            e = jnp.exp(s)
            a = e / jnp.sum(e, axis=-1, keepdims=True)            # exact recip
            o = jnp.einsum('gqk,gkd->gqd', a, v,
                           preferred_element_type=f32)            # (G, S, HD)

            # output projection: head-batched matmul + leading-dim sum
            # (no serial per-head accumulate chain, no lane concat)
            o = o.reshape(H, N, HD)
            per_head = jnp.einsum('hnd,hde->hne', o, wo_ref[l],
                                  preferred_element_type=f32)     # (H, N, D)
            attn = jnp.sum(per_head, axis=0) + bo                 # (N, D)

            x = _layernorm(x + attn, g1, be1)

            ff = jnp.maximum(
                jnp.dot(x, w1_ref[l], preferred_element_type=f32) + bf1, 0.0)
            ff = jnp.dot(ff, w2_ref[l], preferred_element_type=f32) + bf2

            x = _layernorm(x + ff, g2, be2)

        if apply_final_norm:
            x = _layernorm(x, vec_ref[6 * num_layers], vec_ref[6 * num_layers + 1])

        # lane-dense (N, D) store; wrapper reshapes to (B, S, D)
        out_ref[...] = x.astype(out_ref.dtype)

    return kernel


# ---------------------------------------------------------------------------
# Wrapper: host-side parameter packing (8 operands) + one pallas_call.
# ---------------------------------------------------------------------------
def cross_transformer_encoder3(real_src, gt_src, pos, layer_params, norm_params):
    """Forward pass of CrossTransformerEncoder3 (masks=None, no sigmoid weights)."""
    num_layers = len(layer_params)
    f32 = jnp.float32

    def split_in(w):    # (D, D) -> (H, D, HD):  w[:, h*HD:(h+1)*HD]
        return jnp.transpose(w.reshape(D, H, HD), (1, 0, 2))

    def split_out(w):   # (D, D) -> (H, HD, D):  w[h*HD:(h+1)*HD, :]
        return w.reshape(H, HD, D)

    def split_bias(b):  # (1, D) -> (H, 1, HD)
        return b.reshape(H, 1, HD)

    w_qkv = jnp.stack([
        jnp.stack([split_in(lp["wq"]) for lp in layer_params]),
        jnp.stack([split_in(lp["wk"]) for lp in layer_params]),
        jnp.stack([split_in(lp["wv"]) for lp in layer_params]),
    ]).astype(f32)                                                   # (3,L,H,D,HD)

    b_qkv = jnp.stack([
        jnp.stack([split_bias(lp["bq"]) for lp in layer_params]),
        jnp.stack([split_bias(lp["bk"]) for lp in layer_params]),
        jnp.stack([split_bias(lp["bv"]) for lp in layer_params]),
    ]).astype(f32)                                                   # (3,L,H,1,HD)

    w_o = jnp.stack([split_out(lp["wo"]) for lp in layer_params]).astype(f32)   # (L,H,HD,D)
    w_1 = jnp.stack([lp["w1"] for lp in layer_params]).astype(f32)              # (L,D,FF)
    w_2 = jnp.stack([lp["w2"] for lp in layer_params]).astype(f32)              # (L,FF,D)
    b_f1 = jnp.stack([lp["bf1"].reshape(1, FF) for lp in layer_params]).astype(f32)  # (L,1,FF)

    apply_norm = norm_params is not None
    gn = (norm_params["g"] if apply_norm else jnp.ones((1, D), f32)).reshape(1, D)
    bn = (norm_params["b"] if apply_norm else jnp.zeros((1, D), f32)).reshape(1, D)

    vec_rows = []
    for lp in layer_params:
        vec_rows += [lp["bo"].reshape(1, D), lp["g1"].reshape(1, D),
                     lp["be1"].reshape(1, D), lp["bf2"].reshape(1, D),
                     lp["g2"].reshape(1, D), lp["be2"].reshape(1, D)]
    vec_rows += [gn, bn]
    vecs = jnp.stack(vec_rows).astype(f32)                           # (6L+2, 1, D)

    acts = jnp.stack([real_src.reshape(N, D),
                      gt_src.reshape(N, D),
                      pos.reshape(N, D)]).astype(f32)                # (3, N, D)

    kernel = _make_stack_kernel(num_layers, apply_norm)
    # No grid / BlockSpecs: single invocation, all 8 operands resident in VMEM.
    out = pl.pallas_call(
        kernel,
        out_shape=jax.ShapeDtypeStruct((N, D), f32),
    )(acts, w_qkv, b_qkv, w_o, w_1, w_2, b_f1, vecs)
    return out.reshape(B, S, D)


# ---------------------------------------------------------------------------
# Deterministic parameter init
# ---------------------------------------------------------------------------
def init_layer_params(key):
    ks = jax.random.split(key, 8)
    sc = 0.1
    return {
        "wq": jax.random.normal(ks[0], (D, D), jnp.float32) * sc,
        "wk": jax.random.normal(ks[1], (D, D), jnp.float32) * sc,
        "wv": jax.random.normal(ks[2], (D, D), jnp.float32) * sc,
        "wo": jax.random.normal(ks[3], (D, D), jnp.float32) * sc,
        "w1": jax.random.normal(ks[4], (D, FF), jnp.float32) * sc,
        "w2": jax.random.normal(ks[5], (FF, D), jnp.float32) * sc,
        "bq": jax.random.normal(ks[6], (1, D), jnp.float32) * sc,
        "bk": jnp.zeros((1, D), jnp.float32),
        "bv": jnp.zeros((1, D), jnp.float32),
        "bo": jax.random.normal(ks[7], (1, D), jnp.float32) * sc,
        "bf1": jnp.zeros((1, FF), jnp.float32),
        "bf2": jnp.zeros((1, D), jnp.float32),
        "g1": jnp.ones((1, D), jnp.float32),
        "be1": jnp.zeros((1, D), jnp.float32),
        "g2": jnp.ones((1, D), jnp.float32),
        "be2": jnp.zeros((1, D), jnp.float32),
    }


if __name__ == "__main__":
    key = jax.random.PRNGKey(0)
    k_real, k_gt, k_pos, k_params = jax.random.split(key, 4)

    real_src = jax.random.normal(k_real, (B, S, D), jnp.float32)
    gt_src = jax.random.normal(k_gt, (B, S, D), jnp.float32)
    pos = jax.random.normal(k_pos, (B, S, D), jnp.float32)

    layer_keys = jax.random.split(k_params, NUM_LAYERS)
    layer_params = [init_layer_params(k) for k in layer_keys]
    norm_params = {"g": jnp.ones((1, D), jnp.float32),
                   "b": jnp.zeros((1, D), jnp.float32)}

    out = cross_transformer_encoder3(real_src, gt_src, pos, layer_params, norm_params)
    out = jax.block_until_ready(out)

    assert out.shape == (B, S, D)
    assert bool(jnp.all(jnp.isfinite(out)))
    print("KERNEL_OK")
</pallas_src>

<mosaic_0001>
module attributes {stable_mosaic.version = 11 : i64} {
  func.func @kernel(%arg0: memref<3x16x32xf32, #tpu.memory_space<vmem>>, %arg1: memref<3x2x4x32x8xf32, #tpu.memory_space<vmem>>, %arg2: memref<3x2x4x1x8xf32, #tpu.memory_space<vmem>>, %arg3: memref<2x4x8x32xf32, #tpu.memory_space<vmem>>, %arg4: memref<2x32x64xf32, #tpu.memory_space<vmem>>, %arg5: memref<2x64x32xf32, #tpu.memory_space<vmem>>, %arg6: memref<2x1x64xf32, #tpu.memory_space<vmem>>, %arg7: memref<14x1x32xf32, #tpu.memory_space<vmem>>, %arg8: memref<16x32xf32, #tpu.memory_space<vmem>>) attributes {dimension_semantics = [], scalar_prefetch = 0 : i64, scratch_operands = 0 : i64, tpu.core_type = #tpu.core_type<tc>} {
    %c0 = arith.constant 0 : index
    %c0_0 = arith.constant 0 : index
    %c0_1 = arith.constant 0 : index
    %0 = vector.load %arg0[%c0, %c0_0, %c0_1] : memref<3x16x32xf32, #tpu.memory_space<vmem>>, vector<1x16x32xf32>
    %1 = vector.shape_cast %0 : vector<1x16x32xf32> to vector<16x32xf32>
    %c1 = arith.constant 1 : index
    %c0_2 = arith.constant 0 : index
    %c0_3 = arith.constant 0 : index
    %2 = vector.load %arg0[%c1, %c0_2, %c0_3] : memref<3x16x32xf32, #tpu.memory_space<vmem>>, vector<1x16x32xf32>
    %3 = vector.shape_cast %2 : vector<1x16x32xf32> to vector<16x32xf32>
    %c2 = arith.constant 2 : index
    %c0_4 = arith.constant 0 : index
    %c0_5 = arith.constant 0 : index
    %4 = vector.load %arg0[%c2, %c0_4, %c0_5] : memref<3x16x32xf32, #tpu.memory_space<vmem>>, vector<1x16x32xf32>
    %5 = vector.shape_cast %4 : vector<1x16x32xf32> to vector<16x32xf32>
    %6 = arith.addf %3, %5 : vector<16x32xf32>
    %c1_6 = arith.constant 1 : index
    %c0_7 = arith.constant 0 : index
    %c0_8 = arith.constant 0 : index
    %c0_9 = arith.constant 0 : index
    %c0_10 = arith.constant 0 : index
    %7 = vector.load %arg1[%c1_6, %c0_7, %c0_8, %c0_9, %c0_10] : memref<3x2x4x32x8xf32, #tpu.memory_space<vmem>>, vector<1x1x1x32x8xf32>
    %8 = vector.shape_cast %7 : vector<1x1x1x32x8xf32> to vector<32x8xf32>
    %cst = arith.constant dense<0.000000e+00> : vector<16x8xf32>
    %9 = tpu.matmul %6, %8, %cst {dimension_numbers = #tpu.dot_dimension_numbers<[1], [0], [0], [1], [0, 0, 1, 1], [], []>} : vector<16x32xf32>, vector<32x8xf32>, vector<16x8xf32> -> vector<16x8xf32>
    %c1_11 = arith.constant 1 : index
    %c0_12 = arith.constant 0 : index
    %c0_13 = arith.constant 0 : index
    %c0_14 = arith.constant 0 : index
    %c0_15 = arith.constant 0 : index
    %10 = vector.load %arg2[%c1_11, %c0_12, %c0_13, %c0_14, %c0_15] : memref<3x2x4x1x8xf32, #tpu.memory_space<vmem>>, vector<1x1x1x1x8xf32>
    %11 = vector.shape_cast %10 : vector<1x1x1x1x8xf32> to vector<1x8xf32>
    %12 = vector.broadcast %11 : vector<1x8xf32> to vector<16x8xf32>
    %13 = arith.addf %9, %12 : vector<16x8xf32>
    %c1_16 = arith.constant 1 : index
    %c0_17 = arith.constant 0 : index
    %c1_18 = arith.constant 1 : index
    %c0_19 = arith.constant 0 : index
    %c0_20 = arith.constant 0 : index
    %14 = vector.load %arg1[%c1_16, %c0_17, %c1_18, %c0_19, %c0_20] : memref<3x2x4x32x8xf32, #tpu.memory_space<vmem>>, vector<1x1x1x32x8xf32>
    %15 = vector.shape_cast %14 : vector<1x1x1x32x8xf32> to vector<32x8xf32>
    %cst_21 = arith.constant dense<0.000000e+00> : vector<16x8xf32>
    %16 = tpu.matmul %6, %15, %cst_21 {dimension_numbers = #tpu.dot_dimension_numbers<[1], [0], [0], [1], [0, 0, 1, 1], [], []>} : vector<16x32xf32>, vector<32x8xf32>, vector<16x8xf32> -> vector<16x8xf32>
    %c1_22 = arith.constant 1 : index
    %c0_23 = arith.constant 0 : index
    %c1_24 = arith.constant 1 : index
    %c0_25 = arith.constant 0 : index
    %c0_26 = arith.constant 0 : index
    %17 = vector.load %arg2[%c1_22, %c0_23, %c1_24, %c0_25, %c0_26] : memref<3x2x4x1x8xf32, #tpu.memory_space<vmem>>, vector<1x1x1x1x8xf32>
    %18 = vector.shape_cast %17 : vector<1x1x1x1x8xf32> to vector<1x8xf32>
    %19 = vector.broadcast %18 : vector<1x8xf32> to vector<16x8xf32>
    %20 = arith.addf %16, %19 : vector<16x8xf32>
    %c1_27 = arith.constant 1 : index
    %c0_28 = arith.constant 0 : index
    %c2_29 = arith.constant 2 : index
    %c0_30 = arith.constant 0 : index
    %c0_31 = arith.constant 0 : index
    %21 = vector.load %arg1[%c1_27, %c0_28, %c2_29, %c0_30, %c0_31] : memref<3x2x4x32x8xf32, #tpu.memory_space<vmem>>, vector<1x1x1x32x8xf32>
    %22 = vector.shape_cast %21 : vector<1x1x1x32x8xf32> to vector<32x8xf32>
    %cst_32 = arith.constant dense<0.000000e+00> : vector<16x8xf32>
    %23 = tpu.matmul %6, %22, %cst_32 {dimension_numbers = #tpu.dot_dimension_numbers<[1], [0], [0], [1], [0, 0, 1, 1], [], []>} : vector<16x32xf32>, vector<32x8xf32>, vector<16x8xf32> -> vector<16x8xf32>
    %c1_33 = arith.constant 1 : index
    %c0_34 = arith.constant 0 : index
    %c2_35 = arith.constant 2 : index
    %c0_36 = arith.constant 0 : index
    %c0_37 = arith.constant 0 : index
    %24 = vector.load %arg2[%c1_33, %c0_34, %c2_35, %c0_36, %c0_37] : memref<3x2x4x1x8xf32, #tpu.memory_space<vmem>>, vector<1x1x1x1x8xf32>
    %25 = vector.shape_cast %24 : vector<1x1x1x1x8xf32> to vector<1x8xf32>
    %26 = vector.broadcast %25 : vector<1x8xf32> to vector<16x8xf32>
    %27 = arith.addf %23, %26 : vector<16x8xf32>
    %c1_38 = arith.constant 1 : index
    %c0_39 = arith.constant 0 : index
    %c3 = arith.constant 3 : index
    %c0_40 = arith.constant 0 : index
    %c0_41 = arith.constant 0 : index
    %28 = vector.load %arg1[%c1_38, %c0_39, %c3, %c0_40, %c0_41] : memref<3x2x4x32x8xf32, #tpu.memory_space<vmem>>, vector<1x1x1x32x8xf32>
    %29 = vector.shape_cast %28 : vector<1x1x1x32x8xf32> to vector<32x8xf32>
    %cst_42 = arith.constant dense<0.000000e+00> : vector<16x8xf32>
    %30 = tpu.matmul %6, %29, %cst_42 {dimension_numbers = #tpu.dot_dimension_numbers<[1], [0], [0], [1], [0, 0, 1, 1], [], []>} : vector<16x32xf32>, vector<32x8xf32>, vector<16x8xf32> -> vector<16x8xf32>
    %c1_43 = arith.constant 1 : index
    %c0_44 = arith.constant 0 : index
    %c3_45 = arith.constant 3 : index
    %c0_46 = arith.constant 0 : index
    %c0_47 = arith.constant 0 : index
    %31 = vector.load %arg2[%c1_43, %c0_44, %c3_45, %c0_46, %c0_47] : memref<3x2x4x1x8xf32, #tpu.memory_space<vmem>>, vector<1x1x1x1x8xf32>
    %32 = vector.shape_cast %31 : vector<1x1x1x1x8xf32> to vector<1x8xf32>
    %33 = vector.broadcast %32 : vector<1x8xf32> to vector<16x8xf32>
    %34 = arith.addf %30, %33 : vector<16x8xf32>
    %c2_48 = arith.constant 2 : index
    %c0_49 = arith.constant 0 : index
    %c0_50 = arith.constant 0 : index
    %c0_51 = arith.constant 0 : index
    %c0_52 = arith.constant 0 : index
    %35 = vector.load %arg1[%c2_48, %c0_49, %c0_50, %c0_51, %c0_52] : memref<3x2x4x32x8xf32, #tpu.memory_space<vmem>>, vector<1x1x1x32x8xf32>
    %36 = vector.shape_cast %35 : vector<1x1x1x32x8xf32> to vector<32x8xf32>
    %cst_53 = arith.constant dense<0.000000e+00> : vector<16x8xf32>
    %37 = tpu.matmul %3, %36, %cst_53 {dimension_numbers = #tpu.dot_dimension_numbers<[1], [0], [0], [1], [0, 0, 1, 1], [], []>} : vector<16x32xf32>, vector<32x8xf32>, vector<16x8xf32> -> vector<16x8xf32>
    %c2_54 = arith.constant 2 : index
    %c0_55 = arith.constant 0 : index
    %c0_56 = arith.constant 0 : index
    %c0_57 = arith.constant 0 : index
    %c0_58 = arith.constant 0 : index
    %38 = vector.load %arg2[%c2_54, %c0_55, %c0_56, %c0_57, %c0_58] : memref<3x2x4x1x8xf32, #tpu.memory_space<vmem>>, vector<1x1x1x1x8xf32>
    %39 = vector.shape_cast %38 : vector<1x1x1x1x8xf32> to vector<1x8xf32>
    %40 = vector.broadcast %39 : vector<1x8xf32> to vector<16x8xf32>
    %41 = arith.addf %37, %40 : vector<16x8xf32>
    %c2_59 = arith.constant 2 : index
    %c0_60 = arith.constant 0 : index
    %c1_61 = arith.constant 1 : index
    %c0_62 = arith.constant 0 : index
    %c0_63 = arith.constant 0 : index
    %42 = vector.load %arg1[%c2_59, %c0_60, %c1_61, %c0_62, %c0_63] : memref<3x2x4x32x8xf32, #tpu.memory_space<vmem>>, vector<1x1x1x32x8xf32>
    %43 = vector.shape_cast %42 : vector<1x1x1x32x8xf32> to vector<32x8xf32>
    %cst_64 = arith.constant dense<0.000000e+00> : vector<16x8xf32>
    %44 = tpu.matmul %3, %43, %cst_64 {dimension_numbers = #tpu.dot_dimension_numbers<[1], [0], [0], [1], [0, 0, 1, 1], [], []>} : vector<16x32xf32>, vector<32x8xf32>, vector<16x8xf32> -> vector<16x8xf32>
    %c2_65 = arith.constant 2 : index
    %c0_66 = arith.constant 0 : index
    %c1_67 = arith.constant 1 : index
    %c0_68 = arith.constant 0 : index
    %c0_69 = arith.constant 0 : index
    %45 = vector.load %arg2[%c2_65, %c0_66, %c1_67, %c0_68, %c0_69] : memref<3x2x4x1x8xf32, #tpu.memory_space<vmem>>, vector<1x1x1x1x8xf32>
    %46 = vector.shape_cast %45 : vector<1x1x1x1x8xf32> to vector<1x8xf32>
    %47 = vector.broadcast %46 : vector<1x8xf32> to vector<16x8xf32>
    %48 = arith.addf %44, %47 : vector<16x8xf32>
    %c2_70 = arith.constant 2 : index
    %c0_71 = arith.constant 0 : index
    %c2_72 = arith.constant 2 : index
    %c0_73 = arith.constant 0 : index
    %c0_74 = arith.constant 0 : index
    %49 = vector.load %arg1[%c2_70, %c0_71, %c2_72, %c0_73, %c0_74] : memref<3x2x4x32x8xf32, #tpu.memory_space<vmem>>, vector<1x1x1x32x8xf32>
    %50 = vector.shape_cast %49 : vector<1x1x1x32x8xf32> to vector<32x8xf32>
    %cst_75 = arith.constant dense<0.000000e+00> : vector<16x8xf32>
    %51 = tpu.matmul %3, %50, %cst_75 {dimension_numbers = #tpu.dot_dimension_numbers<[1], [0], [0], [1], [0, 0, 1, 1], [], []>} : vector<16x32xf32>, vector<32x8xf32>, vector<16x8xf32> -> vector<16x8xf32>
    %c2_76 = arith.constant 2 : index
    %c0_77 = arith.constant 0 : index
    %c2_78 = arith.constant 2 : index
    %c0_79 = arith.constant 0 : index
    %c0_80 = arith.constant 0 : index
    %52 = vector.load %arg2[%c2_76, %c0_77, %c2_78, %c0_79, %c0_80] : memref<3x2x4x1x8xf32, #tpu.memory_space<vmem>>, vector<1x1x1x1x8xf32>
    %53 = vector.shape_cast %52 : vector<1x1x1x1x8xf32> to vector<1x8xf32>
    %54 = vector.broadcast %53 : vector<1x8xf32> to vector<16x8xf32>
    %55 = arith.addf %51, %54 : vector<16x8xf32>
    %c2_81 = arith.constant 2 : index
    %c0_82 = arith.constant 0 : index
    %c3_83 = arith.constant 3 : index
    %c0_84 = arith.constant 0 : index
    %c0_85 = arith.constant 0 : index
    %56 = vector.load %arg1[%c2_81, %c0_82, %c3_83, %c0_84, %c0_85] : memref<3x2x4x32x8xf32, #tpu.memory_space<vmem>>, vector<1x1x1x32x8xf32>
    %57 = vector.shape_cast %56 : vector<1x1x1x32x8xf32> to vector<32x8xf32>
    %cst_86 = arith.constant dense<0.000000e+00> : vector<16x8xf32>
    %58 = tpu.matmul %3, %57, %cst_86 {dimension_numbers = #tpu.dot_dimension_numbers<[1], [0], [0], [1], [0, 0, 1, 1], [], []>} : vector<16x32xf32>, vector<32x8xf32>, vector<16x8xf32> -> vector<16x8xf32>
    %c2_87 = arith.constant 2 : index
    %c0_88 = arith.constant 0 : index
    %c3_89 = arith.constant 3 : index
    %c0_90 = arith.constant 0 : index
    %c0_91 = arith.constant 0 : index
    %59 = vector.load %arg2[%c2_87, %c0_88, %c3_89, %c0_90, %c0_91] : memref<3x2x4x1x8xf32, #tpu.memory_space<vmem>>, vector<1x1x1x1x8xf32>
    %60 = vector.shape_cast %59 : vector<1x1x1x1x8xf32> to vector<1x8xf32>
    %61 = vector.broadcast %60 : vector<1x8xf32> to vector<16x8xf32>
    %62 = arith.addf %58, %61 : vector<16x8xf32>
    %63 = vector.shape_cast %13 : vector<16x8xf32> to vector<1x16x8xf32>
    %64 = vector.shape_cast %20 : vector<16x8xf32> to vector<1x16x8xf32>
    %65 = vector.shape_cast %27 : vector<16x8xf32> to vector<1x16x8xf32>
    %66 = vector.shape_cast %34 : vector<16x8xf32> to vector<1x16x8xf32>
    %67 = tpu.concatenate %63, %64, %65, %66 in 0 : vector<1x16x8xf32>, vector<1x16x8xf32>, vector<1x16x8xf32>, vector<1x16x8xf32> -> vector<4x16x8xf32>
    %68 = vector.shape_cast %67 : vector<4x16x8xf32> to vector<8x8x8xf32>
    %69 = vector.shape_cast %41 : vector<16x8xf32> to vector<1x16x8xf32>
    %70 = vector.shape_cast %48 : vector<16x8xf32> to vector<1x16x8xf32>
    %71 = vector.shape_cast %55 : vector<16x8xf32> to vector<1x16x8xf32>
    %72 = vector.shape_cast %62 : vector<16x8xf32> to vector<1x16x8xf32>
    %73 = tpu.concatenate %69, %70, %71, %72 in 0 : vector<1x16x8xf32>, vector<1x16x8xf32>, vector<1x16x8xf32>, vector<1x16x8xf32> -> vector<4x16x8xf32>
    %74 = vector.shape_cast %73 : vector<4x16x8xf32> to vector<8x8x8xf32>
    %c1_92 = arith.constant 1 : index
    %c1_93 = arith.constant 1 : index
    %c0_94 = arith.constant 0 : index
    %c0_95 = arith.constant 0 : index
    %c0_96 = arith.constant 0 : index
    %75 = vector.load %arg1[%c1_92, %c1_93, %c0_94, %c0_95, %c0_96] : memref<3x2x4x32x8xf32, #tpu.memory_space<vmem>>, vector<1x1x1x32x8xf32>
    %76 = vector.shape_cast %75 : vector<1x1x1x32x8xf32> to vector<32x8xf32>
    %cst_97 = arith.constant dense<0.000000e+00> : vector<16x8xf32>
    %77 = tpu.matmul %6, %76, %cst_97 {dimension_numbers = #tpu.dot_dimension_numbers<[1], [0], [0], [1], [0, 0, 1, 1], [], []>} : vector<16x32xf32>, vector<32x8xf32>, vector<16x8xf32> -> vector<16x8xf32>
    %c1_98 = arith.constant 1 : index
    %c1_99 = arith.constant 1 : index
    %c0_100 = arith.constant 0 : index
    %c0_101 = arith.constant 0 : index
    %c0_102 = arith.constant 0 : index
    %78 = vector.load %arg2[%c1_98, %c1_99, %c0_100, %c0_101, %c0_102] : memref<3x2x4x1x8xf32, #tpu.memory_space<vmem>>, vector<1x1x1x1x8xf32>
    %79 = vector.shape_cast %78 : vector<1x1x1x1x8xf32> to vector<1x8xf32>
    %80 = vector.broadcast %79 : vector<1x8xf32> to vector<16x8xf32>
    %81 = arith.addf %77, %80 : vector<16x8xf32>
    %c1_103 = arith.constant 1 : index
    %c1_104 = arith.constant 1 : index
    %c1_105 = arith.constant 1 : index
    %c0_106 = arith.constant 0 : index
    %c0_107 = arith.constant 0 : index
    %82 = vector.load %arg1[%c1_103, %c1_104, %c1_105, %c0_106, %c0_107] : memref<3x2x4x32x8xf32, #tpu.memory_space<vmem>>, vector<1x1x1x32x8xf32>
    %83 = vector.shape_cast %82 : vector<1x1x1x32x8xf32> to vector<32x8xf32>
    %cst_108 = arith.constant dense<0.000000e+00> : vector<16x8xf32>
    %84 = tpu.matmul %6, %83, %cst_108 {dimension_numbers = #tpu.dot_dimension_numbers<[1], [0], [0], [1], [0, 0, 1, 1], [], []>} : vector<16x32xf32>, vector<32x8xf32>, vector<16x8xf32> -> vector<16x8xf32>
    %c1_109 = arith.constant 1 : index
    %c1_110 = arith.constant 1 : index
    %c1_111 = arith.constant 1 : index
    %c0_112 = arith.constant 0 : index
    %c0_113 = arith.constant 0 : index
    %85 = vector.load %arg2[%c1_109, %c1_110, %c1_111, %c0_112, %c0_113] : memref<3x2x4x1x8xf32, #tpu.memory_space<vmem>>, vector<1x1x1x1x8xf32>
    %86 = vector.shape_cast %85 : vector<1x1x1x1x8xf32> to vector<1x8xf32>
    %87 = vector.broadcast %86 : vector<1x8xf32> to vector<16x8xf32>
    %88 = arith.addf %84, %87 : vector<16x8xf32>
    %c1_114 = arith.constant 1 : index
    %c1_115 = arith.constant 1 : index
    %c2_116 = arith.constant 2 : index
    %c0_117 = arith.constant 0 : index
    %c0_118 = arith.constant 0 : index
    %89 = vector.load %arg1[%c1_114, %c1_115, %c2_116, %c0_117, %c0_118] : memref<3x2x4x32x8xf32, #tpu.memory_space<vmem>>, vector<1x1x1x32x8xf32>
    %90 = vector.shape_cast %89 : vector<1x1x1x32x8xf32> to vector<32x8xf32>
    %cst_119 = arith.constant dense<0.000000e+00> : vector<16x8xf32>
    %91 = tpu.matmul %6, %90, %cst_119 {dimension_numbers = #tpu.dot_dimension_numbers<[1], [0], [0], [1], [0, 0, 1, 1], [], []>} : vector<16x32xf32>, vector<32x8xf32>, vector<16x8xf32> -> vector<16x8xf32>
    %c1_120 = arith.constant 1 : index
    %c1_121 = arith.constant 1 : index
    %c2_122 = arith.constant 2 : index
    %c0_123 = arith.constant 0 : index
    %c0_124 = arith.constant 0 : index
    %92 = vector.load %arg2[%c1_120, %c1_121, %c2_122, %c0_123, %c0_124] : memref<3x2x4x1x8xf32, #tpu.memory_space<vmem>>, vector<1x1x1x1x8xf32>
    %93 = vector.shape_cast %92 : vector<1x1x1x1x8xf32> to vector<1x8xf32>
    %94 = vector.broadcast %93 : vector<1x8xf32> to vector<16x8xf32>
    %95 = arith.addf %91, %94 : vector<16x8xf32>
    %c1_125 = arith.constant 1 : index
    %c1_126 = arith.constant 1 : index
    %c3_127 = arith.constant 3 : index
    %c0_128 = arith.constant 0 : index
    %c0_129 = arith.constant 0 : index
    %96 = vector.load %arg1[%c1_125, %c1_126, %c3_127, %c0_128, %c0_129] : memref<3x2x4x32x8xf32, #tpu.memory_space<vmem>>, vector<1x1x1x32x8xf32>
    %97 = vector.shape_cast %96 : vector<1x1x1x32x8xf32> to vector<32x8xf32>
    %cst_130 = arith.constant dense<0.000000e+00> : vector<16x8xf32>
    %98 = tpu.matmul %6, %97, %cst_130 {dimension_numbers = #tpu.dot_dimension_numbers<[1], [0], [0], [1], [0, 0, 1, 1], [], []>} : vector<16x32xf32>, vector<32x8xf32>, vector<16x8xf32> -> vector<16x8xf32>
    %c1_131 = arith.constant 1 : index
    %c1_132 = arith.constant 1 : index
    %c3_133 = arith.constant 3 : index
    %c0_134 = arith.constant 0 : index
    %c0_135 = arith.constant 0 : index
    %99 = vector.load %arg2[%c1_131, %c1_132, %c3_133, %c0_134, %c0_135] : memref<3x2x4x1x8xf32, #tpu.memory_space<vmem>>, vector<1x1x1x1x8xf32>
    %100 = vector.shape_cast %99 : vector<1x1x1x1x8xf32> to vector<1x8xf32>
    %101 = vector.broadcast %100 : vector<1x8xf32> to vector<16x8xf32>
    %102 = arith.addf %98, %101 : vector<16x8xf32>
    %c2_136 = arith.constant 2 : index
    %c1_137 = arith.constant 1 : index
    %c0_138 = arith.constant 0 : index
    %c0_139 = arith.constant 0 : index
    %c0_140 = arith.constant 0 : index
    %103 = vector.load %arg1[%c2_136, %c1_137, %c0_138, %c0_139, %c0_140] : memref<3x2x4x32x8xf32, #tpu.memory_space<vmem>>, vector<1x1x1x32x8xf32>
    %104 = vector.shape_cast %103 : vector<1x1x1x32x8xf32> to vector<32x8xf32>
    %cst_141 = arith.constant dense<0.000000e+00> : vector<16x8xf32>
    %105 = tpu.matmul %3, %104, %cst_141 {dimension_numbers = #tpu.dot_dimension_numbers<[1], [0], [0], [1], [0, 0, 1, 1], [], []>} : vector<16x32xf32>, vector<32x8xf32>, vector<16x8xf32> -> vector<16x8xf32>
    %c2_142 = arith.constant 2 : index
    %c1_143 = arith.constant 1 : index
    %c0_144 = arith.constant 0 : index
    %c0_145 = arith.constant 0 : index
    %c0_146 = arith.constant 0 : index
    %106 = vector.load %arg2[%c2_142, %c1_143, %c0_144, %c0_145, %c0_146] : memref<3x2x4x1x8xf32, #tpu.memory_space<vmem>>, vector<1x1x1x1x8xf32>
    %107 = vector.shape_cast %106 : vector<1x1x1x1x8xf32> to vector<1x8xf32>
    %108 = vector.broadcast %107 : vector<1x8xf32> to vector<16x8xf32>
    %109 = arith.addf %105, %108 : vector<16x8xf32>
    %c2_147 = arith.constant 2 : index
    %c1_148 = arith.constant 1 : index
    %c1_149 = arith.constant 1 : index
    %c0_150 = arith.constant 0 : index
    %c0_151 = arith.constant 0 : index
    %110 = vector.load %arg1[%c2_147, %c1_148, %c1_149, %c0_150, %c0_151] : memref<3x2x4x32x8xf32, #tpu.memory_space<vmem>>, vector<1x1x1x32x8xf32>
    %111 = vector.shape_cast %110 : vector<1x1x1x32x8xf32> to vector<32x8xf32>
    %cst_152 = arith.constant dense<0.000000e+00> : vector<16x8xf32>
    %112 = tpu.matmul %3, %111, %cst_152 {dimension_numbers = #tpu.dot_dimension_numbers<[1], [0], [0], [1], [0, 0, 1, 1], [], []>} : vector<16x32xf32>, vector<32x8xf32>, vector<16x8xf32> -> vector<16x8xf32>
    %c2_153 = arith.constant 2 : index
    %c1_154 = arith.constant 1 : index
    %c1_155 = arith.constant 1 : index
    %c0_156 = arith.constant 0 : index
    %c0_157 = arith.constant 0 : index
    %113 = vector.load %arg2[%c2_153, %c1_154, %c1_155, %c0_156, %c0_157] : memref<3x2x4x1x8xf32, #tpu.memory_space<vmem>>, vector<1x1x1x1x8xf32>
    %114 = vector.shape_cast %113 : vector<1x1x1x1x8xf32> to vector<1x8xf32>
    %115 = vector.broadcast %114 : vector<1x8xf32> to vector<16x8xf32>
    %116 = arith.addf %112, %115 : vector<16x8xf32>
    %c2_158 = arith.constant 2 : index
    %c1_159 = arith.constant 1 : index
    %c2_160 = arith.constant 2 : index
    %c0_161 = arith.constant 0 : index
    %c0_162 = arith.constant 0 : index
    %117 = vector.load %arg1[%c2_158, %c1_159, %c2_160, %c0_161, %c0_162] : memref<3x2x4x32x8xf32, #tpu.memory_space<vmem>>, vector<1x1x1x32x8xf32>
    %118 = vector.shape_cast %117 : vector<1x1x1x32x8xf32> to vector<32x8xf32>
    %cst_163 = arith.constant dense<0.000000e+00> : vector<16x8xf32>
    %119 = tpu.matmul %3, %118, %cst_163 {dimension_numbers = #tpu.dot_dimension_numbers<[1], [0], [0], [1], [0, 0, 1, 1], [], []>} : vector<16x32xf32>, vector<32x8xf32>, vector<16x8xf32> -> vector<16x8xf32>
    %c2_164 = arith.constant 2 : index
    %c1_165 = arith.constant 1 : index
    %c2_166 = arith.constant 2 : index
    %c0_167 = arith.constant 0 : index
    %c0_168 = arith.constant 0 : index
    %120 = vector.load %arg2[%c2_164, %c1_165, %c2_166, %c0_167, %c0_168] : memref<3x2x4x1x8xf32, #tpu.memory_space<vmem>>, vector<1x1x1x1x8xf32>
    %121 = vector.shape_cast %120 : vector<1x1x1x1x8xf32> to vector<1x8xf32>
    %122 = vector.broadcast %121 : vector<1x8xf32> to vector<16x8xf32>
    %123 = arith.addf %119, %122 : vector<16x8xf32>
    %c2_169 = arith.constant 2 : index
    %c1_170 = arith.constant 1 : index
    %c3_171 = arith.constant 3 : index
    %c0_172 = arith.constant 0 : index
    %c0_173 = arith.constant 0 : index
    %124 = vector.load %arg1[%c2_169, %c1_170, %c3_171, %c0_172, %c0_173] : memref<3x2x4x32x8xf32, #tpu.memory_space<vmem>>, vector<1x1x1x32x8xf32>
    %125 = vector.shape_cast %124 : vector<1x1x1x32x8xf32> to vector<32x8xf32>
    %cst_174 = arith.constant dense<0.000000e+00> : vector<16x8xf32>
    %126 = tpu.matmul %3, %125, %cst_174 {dimension_numbers = #tpu.dot_dimension_numbers<[1], [0], [0], [1], [0, 0, 1, 1], [], []>} : vector<16x32xf32>, vector<32x8xf32>, vector<16x8xf32> -> vector<16x8xf32>
    %c2_175 = arith.constant 2 : index
    %c1_176 = arith.constant 1 : index
    %c3_177 = arith.constant 3 : index
    %c0_178 = arith.constant 0 : index
    %c0_179 = arith.constant 0 : index
    %127 = vector.load %arg2[%c2_175, %c1_176, %c3_177, %c0_178, %c0_179] : memref<3x2x4x1x8xf32, #tpu.memory_space<vmem>>, vector<1x1x1x1x8xf32>
    %128 = vector.shape_cast %127 : vector<1x1x1x1x8xf32> to vector<1x8xf32>
    %129 = vector.broadcast %128 : vector<1x8xf32> to vector<16x8xf32>
    %130 = arith.addf %126, %129 : vector<16x8xf32>
    %131 = vector.shape_cast %81 : vector<16x8xf32> to vector<1x16x8xf32>
    %132 = vector.shape_cast %88 : vector<16x8xf32> to vector<1x16x8xf32>
    %133 = vector.shape_cast %95 : vector<16x8xf32> to vector<1x16x8xf32>
    %134 = vector.shape_cast %102 : vector<16x8xf32> to vector<1x16x8xf32>
    %135 = tpu.concatenate %131, %132, %133, %134 in 0 : vector<1x16x8xf32>, vector<1x16x8xf32>, vector<1x16x8xf32>, vector<1x16x8xf32> -> vector<4x16x8xf32>
    %136 = vector.shape_cast %135 : vector<4x16x8xf32> to vector<8x8x8xf32>
    %137 = vector.shape_cast %109 : vector<16x8xf32> to vector<1x16x8xf32>
    %138 = vector.shape_cast %116 : vector<16x8xf32> to vector<1x16x8xf32>
    %139 = vector.shape_cast %123 : vector<16x8xf32> to vector<1x16x8xf32>
    %140 = vector.shape_cast %130 : vector<16x8xf32> to vector<1x16x8xf32>
    %141 = tpu.concatenate %137, %138, %139, %140 in 0 : vector<1x16x8xf32>, vector<1x16x8xf32>, vector<1x16x8xf32>, vector<1x16x8xf32> -> vector<4x16x8xf32>
    %142 = vector.shape_cast %141 : vector<4x16x8xf32> to vector<8x8x8xf32>
    %c0_180 = arith.constant 0 : index
    %c0_181 = arith.constant 0 : index
    %c0_182 = arith.constant 0 : index
    %143 = vector.load %arg7[%c0_180, %c0_181, %c0_182] : memref<14x1x32xf32, #tpu.memory_space<vmem>>, vector<1x1x32xf32>
    %144 = vector.shape_cast %143 : vector<1x1x32xf32> to vector<1x32xf32>
    %c1_183 = arith.constant 1 : index
    %c0_184 = arith.constant 0 : index
    %c0_185 = arith.constant 0 : index
    %145 = vector.load %arg7[%c1_183, %c0_184, %c0_185] : memref<14x1x32xf32, #tpu.memory_space<vmem>>, vector<1x1x32xf32>
    %146 = vector.shape_cast %145 : vector<1x1x32xf32> to vector<1x32xf32>
    %c2_186 = arith.constant 2 : index
    %c0_187 = arith.constant 0 : index
    %c0_188 = arith.constant 0 : index
    %147 = vector.load %arg7[%c2_186, %c0_187, %c0_188] : memref<14x1x32xf32, #tpu.memory_space<vmem>>, vector<1x1x32xf32>
    %148 = vector.shape_cast %147 : vector<1x1x32xf32> to vector<1x32xf32>
    %c3_189 = arith.constant 3 : index
    %c0_190 = arith.constant 0 : index
    %c0_191 = arith.constant 0 : index
    %149 = vector.load %arg7[%c3_189, %c0_190, %c0_191] : memref<14x1x32xf32, #tpu.memory_space<vmem>>, vector<1x1x32xf32>
    %150 = vector.shape_cast %149 : vector<1x1x32xf32> to vector<1x32xf32>
    %c4 = arith.constant 4 : index
    %c0_192 = arith.constant 0 : index
    %c0_193 = arith.constant 0 : index
    %151 = vector.load %arg7[%c4, %c0_192, %c0_193] : memref<14x1x32xf32, #tpu.memory_space<vmem>>, vector<1x1x32xf32>
    %152 = vector.shape_cast %151 : vector<1x1x32xf32> to vector<1x32xf32>
    %c5 = arith.constant 5 : index
    %c0_194 = arith.constant 0 : index
    %c0_195 = arith.constant 0 : index
    %153 = vector.load %arg7[%c5, %c0_194, %c0_195] : memref<14x1x32xf32, #tpu.memory_space<vmem>>, vector<1x1x32xf32>
    %154 = vector.shape_cast %153 : vector<1x1x32xf32> to vector<1x32xf32>
    %c0_196 = arith.constant 0 : index
    %c0_197 = arith.constant 0 : index
    %c0_198 = arith.constant 0 : index
    %155 = vector.load %arg6[%c0_196, %c0_197, %c0_198] : memref<2x1x64xf32, #tpu.memory_space<vmem>>, vector<1x1x64xf32>
    %156 = vector.shape_cast %155 : vector<1x1x64xf32> to vector<1x64xf32>
    %157 = arith.addf %1, %5 : vector<16x32xf32>
    %c0_199 = arith.constant 0 : index
    %c0_200 = arith.constant 0 : index
    %c0_201 = arith.constant 0 : index
    %c0_202 = arith.constant 0 : index
    %c0_203 = arith.constant 0 : index
    %158 = vector.load %arg1[%c0_199, %c0_200, %c0_201, %c0_202, %c0_203] : memref<3x2x4x32x8xf32, #tpu.memory_space<vmem>>, vector<1x1x1x32x8xf32>
    %159 = vector.shape_cast %158 : vector<1x1x1x32x8xf32> to vector<32x8xf32>
    %cst_204 = arith.constant dense<0.000000e+00> : vector<16x8xf32>
    %160 = tpu.matmul %157, %159, %cst_204 {dimension_numbers = #tpu.dot_dimension_numbers<[1], [0], [0], [1], [0, 0, 1, 1], [], []>} : vector<16x32xf32>, vector<32x8xf32>, vector<16x8xf32> -> vector<16x8xf32>
    %c0_205 = arith.constant 0 : index
    %c0_206 = arith.constant 0 : index
    %c0_207 = arith.constant 0 : index
    %c0_208 = arith.constant 0 : index
    %c0_209 = arith.constant 0 : index
    %161 = vector.load %arg2[%c0_205, %c0_206, %c0_207, %c0_208, %c0_209] : memref<3x2x4x1x8xf32, #tpu.memory_space<vmem>>, vector<1x1x1x1x8xf32>
    %162 = vector.shape_cast %161 : vector<1x1x1x1x8xf32> to vector<1x8xf32>
    %163 = vector.broadcast %162 : vector<1x8xf32> to vector<16x8xf32>
    %164 = arith.addf %160, %163 : vector<16x8xf32>
    %c0_210 = arith.constant 0 : index
    %c0_211 = arith.constant 0 : index
    %c1_212 = arith.constant 1 : index
    %c0_213 = arith.constant 0 : index
    %c0_214 = arith.constant 0 : index
    %165 = vector.load %arg1[%c0_210, %c0_211, %c1_212, %c0_213, %c0_214] : memref<3x2x4x32x8xf32, #tpu.memory_space<vmem>>, vector<1x1x1x32x8xf32>
    %166 = vector.shape_cast %165 : vector<1x1x1x32x8xf32> to vector<32x8xf32>
    %cst_215 = arith.constant dense<0.000000e+00> : vector<16x8xf32>
    %167 = tpu.matmul %157, %166, %cst_215 {dimension_numbers = #tpu.dot_dimension_numbers<[1], [0], [0], [1], [0, 0, 1, 1], [], []>} : vector<16x32xf32>, vector<32x8xf32>, vector<16x8xf32> -> vector<16x8xf32>
    %c0_216 = arith.constant 0 : index
    %c0_217 = arith.constant 0 : index
    %c1_218 = arith.constant 1 : index
    %c0_219 = arith.constant 0 : index
    %c0_220 = arith.constant 0 : index
    %168 = vector.load %arg2[%c0_216, %c0_217, %c1_218, %c0_219, %c0_220] : memref<3x2x4x1x8xf32, #tpu.memory_space<vmem>>, vector<1x1x1x1x8xf32>
    %169 = vector.shape_cast %168 : vector<1x1x1x1x8xf32> to vector<1x8xf32>
    %170 = vector.broadcast %169 : vector<1x8xf32> to vector<16x8xf32>
    %171 = arith.addf %167, %170 : vector<16x8xf32>
    %c0_221 = arith.constant 0 : index
    %c0_222 = arith.constant 0 : index
    %c2_223 = arith.constant 2 : index
    %c0_224 = arith.constant 0 : index
    %c0_225 = arith.constant 0 : index
    %172 = vector.load %arg1[%c0_221, %c0_222, %c2_223, %c0_224, %c0_225] : memref<3x2x4x32x8xf32, #tpu.memory_space<vmem>>, vector<1x1x1x32x8xf32>
    %173 = vector.shape_cast %172 : vector<1x1x1x32x8xf32> to vector<32x8xf32>
    %cst_226 = arith.constant dense<0.000000e+00> : vector<16x8xf32>
    %174 = tpu.matmul %157, %173, %cst_226 {dimension_numbers = #tpu.dot_dimension_numbers<[1], [0], [0], [1], [0, 0, 1, 1], [], []>} : vector<16x32xf32>, vector<32x8xf32>, vector<16x8xf32> -> vector<16x8xf32>
    %c0_227 = arith.constant 0 : index
    %c0_228 = arith.constant 0 : index
    %c2_229 = arith.constant 2 : index
    %c0_230 = arith.constant 0 : index
    %c0_231 = arith.constant 0 : index
    %175 = vector.load %arg2[%c0_227, %c0_228, %c2_229, %c0_230, %c0_231] : memref<3x2x4x1x8xf32, #tpu.memory_space<vmem>>, vector<1x1x1x1x8xf32>
    %176 = vector.shape_cast %175 : vector<1x1x1x1x8xf32> to vector<1x8xf32>
    %177 = vector.broadcast %176 : vector<1x8xf32> to vector<16x8xf32>
    %178 = arith.addf %174, %177 : vector<16x8xf32>
    %c0_232 = arith.constant 0 : index
    %c0_233 = arith.constant 0 : index
    %c3_234 = arith.constant 3 : index
    %c0_235 = arith.constant 0 : index
    %c0_236 = arith.constant 0 : index
    %179 = vector.load %arg1[%c0_232, %c0_233, %c3_234, %c0_235, %c0_236] : memref<3x2x4x32x8xf32, #tpu.memory_space<vmem>>, vector<1x1x1x32x8xf32>
    %180 = vector.shape_cast %179 : vector<1x1x1x32x8xf32> to vector<32x8xf32>
    %cst_237 = arith.constant dense<0.000000e+00> : vector<16x8xf32>
    %181 = tpu.matmul %157, %180, %cst_237 {dimension_numbers = #tpu.dot_dimension_numbers<[1], [0], [0], [1], [0, 0, 1, 1], [], []>} : vector<16x32xf32>, vector<32x8xf32>, vector<16x8xf32> -> vector<16x8xf32>
    %c0_238 = arith.constant 0 : index
    %c0_239 = arith.constant 0 : index
    %c3_240 = arith.constant 3 : index
    %c0_241 = arith.constant 0 : index
    %c0_242 = arith.constant 0 : index
    %182 = vector.load %arg2[%c0_238, %c0_239, %c3_240, %c0_241, %c0_242] : memref<3x2x4x1x8xf32, #tpu.memory_space<vmem>>, vector<1x1x1x1x8xf32>
    %183 = vector.shape_cast %182 : vector<1x1x1x1x8xf32> to vector<1x8xf32>
    %184 = vector.broadcast %183 : vector<1x8xf32> to vector<16x8xf32>
    %185 = arith.addf %181, %184 : vector<16x8xf32>
    %186 = vector.shape_cast %164 : vector<16x8xf32> to vector<1x16x8xf32>
    %187 = vector.shape_cast %171 : vector<16x8xf32> to vector<1x16x8xf32>
    %188 = vector.shape_cast %178 : vector<16x8xf32> to vector<1x16x8xf32>
    %189 = vector.shape_cast %185 : vector<16x8xf32> to vector<1x16x8xf32>
    %190 = tpu.concatenate %186, %187, %188, %189 in 0 : vector<1x16x8xf32>, vector<1x16x8xf32>, vector<1x16x8xf32>, vector<1x16x8xf32> -> vector<4x16x8xf32>
    %191 = vector.shape_cast %190 : vector<4x16x8xf32> to vector<8x8x8xf32>
    "tpu.trace_start"() <{level = 10 : i32, message = "gqd,gkd->gqk"}> : () -> ()
    %cst_243 = arith.constant dense<0.000000e+00> : vector<8x8x8xf32>
    %192 = tpu.matmul %191, %68, %cst_243 {dimension_numbers = #tpu.dot_dimension_numbers<[2], [2], [1], [1], [0, 0, 0, 1, 1, 1], [0], [0]>} : vector<8x8x8xf32>, vector<8x8x8xf32>, vector<8x8x8xf32> -> vector<8x8x8xf32>
    "tpu.trace_stop"() : () -> ()
    %cst_244 = arith.constant 0.353553385 : f32
    %193 = vector.broadcast %cst_244 : f32 to vector<8x8x8xf32>
    %194 = arith.mulf %192, %193 : vector<8x8x8xf32>
    %cst_245 = arith.constant dense<0xFF800000> : vector<8x8xf32>
    %195 = vector.multi_reduction <maximumf>, %194, %cst_245 [2] : vector<8x8x8xf32> to vector<8x8xf32>
    %196 = vector.shape_cast %195 : vector<8x8xf32> to vector<8x8x1xf32>
    %197 = vector.broadcast %196 : vector<8x8x1xf32> to vector<8x8x8xf32>
    %198 = arith.subf %194, %197 : vector<8x8x8xf32>
    %199 = math.exp %198 : vector<8x8x8xf32>
    %cst_246 = arith.constant dense<0.000000e+00> : vector<8x8xf32>
    %200 = vector.multi_reduction <add>, %199, %cst_246 [2] : vector<8x8x8xf32> to vector<8x8xf32>
    %201 = vector.shape_cast %200 : vector<8x8xf32> to vector<8x8x1xf32>
    %202 = vector.broadcast %201 : vector<8x8x1xf32> to vector<8x8x8xf32>
    %203 = arith.divf %199, %202 : vector<8x8x8xf32>
    "tpu.trace_start"() <{level = 10 : i32, message = "gqk,gkd->gqd"}> : () -> ()
    %cst_247 = arith.constant dense<0.000000e+00> : vector<8x8x8xf32>
    %204 = tpu.matmul %203, %74, %cst_247 {dimension_numbers = #tpu.dot_dimension_numbers<[2], [1], [1], [2], [0, 0, 0, 1, 1, 2], [0], [0]>} : vector<8x8x8xf32>, vector<8x8x8xf32>, vector<8x8x8xf32> -> vector<8x8x8xf32>
    "tpu.trace_stop"() : () -> ()
    %205 = vector.shape_cast %204 : vector<8x8x8xf32> to vector<4x16x8xf32>
    %c0_248 = arith.constant 0 : index
    %c0_249 = arith.constant 0 : index
    %c0_250 = arith.constant 0 : index
    %c0_251 = arith.constant 0 : index
    %206 = vector.load %arg3[%c0_248, %c0_249, %c0_250, %c0_251] : memref<2x4x8x32xf32, #tpu.memory_space<vmem>>, vector<1x4x8x32xf32>
    %207 = vector.shape_cast %206 : vector<1x4x8x32xf32> to vector<4x8x32xf32>
    "tpu.trace_start"() <{level = 10 : i32, message = "hnd,hde->hne"}> : () -> ()
    %cst_252 = arith.constant dense<0.000000e+00> : vector<4x16x32xf32>
    %208 = tpu.matmul %205, %207, %cst_252 {dimension_numbers = #tpu.dot_dimension_numbers<[2], [1], [1], [2], [0, 0, 0, 1, 1, 2], [0], [0]>} : vector<4x16x8xf32>, vector<4x8x32xf32>, vector<4x16x32xf32> -> vector<4x16x32xf32>
    "tpu.trace_stop"() : () -> ()
    %cst_253 = arith.constant dense<0.000000e+00> : vector<16x32xf32>
    %209 = vector.multi_reduction <add>, %208, %cst_253 [0] : vector<4x16x32xf32> to vector<16x32xf32>
    %210 = vector.broadcast %144 : vector<1x32xf32> to vector<16x32xf32>
    %211 = arith.addf %209, %210 : vector<16x32xf32>
    %212 = arith.addf %1, %211 : vector<16x32xf32>
    %cst_254 = arith.constant dense<0.000000e+00> : vector<16xf32>
    %213 = vector.multi_reduction <add>, %212, %cst_254 [1] : vector<16x32xf32> to vector<16xf32>
    %214 = vector.shape_cast %213 : vector<16xf32> to vector<16x1xf32>
    %cst_255 = arith.constant 3.200000e+01 : f32
    %215 = vector.broadcast %cst_255 : f32 to vector<16x1xf32>
    %216 = arith.divf %214, %215 : vector<16x1xf32>
    %217 = arith.mulf %212, %212 : vector<16x32xf32>
    %cst_256 = arith.constant dense<0.000000e+00> : vector<16xf32>
    %218 = vector.multi_reduction <add>, %217, %cst_256 [1] : vector<16x32xf32> to vector<16xf32>
    %219 = vector.shape_cast %218 : vector<16xf32> to vector<16x1xf32>
    %cst_257 = arith.constant 3.200000e+01 : f32
    %220 = vector.broadcast %cst_257 : f32 to vector<16x1xf32>
    %221 = arith.divf %219, %220 : vector<16x1xf32>
    %222 = arith.mulf %216, %216 : vector<16x1xf32>
    %223 = arith.subf %221, %222 : vector<16x1xf32>
    %224 = vector.broadcast %216 : vector<16x1xf32> to vector<16x32xf32>
    %225 = arith.subf %212, %224 : vector<16x32xf32>
    %cst_258 = arith.constant 9.99999974E-6 : f32
    %226 = vector.broadcast %cst_258 : f32 to vector<16x1xf32>
    %227 = arith.addf %223, %226 : vector<16x1xf32>
    %228 = math.rsqrt %227 : vector<16x1xf32>
    %229 = vector.broadcast %228 : vector<16x1xf32> to vector<16x32xf32>
    %230 = arith.mulf %225, %229 : vector<16x32xf32>
    %231 = vector.broadcast %146 : vector<1x32xf32> to vector<16x32xf32>
    %232 = arith.mulf %230, %231 : vector<16x32xf32>
    %233 = vector.broadcast %148 : vector<1x32xf32> to vector<16x32xf32>
    %234 = arith.addf %232, %233 : vector<16x32xf32>
    %c0_259 = arith.constant 0 : index
    %c0_260 = arith.constant 0 : index
    %c0_261 = arith.constant 0 : index
    %235 = vector.load %arg4[%c0_259, %c0_260, %c0_261] : memref<2x32x64xf32, #tpu.memory_space<vmem>>, vector<1x32x64xf32>
    %236 = vector.shape_cast %235 : vector<1x32x64xf32> to vector<32x64xf32>
    %cst_262 = arith.constant dense<0.000000e+00> : vector<16x64xf32>
    %237 = tpu.matmul %234, %236, %cst_262 {dimension_numbers = #tpu.dot_dimension_numbers<[1], [0], [0], [1], [0, 0, 1, 1], [], []>} : vector<16x32xf32>, vector<32x64xf32>, vector<16x64xf32> -> vector<16x64xf32>
    %238 = vector.broadcast %156 : vector<1x64xf32> to vector<16x64xf32>
    %239 = arith.addf %237, %238 : vector<16x64xf32>
    %cst_263 = arith.constant 0.000000e+00 : f32
    %240 = vector.broadcast %cst_263 : f32 to vector<16x64xf32>
    %241 = arith.maximumf %239, %240 : vector<16x64xf32>
    %c0_264 = arith.constant 0 : index
    %c0_265 = arith.constant 0 : index
    %c0_266 = arith.constant 0 : index
    %242 = vector.load %arg5[%c0_264, %c0_265, %c0_266] : memref<2x64x32xf32, #tpu.memory_space<vmem>>, vector<1x64x32xf32>
    %243 = vector.shape_cast %242 : vector<1x64x32xf32> to vector<64x32xf32>
    %cst_267 = arith.constant dense<0.000000e+00> : vector<16x32xf32>
    %244 = tpu.matmul %241, %243, %cst_267 {dimension_numbers = #tpu.dot_dimension_numbers<[1], [0], [0], [1], [0, 0, 1, 1], [], []>} : vector<16x64xf32>, vector<64x32xf32>, vector<16x32xf32> -> vector<16x32xf32>
    %245 = vector.broadcast %150 : vector<1x32xf32> to vector<16x32xf32>
    %246 = arith.addf %244, %245 : vector<16x32xf32>
    %247 = arith.addf %234, %246 : vector<16x32xf32>
    %cst_268 = arith.constant dense<0.000000e+00> : vector<16xf32>
    %248 = vector.multi_reduction <add>, %247, %cst_268 [1] : vector<16x32xf32> to vector<16xf32>
    %249 = vector.shape_cast %248 : vector<16xf32> to vector<16x1xf32>
    %cst_269 = arith.constant 3.200000e+01 : f32
    %250 = vector.broadcast %cst_269 : f32 to vector<16x1xf32>
    %251 = arith.divf %249, %250 : vector<16x1xf32>
    %252 = arith.mulf %247, %247 : vector<16x32xf32>
    %cst_270 = arith.constant dense<0.000000e+00> : vector<16xf32>
    %253 = vector.multi_reduction <add>, %252, %cst_270 [1] : vector<16x32xf32> to vector<16xf32>
    %254 = vector.shape_cast %253 : vector<16xf32> to vector<16x1xf32>
    %cst_271 = arith.constant 3.200000e+01 : f32
    %255 = vector.broadcast %cst_271 : f32 to vector<16x1xf32>
    %256 = arith.divf %254, %255 : vector<16x1xf32>
    %257 = arith.mulf %251, %251 : vector<16x1xf32>
    %258 = arith.subf %256, %257 : vector<16x1xf32>
    %259 = vector.broadcast %251 : vector<16x1xf32> to vector<16x32xf32>
    %260 = arith.subf %247, %259 : vector<16x32xf32>
    %cst_272 = arith.constant 9.99999974E-6 : f32
    %261 = vector.broadcast %cst_272 : f32 to vector<16x1xf32>
    %262 = arith.addf %258, %261 : vector<16x1xf32>
    %263 = math.rsqrt %262 : vector<16x1xf32>
    %264 = vector.broadcast %263 : vector<16x1xf32> to vector<16x32xf32>
    %265 = arith.mulf %260, %264 : vector<16x32xf32>
    %266 = vector.broadcast %152 : vector<1x32xf32> to vector<16x32xf32>
    %267 = arith.mulf %265, %266 : vector<16x32xf32>
    %268 = vector.broadcast %154 : vector<1x32xf32> to vector<16x32xf32>
    %269 = arith.addf %267, %268 : vector<16x32xf32>
    %c6 = arith.constant 6 : index
    %c0_273 = arith.constant 0 : index
    %c0_274 = arith.constant 0 : index
    %270 = vector.load %arg7[%c6, %c0_273, %c0_274] : memref<14x1x32xf32, #tpu.memory_space<vmem>>, vector<1x1x32xf32>
    %271 = vector.shape_cast %270 : vector<1x1x32xf32> to vector<1x32xf32>
    %c7 = arith.constant 7 : index
    %c0_275 = arith.constant 0 : index
    %c0_276 = arith.constant 0 : index
    %272 = vector.load %arg7[%c7, %c0_275, %c0_276] : memref<14x1x32xf32, #tpu.memory_space<vmem>>, vector<1x1x32xf32>
    %273 = vector.shape_cast %272 : vector<1x1x32xf32> to vector<1x32xf32>
    %c8 = arith.constant 8 : index
    %c0_277 = arith.constant 0 : index
    %c0_278 = arith.constant 0 : index
    %274 = vector.load %arg7[%c8, %c0_277, %c0_278] : memref<14x1x32xf32, #tpu.memory_space<vmem>>, vector<1x1x32xf32>
    %275 = vector.shape_cast %274 : vector<1x1x32xf32> to vector<1x32xf32>
    %c9 = arith.constant 9 : index
    %c0_279 = arith.constant 0 : index
    %c0_280 = arith.constant 0 : index
    %276 = vector.load %arg7[%c9, %c0_279, %c0_280] : memref<14x1x32xf32, #tpu.memory_space<vmem>>, vector<1x1x32xf32>
    %277 = vector.shape_cast %276 : vector<1x1x32xf32> to vector<1x32xf32>
    %c10 = arith.constant 10 : index
    %c0_281 = arith.constant 0 : index
    %c0_282 = arith.constant 0 : index
    %278 = vector.load %arg7[%c10, %c0_281, %c0_282] : memref<14x1x32xf32, #tpu.memory_space<vmem>>, vector<1x1x32xf32>
    %279 = vector.shape_cast %278 : vector<1x1x32xf32> to vector<1x32xf32>
    %c11 = arith.constant 11 : index
    %c0_283 = arith.constant 0 : index
    %c0_284 = arith.constant 0 : index
    %280 = vector.load %arg7[%c11, %c0_283, %c0_284] : memref<14x1x32xf32, #tpu.memory_space<vmem>>, vector<1x1x32xf32>
    %281 = vector.shape_cast %280 : vector<1x1x32xf32> to vector<1x32xf32>
    %c1_285 = arith.constant 1 : index
    %c0_286 = arith.constant 0 : index
    %c0_287 = arith.constant 0 : index
    %282 = vector.load %arg6[%c1_285, %c0_286, %c0_287] : memref<2x1x64xf32, #tpu.memory_space<vmem>>, vector<1x1x64xf32>
    %283 = vector.shape_cast %282 : vector<1x1x64xf32> to vector<1x64xf32>
    %284 = arith.addf %269, %5 : vector<16x32xf32>
    %c0_288 = arith.constant 0 : index
    %c1_289 = arith.constant 1 : index
    %c0_290 = arith.constant 0 : index
    %c0_291 = arith.constant 0 : index
    %c0_292 = arith.constant 0 : index
    %285 = vector.load %arg1[%c0_288, %c1_289, %c0_290, %c0_291, %c0_292] : memref<3x2x4x32x8xf32, #tpu.memory_space<vmem>>, vector<1x1x1x32x8xf32>
    %286 = vector.shape_cast %285 : vector<1x1x1x32x8xf32> to vector<32x8xf32>
    %cst_293 = arith.constant dense<0.000000e+00> : vector<16x8xf32>
    %287 = tpu.matmul %284, %286, %cst_293 {dimension_numbers = #tpu.dot_dimension_numbers<[1], [0], [0], [1], [0, 0, 1, 1], [], []>} : vector<16x32xf32>, vector<32x8xf32>, vector<16x8xf32> -> vector<16x8xf32>
    %c0_294 = arith.constant 0 : index
    %c1_295 = arith.constant 1 : index
    %c0_296 = arith.constant 0 : index
    %c0_297 = arith.constant 0 : index
    %c0_298 = arith.constant 0 : index
    %288 = vector.load %arg2[%c0_294, %c1_295, %c0_296, %c0_297, %c0_298] : memref<3x2x4x1x8xf32, #tpu.memory_space<vmem>>, vector<1x1x1x1x8xf32>
    %289 = vector.shape_cast %288 : vector<1x1x1x1x8xf32> to vector<1x8xf32>
    %290 = vector.broadcast %289 : vector<1x8xf32> to vector<16x8xf32>
    %291 = arith.addf %287, %290 : vector<16x8xf32>
    %c0_299 = arith.constant 0 : index
    %c1_300 = arith.constant 1 : index
    %c1_301 = arith.constant 1 : index
    %c0_302 = arith.constant 0 : index
    %c0_303 = arith.constant 0 : index
    %292 = vector.load %arg1[%c0_299, %c1_300, %c1_301, %c0_302, %c0_303] : memref<3x2x4x32x8xf32, #tpu.memory_space<vmem>>, vector<1x1x1x32x8xf32>
    %293 = vector.shape_cast %292 : vector<1x1x1x32x8xf32> to vector<32x8xf32>
    %cst_304 = arith.constant dense<0.000000e+00> : vector<16x8xf32>
    %294 = tpu.matmul %284, %293, %cst_304 {dimension_numbers = #tpu.dot_dimension_numbers<[1], [0], [0], [1], [0, 0, 1, 1], [], []>} : vector<16x32xf32>, vector<32x8xf32>, vector<16x8xf32> -> vector<16x8xf32>
    %c0_305 = arith.constant 0 : index
    %c1_306 = arith.constant 1 : index
    %c1_307 = arith.constant 1 : index
    %c0_308 = arith.constant 0 : index
    %c0_309 = arith.constant 0 : index
    %295 = vector.load %arg2[%c0_305, %c1_306, %c1_307, %c0_308, %c0_309] : memref<3x2x4x1x8xf32, #tpu.memory_space<vmem>>, vector<1x1x1x1x8xf32>
    %296 = vector.shape_cast %295 : vector<1x1x1x1x8xf32> to vector<1x8xf32>
    %297 = vector.broadcast %296 : vector<1x8xf32> to vector<16x8xf32>
    %298 = arith.addf %294, %297 : vector<16x8xf32>
    %c0_310 = arith.constant 0 : index
    %c1_311 = arith.constant 1 : index
    %c2_312 = arith.constant 2 : index
    %c0_313 = arith.constant 0 : index
    %c0_314 = arith.constant 0 : index
    %299 = vector.load %arg1[%c0_310, %c1_311, %c2_312, %c0_313, %c0_314] : memref<3x2x4x32x8xf32, #tpu.memory_space<vmem>>, vector<1x1x1x32x8xf32>
    %300 = vector.shape_cast %299 : vector<1x1x1x32x8xf32> to vector<32x8xf32>
    %cst_315 = arith.constant dense<0.000000e+00> : vector<16x8xf32>
    %301 = tpu.matmul %284, %300, %cst_315 {dimension_numbers = #tpu.dot_dimension_numbers<[1], [0], [0], [1], [0, 0, 1, 1], [], []>} : vector<16x32xf32>, vector<32x8xf32>, vector<16x8xf32> -> vector<16x8xf32>
    %c0_316 = arith.constant 0 : index
    %c1_317 = arith.constant 1 : index
    %c2_318 = arith.constant 2 : index
    %c0_319 = arith.constant 0 : index
    %c0_320 = arith.constant 0 : index
    %302 = vector.load %arg2[%c0_316, %c1_317, %c2_318, %c0_319, %c0_320] : memref<3x2x4x1x8xf32, #tpu.memory_space<vmem>>, vector<1x1x1x1x8xf32>
    %303 = vector.shape_cast %302 : vector<1x1x1x1x8xf32> to vector<1x8xf32>
    %304 = vector.broadcast %303 : vector<1x8xf32> to vector<16x8xf32>
    %305 = arith.addf %301, %304 : vector<16x8xf32>
    %c0_321 = arith.constant 0 : index
    %c1_322 = arith.constant 1 : index
    %c3_323 = arith.constant 3 : index
    %c0_324 = arith.constant 0 : index
    %c0_325 = arith.constant 0 : index
    %306 = vector.load %arg1[%c0_321, %c1_322, %c3_323, %c0_324, %c0_325] : memref<3x2x4x32x8xf32, #tpu.memory_space<vmem>>, vector<1x1x1x32x8xf32>
    %307 = vector.shape_cast %306 : vector<1x1x1x32x8xf32> to vector<32x8xf32>
    %cst_326 = arith.constant dense<0.000000e+00> : vector<16x8xf32>
    %308 = tpu.matmul %284, %307, %cst_326 {dimension_numbers = #tpu.dot_dimension_numbers<[1], [0], [0], [1], [0, 0, 1, 1], [], []>} : vector<16x32xf32>, vector<32x8xf32>, vector<16x8xf32> -> vector<16x8xf32>
    %c0_327 = arith.constant 0 : index
    %c1_328 = arith.constant 1 : index
    %c3_329 = arith.constant 3 : index
    %c0_330 = arith.constant 0 : index
    %c0_331 = arith.constant 0 : index
    %309 = vector.load %arg2[%c0_327, %c1_328, %c3_329, %c0_330, %c0_331] : memref<3x2x4x1x8xf32, #tpu.memory_space<vmem>>, vector<1x1x1x1x8xf32>
    %310 = vector.shape_cast %309 : vector<1x1x1x1x8xf32> to vector<1x8xf32>
    %311 = vector.broadcast %310 : vector<1x8xf32> to vector<16x8xf32>
    %312 = arith.addf %308, %311 : vector<16x8xf32>
    %313 = vector.shape_cast %291 : vector<16x8xf32> to vector<1x16x8xf32>
    %314 = vector.shape_cast %298 : vector<16x8xf32> to vector<1x16x8xf32>
    %315 = vector.shape_cast %305 : vector<16x8xf32> to vector<1x16x8xf32>
    %316 = vector.shape_cast %312 : vector<16x8xf32> to vector<1x16x8xf32>
    %317 = tpu.concatenate %313, %314, %315, %316 in 0 : vector<1x16x8xf32>, vector<1x16x8xf32>, vector<1x16x8xf32>, vector<1x16x8xf32> -> vector<4x16x8xf32>
    %318 = vector.shape_cast %317 : vector<4x16x8xf32> to vector<8x8x8xf32>
    "tpu.trace_start"() <{level = 10 : i32, message = "gqd,gkd->gqk"}> : () -> ()
    %cst_332 = arith.constant dense<0.000000e+00> : vector<8x8x8xf32>
    %319 = tpu.matmul %318, %136, %cst_332 {dimension_numbers = #tpu.dot_dimension_numbers<[2], [2], [1], [1], [0, 0, 0, 1, 1, 1], [0], [0]>} : vector<8x8x8xf32>, vector<8x8x8xf32>, vector<8x8x8xf32> -> vector<8x8x8xf32>
    "tpu.trace_stop"() : () -> ()
    %cst_333 = arith.constant 0.353553385 : f32
    %320 = vector.broadcast %cst_333 : f32 to vector<8x8x8xf32>
    %321 = arith.mulf %319, %320 : vector<8x8x8xf32>
    %cst_334 = arith.constant dense<0xFF800000> : vector<8x8xf32>
    %322 = vector.multi_reduction <maximumf>, %321, %cst_334 [2] : vector<8x8x8xf32> to vector<8x8xf32>
    %323 = vector.shape_cast %322 : vector<8x8xf32> to vector<8x8x1xf32>
    %324 = vector.broadcast %323 : vector<8x8x1xf32> to vector<8x8x8xf32>
    %325 = arith.subf %321, %324 : vector<8x8x8xf32>
    %326 = math.exp %325 : vector<8x8x8xf32>
    %cst_335 = arith.constant dense<0.000000e+00> : vector<8x8xf32>
    %327 = vector.multi_reduction <add>, %326, %cst_335 [2] : vector<8x8x8xf32> to vector<8x8xf32>
    %328 = vector.shape_cast %327 : vector<8x8xf32> to vector<8x8x1xf32>
    %329 = vector.broadcast %328 : vector<8x8x1xf32> to vector<8x8x8xf32>
    %330 = arith.divf %326, %329 : vector<8x8x8xf32>
    "tpu.trace_start"() <{level = 10 : i32, message = "gqk,gkd->gqd"}> : () -> ()
    %cst_336 = arith.constant dense<0.000000e+00> : vector<8x8x8xf32>
    %331 = tpu.matmul %330, %142, %cst_336 {dimension_numbers = #tpu.dot_dimension_numbers<[2], [1], [1], [2], [0, 0, 0, 1, 1, 2], [0], [0]>} : vector<8x8x8xf32>, vector<8x8x8xf32>, vector<8x8x8xf32> -> vector<8x8x8xf32>
    "tpu.trace_stop"() : () -> ()
    %332 = vector.shape_cast %331 : vector<8x8x8xf32> to vector<4x16x8xf32>
    %c1_337 = arith.constant 1 : index
    %c0_338 = arith.constant 0 : index
    %c0_339 = arith.constant 0 : index
    %c0_340 = arith.constant 0 : index
    %333 = vector.load %arg3[%c1_337, %c0_338, %c0_339, %c0_340] : memref<2x4x8x32xf32, #tpu.memory_space<vmem>>, vector<1x4x8x32xf32>
    %334 = vector.shape_cast %333 : vector<1x4x8x32xf32> to vector<4x8x32xf32>
    "tpu.trace_start"() <{level = 10 : i32, message = "hnd,hde->hne"}> : () -> ()
    %cst_341 = arith.constant dense<0.000000e+00> : vector<4x16x32xf32>
    %335 = tpu.matmul %332, %334, %cst_341 {dimension_numbers = #tpu.dot_dimension_numbers<[2], [1], [1], [2], [0, 0, 0, 1, 1, 2], [0], [0]>} : vector<4x16x8xf32>, vector<4x8x32xf32>, vector<4x16x32xf32> -> vector<4x16x32xf32>
    "tpu.trace_stop"() : () -> ()
    %cst_342 = arith.constant dense<0.000000e+00> : vector<16x32xf32>
    %336 = vector.multi_reduction <add>, %335, %cst_342 [0] : vector<4x16x32xf32> to vector<16x32xf32>
    %337 = vector.broadcast %271 : vector<1x32xf32> to vector<16x32xf32>
    %338 = arith.addf %336, %337 : vector<16x32xf32>
    %339 = arith.addf %269, %338 : vector<16x32xf32>
    %cst_343 = arith.constant dense<0.000000e+00> : vector<16xf32>
    %340 = vector.multi_reduction <add>, %339, %cst_343 [1] : vector<16x32xf32> to vector<16xf32>
    %341 = vector.shape_cast %340 : vector<16xf32> to vector<16x1xf32>
    %cst_344 = arith.constant 3.200000e+01 : f32
    %342 = vector.broadcast %cst_344 : f32 to vector<16x1xf32>
    %343 = arith.divf %341, %342 : vector<16x1xf32>
    %344 = arith.mulf %339, %339 : vector<16x32xf32>
    %cst_345 = arith.constant dense<0.000000e+00> : vector<16xf32>
    %345 = vector.multi_reduction <add>, %344, %cst_345 [1] : vector<16x32xf32> to vector<16xf32>
    %346 = vector.shape_cast %345 : vector<16xf32> to vector<16x1xf32>
    %cst_346 = arith.constant 3.200000e+01 : f32
    %347 = vector.broadcast %cst_346 : f32 to vector<16x1xf32>
    %348 = arith.divf %346, %347 : vector<16x1xf32>
    %349 = arith.mulf %343, %343 : vector<16x1xf32>
    %350 = arith.subf %348, %349 : vector<16x1xf32>
    %351 = vector.broadcast %343 : vector<16x1xf32> to vector<16x32xf32>
    %352 = arith.subf %339, %351 : vector<16x32xf32>
    %cst_347 = arith.constant 9.99999974E-6 : f32
    %353 = vector.broadcast %cst_347 : f32 to vector<16x1xf32>
    %354 = arith.addf %350, %353 : vector<16x1xf32>
    %355 = math.rsqrt %354 : vector<16x1xf32>
    %356 = vector.broadcast %355 : vector<16x1xf32> to vector<16x32xf32>
    %357 = arith.mulf %352, %356 : vector<16x32xf32>
    %358 = vector.broadcast %273 : vector<1x32xf32> to vector<16x32xf32>
    %359 = arith.mulf %357, %358 : vector<16x32xf32>
    %360 = vector.broadcast %275 : vector<1x32xf32> to vector<16x32xf32>
    %361 = arith.addf %359, %360 : vector<16x32xf32>
    %c1_348 = arith.constant 1 : index
    %c0_349 = arith.constant 0 : index
    %c0_350 = arith.constant 0 : index
    %362 = vector.load %arg4[%c1_348, %c0_349, %c0_350] : memref<2x32x64xf32, #tpu.memory_space<vmem>>, vector<1x32x64xf32>
    %363 = vector.shape_cast %362 : vector<1x32x64xf32> to vector<32x64xf32>
    %cst_351 = arith.constant dense<0.000000e+00> : vector<16x64xf32>
    %364 = tpu.matmul %361, %363, %cst_351 {dimension_numbers = #tpu.dot_dimension_numbers<[1], [0], [0], [1], [0, 0, 1, 1], [], []>} : vector<16x32xf32>, vector<32x64xf32>, vector<16x64xf32> -> vector<16x64xf32>
    %365 = vector.broadcast %283 : vector<1x64xf32> to vector<16x64xf32>
    %366 = arith.addf %364, %365 : vector<16x64xf32>
    %cst_352 = arith.constant 0.000000e+00 : f32
    %367 = vector.broadcast %cst_352 : f32 to vector<16x64xf32>
    %368 = arith.maximumf %366, %367 : vector<16x64xf32>
    %c1_353 = arith.constant 1 : index
    %c0_354 = arith.constant 0 : index
    %c0_355 = arith.constant 0 : index
    %369 = vector.load %arg5[%c1_353, %c0_354, %c0_355] : memref<2x64x32xf32, #tpu.memory_space<vmem>>, vector<1x64x32xf32>
    %370 = vector.shape_cast %369 : vector<1x64x32xf32> to vector<64x32xf32>
    %cst_356 = arith.constant dense<0.000000e+00> : vector<16x32xf32>
    %371 = tpu.matmul %368, %370, %cst_356 {dimension_numbers = #tpu.dot_dimension_numbers<[1], [0], [0], [1], [0, 0, 1, 1], [], []>} : vector<16x64xf32>, vector<64x32xf32>, vector<16x32xf32> -> vector<16x32xf32>
    %372 = vector.broadcast %277 : vector<1x32xf32> to vector<16x32xf32>
    %373 = arith.addf %371, %372 : vector<16x32xf32>
    %374 = arith.addf %361, %373 : vector<16x32xf32>
    %cst_357 = arith.constant dense<0.000000e+00> : vector<16xf32>
    %375 = vector.multi_reduction <add>, %374, %cst_357 [1] : vector<16x32xf32> to vector<16xf32>
    %376 = vector.shape_cast %375 : vector<16xf32> to vector<16x1xf32>
    %cst_358 = arith.constant 3.200000e+01 : f32
    %377 = vector.broadcast %cst_358 : f32 to vector<16x1xf32>
    %378 = arith.divf %376, %377 : vector<16x1xf32>
    %379 = arith.mulf %374, %374 : vector<16x32xf32>
    %cst_359 = arith.constant dense<0.000000e+00> : vector<16xf32>
    %380 = vector.multi_reduction <add>, %379, %cst_359 [1] : vector<16x32xf32> to vector<16xf32>
    %381 = vector.shape_cast %380 : vector<16xf32> to vector<16x1xf32>
    %cst_360 = arith.constant 3.200000e+01 : f32
    %382 = vector.broadcast %cst_360 : f32 to vector<16x1xf32>
    %383 = arith.divf %381, %382 : vector<16x1xf32>
    %384 = arith.mulf %378, %378 : vector<16x1xf32>
    %385 = arith.subf %383, %384 : vector<16x1xf32>
    %386 = vector.broadcast %378 : vector<16x1xf32> to vector<16x32xf32>
    %387 = arith.subf %374, %386 : vector<16x32xf32>
    %cst_361 = arith.constant 9.99999974E-6 : f32
    %388 = vector.broadcast %cst_361 : f32 to vector<16x1xf32>
    %389 = arith.addf %385, %388 : vector<16x1xf32>
    %390 = math.rsqrt %389 : vector<16x1xf32>
    %391 = vector.broadcast %390 : vector<16x1xf32> to vector<16x32xf32>
    %392 = arith.mulf %387, %391 : vector<16x32xf32>
    %393 = vector.broadcast %279 : vector<1x32xf32> to vector<16x32xf32>
    %394 = arith.mulf %392, %393 : vector<16x32xf32>
    %395 = vector.broadcast %281 : vector<1x32xf32> to vector<16x32xf32>
    %396 = arith.addf %394, %395 : vector<16x32xf32>
    %c12 = arith.constant 12 : index
    %c0_362 = arith.constant 0 : index
    %c0_363 = arith.constant 0 : index
    %397 = vector.load %arg7[%c12, %c0_362, %c0_363] : memref<14x1x32xf32, #tpu.memory_space<vmem>>, vector<1x1x32xf32>
    %398 = vector.shape_cast %397 : vector<1x1x32xf32> to vector<1x32xf32>
    %c13 = arith.constant 13 : index
    %c0_364 = arith.constant 0 : index
    %c0_365 = arith.constant 0 : index
    %399 = vector.load %arg7[%c13, %c0_364, %c0_365] : memref<14x1x32xf32, #tpu.memory_space<vmem>>, vector<1x1x32xf32>
    %400 = vector.shape_cast %399 : vector<1x1x32xf32> to vector<1x32xf32>
    %cst_366 = arith.constant dense<0.000000e+00> : vector<16xf32>
    %401 = vector.multi_reduction <add>, %396, %cst_366 [1] : vector<16x32xf32> to vector<16xf32>
    %402 = vector.shape_cast %401 : vector<16xf32> to vector<16x1xf32>
    %cst_367 = arith.constant 3.200000e+01 : f32
    %403 = vector.broadcast %cst_367 : f32 to vector<16x1xf32>
    %404 = arith.divf %402, %403 : vector<16x1xf32>
    %405 = arith.mulf %396, %396 : vector<16x32xf32>
    %cst_368 = arith.constant dense<0.000000e+00> : vector<16xf32>
    %406 = vector.multi_reduction <add>, %405, %cst_368 [1] : vector<16x32xf32> to vector<16xf32>
    %407 = vector.shape_cast %406 : vector<16xf32> to vector<16x1xf32>
    %cst_369 = arith.constant 3.200000e+01 : f32
    %408 = vector.broadcast %cst_369 : f32 to vector<16x1xf32>
    %409 = arith.divf %407, %408 : vector<16x1xf32>
    %410 = arith.mulf %404, %404 : vector<16x1xf32>
    %411 = arith.subf %409, %410 : vector<16x1xf32>
    %412 = vector.broadcast %404 : vector<16x1xf32> to vector<16x32xf32>
    %413 = arith.subf %396, %412 : vector<16x32xf32>
    %cst_370 = arith.constant 9.99999974E-6 : f32
    %414 = vector.broadcast %cst_370 : f32 to vector<16x1xf32>
    %415 = arith.addf %411, %414 : vector<16x1xf32>
    %416 = math.rsqrt %415 : vector<16x1xf32>
    %417 = vector.broadcast %416 : vector<16x1xf32> to vector<16x32xf32>
    %418 = arith.mulf %413, %417 : vector<16x32xf32>
    %419 = vector.broadcast %398 : vector<1x32xf32> to vector<16x32xf32>
    %420 = arith.mulf %418, %419 : vector<16x32xf32>
    %421 = vector.broadcast %400 : vector<1x32xf32> to vector<16x32xf32>
    %422 = arith.addf %420, %421 : vector<16x32xf32>
    %c0_371 = arith.constant 0 : index
    %c0_372 = arith.constant 0 : index
    %423 = vector.load %arg8[%c0_371, %c0_372] : memref<16x32xf32, #tpu.memory_space<vmem>>, vector<16x32xf32>
    tpu.vector_store %arg8[%c0_371, %c0_372], %422 {strides = array<i32>} : memref<16x32xf32, #tpu.memory_space<vmem>>, vector<16x32xf32>,
    return
  }
}

</mosaic_0001>

<bundles_post_ra>
// kernel: tpu_custom_call.1
= control target key start
LH: loop header
LB: loop body
LE: loop exit
PB: predicated region body
PF: predicated region fallthrough
CT: control target
= control target key end

     0   :  { %vm53_vm0 = vcmask 261120   ;;  %s8622_s0 = inlined_call_operand.vmem [shape: f32[3,16,32], index: 0, kind: input, shape index: {}]   ;;  %s8623_s1 = inlined_call_operand.vmem [shape: f32[3,2,4,32,8], index: 1, kind: input, shape index: {}]   ;;  %s8624_s2 = inlined_call_operand.vmem [shape: f32[3,2,4,1,8], index: 2, kind: input, shape index: {}]   ;;  %s8625_s3 = inlined_call_operand.vmem [shape: f32[2,4,8,32], index: 3, kind: input, shape index: {}]   ;;  %s8626_s4 = inlined_call_operand.vmem [shape: f32[2,32,64], index: 4, kind: input, shape index: {}]   ;;  %s8627_s5 = inlined_call_operand.vmem [shape: f32[2,64,32], index: 5, kind: input, shape index: {}]   ;;  %s8628_s6 = inlined_call_operand.vmem [shape: f32[2,1,64], index: 6, kind: input, shape index: {}]   ;;  %s8629_s7 = inlined_call_operand.vmem [shape: f32[14,1,32], index: 7, kind: input, shape index: {}]   ;;  %s8630_s8 = inlined_call_operand.hbm [shape: f32[16,32], index: 8, kind: output, shape index: {}]  }
   0x1   :  { %v6127_v0 = vld [vmem:[%s8623_s1 + $0x100] sm:$0xff]  ;;  %v6128_v1 = vld [vmem:[%s8623_s1 + $0x108] sm:$0xff]  ;;  %v6129_v5 = vld [vmem:[%s8623_s1 + $0x110] sm:$0xff] }
   0x2   :  { %v6135_v2 = vld [vmem:[%s8623_s1 + $0x120] sm:$0xff]  ;;  %v7220_v3 = vpack.c.bf16 %v6128_v1, %v6127_v0  ;;  %v6136_v4 = vld [vmem:[%s8623_s1 + $0x128] sm:$0xff]  ;;  %v6130_v6 = vld [vmem:[%s8623_s1 + $0x118] sm:$0xff] }
   0x3   :  { %v7228_v7 = vpack.c.bf16 %v6136_v4, %v6135_v2  ;;  %v7224_v8 = vpack.c.bf16 %v6130_v6, %v6129_v5  ;;  %v6137_v9 = vld [vmem:[%s8623_s1 + $0x130] sm:$0xff]  ;;  %v6138_v10 = vld [vmem:[%s8623_s1 + $0x138] sm:$0xff]  ;;  %v7657_v13 = vld [vmem:[%s8622_s0 + $0x20] sm:$0xff] }
   0x4   :  { %v7652_v11 = vld [vmem:[%s8622_s0 + $0x10] sm:$0xff]  ;;  %7221 = vmatprep.subr.bf16.mxu0 %v7220_v3  ;;  %v7232_v12 = vpack.c.bf16 %v6138_v10, %v6137_v9  ;;  %v7662_v14 = vld [vmem:[%s8622_s0 + $0x18] sm:$0xff]  ;;  %v7667_v15 = vld [vmem:[%s8622_s0 + $0x28] sm:$0xff] }
   0x5   :  { %7229 = vmatprep.subr.bf16.mxu1 %v7228_v7  ;;  %7223 = vmatpush3.bf16.msra.mxu0 %v7220_v3  ;;  %v7671_v16 = vadd.f32 %v7657_v13, %v7652_v11  ;;  %v6143_v17 = vld [vmem:[%s8623_s1 + $0x140] sm:$0xff]  ;;  %v6144_v18 = vld [vmem:[%s8623_s1 + $0x148] sm:$0xff]  ;;  %v6145_v23 = vld [vmem:[%s8623_s1 + $0x150] sm:$0xff]  ;;  %v7695_v25 = vadd.f32 %v7667_v15, %v7662_v14 }
   0x6   :  { %v6151_v19 = vld [vmem:[%s8623_s1 + $0x160] sm:$0xff]  ;;  %7231 = vmatpush3.bf16.msra.mxu1 %v7228_v7  ;;  %7225 = vmatprep.subr.bf16.mxu0 %v7224_v8  ;;  %v7236_v20 = vpack.c.bf16 %v6144_v18, %v6143_v17  ;;  %v6152_v21 = vld [vmem:[%s8623_s1 + $0x168] sm:$0xff]  ;;  %v6146_v24 = vld [vmem:[%s8623_s1 + $0x158] sm:$0xff] }
   0x7   :  { %7233 = vmatprep.subr.bf16.mxu1 %v7232_v12  ;;  %6704 = vmatprep.mubr.msk.f32.mxu0 %vm53_vm0, %v7671_v16  ;;  %v7244_v22 = vpack.c.bf16 %v6152_v21, %v6151_v19  ;;  %v6153_v26 = vld [vmem:[%s8623_s1 + $0x170] sm:$0xff]  ;;  %v6154_v27 = vld [vmem:[%s8623_s1 + $0x178] sm:$0xff]  ;;  %v7240_v28 = vpack.c.bf16 %v6146_v24, %v6145_v23  ;;  %v6159_v30 = vld [vmem:[%s8623_s1 + $0x200] sm:$0xff] }
   0x8   :  { %6715 = vmatprep.mubr.msk.f32.mxu1 %vm53_vm0, %v7671_v16  ;;  %v7248_v29 = vpack.c.bf16 %v6154_v27, %v6153_v26  ;;  %v6160_v31 = vld [vmem:[%s8623_s1 + $0x208] sm:$0xff]  ;;  %v6167_v32 = vld [vmem:[%s8623_s1 + $0x220] sm:$0xff]  ;;  %v6161_v36 = vld [vmem:[%s8623_s1 + $0x210] sm:$0xff] }
   0x9   :  { %7227 = vmatpush3.bf16.msra.mxu0 %v7224_v8  ;;  %v6168_v33 = vld [vmem:[%s8623_s1 + $0x228] sm:$0xff]  ;;  %v7252_v34 = vpack.c.bf16 %v6160_v31, %v6159_v30  ;;  %v6162_v37 = vld [vmem:[%s8623_s1 + $0x218] sm:$0xff]  ;;  %v6169_v38 = vld [vmem:[%s8623_s1 + $0x230] sm:$0xff] }
   0xa   :  { %7235 = vmatpush3.bf16.msra.mxu1 %v7232_v12  ;;  %7237 = vmatprep.subr.bf16.mxu0 %v7236_v20  ;;  %v7260_v35 = vpack.c.bf16 %v6168_v33, %v6167_v32  ;;  %v6170_v39 = vld [vmem:[%s8623_s1 + $0x238] sm:$0xff]  ;;  %v7256_v40 = vpack.c.bf16 %v6162_v37, %v6161_v36  ;;  %v6175_v42 = vld [vmem:[%s8623_s1 + $0x240] sm:$0xff]  ;;  %v6176_v43 = vld [vmem:[%s8623_s1 + $0x248] sm:$0xff] }
   0xb   :  { %7245 = vmatprep.subr.bf16.mxu1 %v7244_v22  ;;  %v7264_v41 = vpack.c.bf16 %v6170_v39, %v6169_v38  ;;  %v6183_v44 = vld [vmem:[%s8623_s1 + $0x260] sm:$0xff]  ;;  %v6184_v45 = vld [vmem:[%s8623_s1 + $0x268] sm:$0xff]  ;;  %v7268_v46 = vpack.c.bf16 %v6176_v43, %v6175_v42  ;;  %v6177_v48 = vld [vmem:[%s8623_s1 + $0x250] sm:$0xff] }
   0xc   :  { %6705 = vmatmul.mubr.msk.f32.vlgmr.msra.gmra.mrb[0].mxu0 %vm53_vm0, %v7695_v25  ;;  %v7276_v47 = vpack.c.bf16 %v6184_v45, %v6183_v44  ;;  %v6178_v49 = vld [vmem:[%s8623_s1 + $0x258] sm:$0xff]  ;;  %v6185_v50 = vld [vmem:[%s8623_s1 + $0x270] sm:$0xff]  ;;  %v6191_v54 = vld [vmem:[%s8623_s1 + $0x180] sm:$0xff] }
   0xd   :  { %6716 = vmatmul.mubr.msk.f32.vlgmr.msra.gmra.mrb[0].mxu1 %vm53_vm0, %v7695_v25  ;;  %7239 = vmatpush3.bf16.msra.mxu0 %v7236_v20  ;;  %v6186_v51 = vld [vmem:[%s8623_s1 + $0x278] sm:$0xff]  ;;  %v7272_v52 = vpack.c.bf16 %v6178_v49, %v6177_v48  ;;  %v6192_v55 = vld [vmem:[%s8623_s1 + $0x188] sm:$0xff]  ;;  %v6199_v56 = vld [vmem:[%s8623_s1 + $0x1a0] sm:$0xff] }
   0xe   :  { %7247 = vmatpush3.bf16.msra.mxu1 %v7244_v22  ;;  %7241 = vmatprep.subr.bf16.mxu0 %v7240_v28  ;;  %v7280_v53 = vpack.c.bf16 %v6186_v51, %v6185_v50  ;;  %v6200_v57 = vld [vmem:[%s8623_s1 + $0x1a8] sm:$0xff] }
   0xf   :  { %7249 = vmatprep.subr.bf16.mxu1 %v7248_v29  ;;  %6726 = vmatprep.mubr.msk.f32.mxu0 %vm53_vm0, %v7671_v16 }
  0x10   :  { %6737 = vmatprep.mubr.msk.f32.mxu1 %vm53_vm0, %v7671_v16 }
  0x11   :  { %7243 = vmatpush3.bf16.msra.mxu0 %v7240_v28 }
  0x12   :  { %7251 = vmatpush3.bf16.msra.mxu1 %v7248_v29  ;;  %7253 = vmatprep.subr.bf16.mxu0 %v7252_v34 }
  0x13   :  { %7261 = vmatprep.subr.bf16.mxu1 %v7260_v35 }
  0x14   :  { %6727 = vmatmul.mubr.msk.f32.vlgmr.msra.gmra.mrb[2].mxu0 %vm53_vm0, %v7695_v25 }
  0x15   :  { %6738 = vmatmul.mubr.msk.f32.vlgmr.msra.gmra.mrb[2].mxu1 %vm53_vm0, %v7695_v25  ;;  %7255 = vmatpush3.bf16.msra.mxu0 %v7252_v34 }
  0x16   :  { %7263 = vmatpush3.bf16.msra.mxu1 %v7260_v35  ;;  %7257 = vmatprep.subr.bf16.mxu0 %v7256_v40 }
  0x17   :  { %7265 = vmatprep.subr.bf16.mxu1 %v7264_v41  ;;  %6748 = vmatprep.mubr.msk.f32.mxu0 %vm53_vm0, %v7652_v11 }
  0x18   :  { %6759 = vmatprep.mubr.msk.f32.mxu1 %vm53_vm0, %v7652_v11 }
  0x19   :  { %7259 = vmatpush3.bf16.msra.mxu0 %v7256_v40 }
  0x1a   :  { %7267 = vmatpush3.bf16.msra.mxu1 %v7264_v41  ;;  %7269 = vmatprep.subr.bf16.mxu0 %v7268_v46 }
  0x1b   :  { %7277 = vmatprep.subr.bf16.mxu1 %v7276_v47 }
  0x1c   :  { %6749 = vmatmul.mubr.msk.f32.vlgmr.msra.gmra.mrb[4].mxu0 %vm53_vm0, %v7662_v14 }
  0x1d   :  { %6760 = vmatmul.mubr.msk.f32.vlgmr.msra.gmra.mrb[4].mxu1 %vm53_vm0, %v7662_v14  ;;  %7271 = vmatpush3.bf16.msra.mxu0 %v7268_v46 }
  0x1e   :  { %13 = vsyncpa [#allocation3], 0  ;;  %7279 = vmatpush3.bf16.msra.mxu1 %v7276_v47  ;;  %7273 = vmatprep.subr.bf16.mxu0 %v7272_v52  ;;  %v7284_v58 = vpack.c.bf16 %v6192_v55, %v6191_v54  ;;  %v7292_v59 = vpack.c.bf16 %v6200_v57, %v6199_v56  ;;  %v6193_v60 = vld [vmem:[%s8623_s1 + $0x190] sm:$0xff]  ;;  %v6194_v61 = vld [vmem:[%s8623_s1 + $0x198] sm:$0xff]  ;;  %vm7576_vm1 = vmmov 0   ;;  %vm1831_vm2 = vcmask 64512  }
  0x1f   :  { %7281 = vmatprep.subr.bf16.mxu1 %v7280_v53  ;;  %6770 = vmatprep.mubr.msk.f32.mxu0 %vm53_vm0, %v7652_v11  ;;  %v6201_v62 = vld [vmem:[%s8623_s1 + $0x1b0] sm:$0xff]  ;;  %v6202_v63 = vld [vmem:[%s8623_s1 + $0x1b8] sm:$0xff]  ;;  %v7288_v0 = vpack.c.bf16 %v6194_v61, %v6193_v60  ;;  %v6207_v2 = vld [vmem:[%s8623_s1 + $0x1c0] sm:$0xff]  ;;  %vm3626_vm3 = vcmask 523264   ;;  %s7577_s14 = smov [#allocation2]  }
  0x20   :  { %6781 = vmatprep.mubr.msk.f32.mxu1 %vm53_vm0, %v7652_v11  ;;  %v7296_v1 = vpack.c.bf16 %v6202_v63, %v6201_v62  ;;  %v6208_v3 = vld [vmem:[%s8623_s1 + $0x1c8] sm:$0xff]  ;;  %v6215_v4 = vld [vmem:[%s8623_s1 + $0x1e0] sm:$0xff]  ;;  %v6209_v8 = vld [vmem:[%s8623_s1 + $0x1d0] sm:$0xff]  ;;  %s6112_s15 = sshll.u32 %s7577_s14, 4  ;;  %s6113_s15 = int_to_ptr.vmem [resolvable:$true] %s6112_s15 }
  0x21   :  { %7275 = vmatpush3.bf16.msra.mxu0 %v7272_v52  ;;  %v6216_v5 = vld [vmem:[%s8623_s1 + $0x1e8] sm:$0xff]  ;;  %v7300_v6 = vpack.c.bf16 %v6208_v3, %v6207_v2  ;;  %v6210_v9 = vld [vmem:[%s8623_s1 + $0x1d8] sm:$0xff]  ;;  %v6217_v10 = vld [vmem:[%s8623_s1 + $0x1f0] sm:$0xff]  ;;  %s7551_s16 = scalar_lea.vmem %s6113_s15, 256  ;;  %p7556_p1 = scmp.lt.s32.totalorder %s6113_s15, %s6113_s15 }
  0x22   :  { %7283 = vmatpush3.bf16.msra.mxu1 %v7280_v53  ;;  %7285 = vmatprep.subr.bf16.mxu0 %v7284_v58  ;;  %v7308_v7 = vpack.c.bf16 %v6216_v5, %v6215_v4  ;;  %v6218_v12 = vld [vmem:[%s8623_s1 + $0x1f8] sm:$0xff]  ;;  %v7304_v17 = vpack.c.bf16 %v6210_v9, %v6209_v8  ;;  %v6223_v19 = vld [vmem:[%s8623_s1 + $0x280] sm:$0xff]  ;;  %v6224_v20 = vld [vmem:[%s8623_s1 + $0x288] sm:$0xff]  ;;  %p7552_p0 = scmp.ne.s32.totalorder %s6113_s15, %s7551_s16  ;;  %p7557_p2 = scmp.lt.s32.totalorder %s7551_s16, %s7551_s16 }
  0x23   :  { %7293 = vmatprep.subr.bf16.mxu1 %v7292_v59  ;;  %v7312_v18 = vpack.c.bf16 %v6218_v12, %v6217_v10  ;;  %v6231_v21 = vld [vmem:[%s8623_s1 + $0x2a0] sm:$0xff]  ;;  %v6232_v22 = vld [vmem:[%s8623_s1 + $0x2a8] sm:$0xff]  ;;  %v7316_v23 = vpack.c.bf16 %v6224_v20, %v6223_v19  ;;  %v6225_v26 = vld [vmem:[%s8623_s1 + $0x290] sm:$0xff] }
  0x24   :  { %6771 = vmatmul.mubr.msk.f32.vlgmr.msra.gmra.mrb[6].mxu0 %vm53_vm0, %v7662_v14  ;;  %v7324_v24 = vpack.c.bf16 %v6232_v22, %v6231_v21  ;;  %v6226_v27 = vld [vmem:[%s8623_s1 + $0x298] sm:$0xff]  ;;  %v6233_v28 = vld [vmem:[%s8623_s1 + $0x2b0] sm:$0xff]  ;;  %v6239_v32 = vld [vmem:[%s8623_s1 + $0x2c0] sm:$0xff]  ;;  %p7558_p3 = por %p7557_p2, %p7556_p1 }
  0x25   :  { %6782 = vmatmul.mubr.msk.f32.vlgmr.msra.gmra.mrb[6].mxu1 %vm53_vm0, %v7662_v14  ;;  %7287 = vmatpush3.bf16.msra.mxu0 %v7284_v58  ;;  %v6234_v29 = vld [vmem:[%s8623_s1 + $0x2b8] sm:$0xff]  ;;  %v7320_v30 = vpack.c.bf16 %v6226_v27, %v6225_v26  ;;  %v6247_v33 = vld [vmem:[%s8623_s1 + $0x2e0] sm:$0xff]  ;;  %v6248_v34 = vld [vmem:[%s8623_s1 + $0x2e8] sm:$0xff] }
  0x26   :  { %7295 = vmatpush3.bf16.msra.mxu1 %v7292_v59  ;;  %7289 = vmatprep.subr.bf16.mxu0 %v7288_v0  ;;  %v7328_v31 = vpack.c.bf16 %v6234_v29, %v6233_v28  ;;  %v7340_v36 = vpack.c.bf16 %v6248_v34, %v6247_v33  ;;  %v6241_v37 = vld [vmem:[%s8623_s1 + $0x2d0] sm:$0xff]  ;;  %v6242_v38 = vld [vmem:[%s8623_s1 + $0x2d8] sm:$0xff]  ;;  %v1475_v42 = vld [vmem:[%s8623_s1] sm:$0xff]  ;;  %p7559_p4 = pnand %p7558_p3, %p7552_p0 }
  0x27   :  { %7297 = vmatprep.subr.bf16.mxu1 %v7296_v1  ;;  %6792 = vmatprep.mubr.msk.f32.mxu0 %vm53_vm0, %v7671_v16  ;;  %v6250_v39 = vld [vmem:[%s8623_s1 + $0x2f8] sm:$0xff]  ;;  %v7336_v40 = vpack.c.bf16 %v6242_v38, %v6241_v37  ;;  %v1476_v43 = vld [vmem:[%s8623_s1 + $0x8] sm:$0xff]  ;;  %v6263_v44 = vld [vmem:[%s8623_s1 + $0x20] sm:$0xff] }
  0x28   :  { %6803 = vmatprep.mubr.msk.f32.mxu1 %vm53_vm0, %v7671_v16  ;;  %v6264_v45 = vld [vmem:[%s8623_s1 + $0x28] sm:$0xff]  ;;  %v7348_v46 = vpack.c.bf16 %v1476_v43, %v1475_v42  ;;  %v1477_v48 = vld [vmem:[%s8623_s1 + $0x10] sm:$0xff]  ;;  %v1478_v49 = vld [vmem:[%s8623_s1 + $0x18] sm:$0xff] }
  0x29   :  { %7291 = vmatpush3.bf16.msra.mxu0 %v7288_v0  ;;  %v7356_v47 = vpack.c.bf16 %v6264_v45, %v6263_v44  ;;  %v6265_v50 = vld [vmem:[%s8623_s1 + $0x30] sm:$0xff]  ;;  %v6266_v51 = vld [vmem:[%s8623_s1 + $0x38] sm:$0xff]  ;;  %v7932_v52 = vld [vmem:[%s8622_s0] sm:$0xff]  ;;  %v7352_v53 = vpack.c.bf16 %v1478_v49, %v1477_v48 }
  0x2a   :  { %7299 = vmatpush3.bf16.msra.mxu1 %v7296_v1  ;;  %7301 = vmatprep.subr.bf16.mxu0 %v7300_v6  ;;  %v7360_v54 = vpack.c.bf16 %v6266_v51, %v6265_v50  ;;  %v6271_v55 = vld [vmem:[%s8623_s1 + $0x40] sm:$0xff]  ;;  %v6272_v56 = vld [vmem:[%s8623_s1 + $0x48] sm:$0xff]  ;;  %v6273_v60 = vld [vmem:[%s8623_s1 + $0x50] sm:$0xff] }
  0x2b   :  { %7309 = vmatprep.subr.bf16.mxu1 %v7308_v7  ;;  %v6279_v57 = vld [vmem:[%s8623_s1 + $0x60] sm:$0xff]  ;;  %v6280_v58 = vld [vmem:[%s8623_s1 + $0x68] sm:$0xff]  ;;  %v7364_v59 = vpack.c.bf16 %v6272_v56, %v6271_v55  ;;  %v6281_v63 = vld [vmem:[%s8623_s1 + $0x70] sm:$0xff] }
  0x2c   :  { %6793 = vmatmul.mubr.msk.f32.vlgmr.msra.gmra.mrb[8].mxu0 %vm53_vm0, %v7695_v25  ;;  %v7372_v61 = vpack.c.bf16 %v6280_v58, %v6279_v57  ;;  %v6282_v0 = vld [vmem:[%s8623_s1 + $0x78] sm:$0xff]  ;;  %v6132_v3 = vld [vmem:[%s8624_s2 + $0x8] ss:$0 sm:$0xff]  ;;  %v6140_v4 = vld [vmem:[%s8624_s2 + $0x9] ss:$0 sm:$0xff] }
  0x2d   :  { %6804 = vmatmul.mubr.msk.f32.vlgmr.msra.gmra.mrb[8].mxu1 %vm53_vm0, %v7695_v25  ;;  %7303 = vmatpush3.bf16.msra.mxu0 %v7300_v6  ;;  %v7376_v2 = vpack.c.bf16 %v6282_v0, %v6281_v63  ;;  %v6260_v49 = vld [vmem:[%s8624_s2] ss:$0 sm:$0xff]  ;;  %v6268_v50 = vld [vmem:[%s8624_s2 + $0x1] ss:$0 sm:$0xff]  ;;  %v6148_v51 = vld [vmem:[%s8624_s2 + $0xa] ss:$0 sm:$0xff] }
  0x2e   :  { %7311 = vmatpush3.bf16.msra.mxu1 %v7308_v7  ;;  %7305 = vmatprep.subr.bf16.mxu0 %v7304_v17  ;;  %v6284_v63 = vld [vmem:[%s8624_s2 + $0x3] ss:$0 sm:$0xff] }
  0x2f   :  { %7313 = vmatprep.subr.bf16.mxu1 %v7312_v18  ;;  %6814 = vmatprep.mubr.msk.f32.mxu0 %vm53_vm0, %v7671_v16 }
  0x30   :  { %6825 = vmatprep.mubr.msk.f32.mxu1 %vm53_vm0, %v7671_v16  ;;  %v6240_v16 = vld [vmem:[%s8623_s1 + $0x2c8] sm:$0xff] }
  0x31   :  { %7307 = vmatpush3.bf16.msra.mxu0 %v7304_v17  ;;  %v7332_v35 = vpack.c.bf16 %v6240_v16, %v6239_v32  ;;  %v8025_v32 = vld [vmem:[%s8624_s2 + $0xd] ss:$0 sm:$0xff] }
  0x32   :  { %7315 = vmatpush3.bf16.msra.mxu1 %v7312_v18  ;;  %7317 = vmatprep.subr.bf16.mxu0 %v7316_v23 }
  0x33   :  { %7325 = vmatprep.subr.bf16.mxu1 %v7324_v24 }
  0x34   :  { %6815 = vmatmul.mubr.msk.f32.vlgmr.msra.gmra.mrb[10].mxu0 %vm53_vm0, %v7695_v25 }
  0x35   :  { %6826 = vmatmul.mubr.msk.f32.vlgmr.msra.gmra.mrb[10].mxu1 %vm53_vm0, %v7695_v25  ;;  %7319 = vmatpush3.bf16.msra.mxu0 %v7316_v23  ;;  %v6249_v25 = vld [vmem:[%s8623_s1 + $0x2f0] sm:$0xff] }
  0x36   :  { %7327 = vmatpush3.bf16.msra.mxu1 %v7324_v24  ;;  %7321 = vmatprep.subr.bf16.mxu0 %v7320_v30  ;;  %v7344_v41 = vpack.c.bf16 %v6250_v39, %v6249_v25 }
  0x37   :  { %7329 = vmatprep.subr.bf16.mxu1 %v7328_v31  ;;  %6836 = vmatprep.mubr.msk.f32.mxu0 %vm53_vm0, %v7652_v11 }
  0x38   :  { %6847 = vmatprep.mubr.msk.f32.mxu1 %vm53_vm0, %v7652_v11 }
  0x39   :  { %7323 = vmatpush3.bf16.msra.mxu0 %v7320_v30 }
  0x3a   :  { %7331 = vmatpush3.bf16.msra.mxu1 %v7328_v31  ;;  %7333 = vmatprep.subr.bf16.mxu0 %v7332_v35  ;;  %v8020_v31 = vld [vmem:[%s8624_s2 + $0xc] ss:$0 sm:$0xff] }
  0x3b   :  { %7341 = vmatprep.subr.bf16.mxu1 %v7340_v36 }
  0x3c   :  { %6837 = vmatmul.mubr.msk.f32.vlgmr.msra.gmra.mrb[12].mxu0 %vm53_vm0, %v7662_v14 }
  0x3d   :  { %6848 = vmatmul.mubr.msk.f32.vlgmr.msra.gmra.mrb[12].mxu1 %vm53_vm0, %v7662_v14  ;;  %7335 = vmatpush3.bf16.msra.mxu0 %v7332_v35 }
  0x3e   :  { %7343 = vmatpush3.bf16.msra.mxu1 %v7340_v36  ;;  %7337 = vmatprep.subr.bf16.mxu0 %v7336_v40 }
  0x3f   :  { %7345 = vmatprep.subr.bf16.mxu1 %v7344_v41  ;;  %6858 = vmatprep.mubr.msk.f32.mxu0 %vm53_vm0, %v7652_v11 }
  0x40   :  { %6869 = vmatprep.mubr.msk.f32.mxu1 %vm53_vm0, %v7652_v11  ;;  %v1473_v11 = vadd.f32 %v7657_v13, %v7932_v52  ;;  %v7955_v13 = vld [vmem:[%s8622_s0 + $0x8] sm:$0xff] }
  0x41   :  { %7339 = vmatpush3.bf16.msra.mxu0 %v7336_v40  ;;  %v1474_v62 = vadd.f32 %v7667_v15, %v7955_v13  ;;  %v7575_v15 = vmov 0.0  }
  0x42   :  { %7347 = vmatpush3.bf16.msra.mxu1 %v7344_v41  ;;  %7349 = vmatprep.subr.bf16.mxu0 %v7348_v46 }
  0x43   :  { %7357 = vmatprep.subr.bf16.mxu1 %v7356_v47 }
  0x44   :  { %6859 = vmatmul.mubr.msk.f32.vlgmr.msra.gmra.mrb[14].mxu0 %vm53_vm0, %v7662_v14 }
  0x45   :  { %6870 = vmatmul.mubr.msk.f32.vlgmr.msra.gmra.mrb[14].mxu1 %vm53_vm0, %v7662_v14  ;;  %7351 = vmatpush3.bf16.msra.mxu0 %v7348_v46  ;;  %v6274_v14 = vld [vmem:[%s8623_s1 + $0x58] sm:$0xff] }
  0x46   :  { %7359 = vmatpush3.bf16.msra.mxu1 %v7356_v47  ;;  %7353 = vmatprep.subr.bf16.mxu0 %v7352_v53  ;;  %v7368_v1 = vpack.c.bf16 %v6274_v14, %v6273_v60  ;;  %v6276_v60 = vld [vmem:[%s8624_s2 + $0x2] ss:$0 sm:$0xff]  ;;  %v6156_v14 = vld [vmem:[%s8624_s2 + $0xb] ss:$0 sm:$0xff] }
  0x47   :  { %7361 = vmatprep.subr.bf16.mxu1 %v7360_v54  ;;  %6880 = vmatprep.mubr.msk.f32.mxu0 %vm53_vm0, %v1473_v11 }
  0x48   :  { %6891 = vmatprep.mubr.msk.f32.mxu1 %vm53_vm0, %v1473_v11 }
  0x49   :  { %7355 = vmatpush3.bf16.msra.mxu0 %v7352_v53 }
  0x4a   :  { %7363 = vmatpush3.bf16.msra.mxu1 %v7360_v54  ;;  %7365 = vmatprep.subr.bf16.mxu0 %v7364_v59 }
  0x4b   :  { %7373 = vmatprep.subr.bf16.mxu1 %v7372_v61 }
  0x4c   :  { %6881 = vmatmul.mubr.msk.f32.vlgmr.msra.gmra.mrb[16].mxu0 %vm53_vm0, %v1474_v62 }
  0x4d   :  { %6892 = vmatmul.mubr.msk.f32.vlgmr.msra.gmra.mrb[16].mxu1 %vm53_vm0, %v1474_v62  ;;  %7367 = vmatpush3.bf16.msra.mxu0 %v7364_v59 }
  0x4e   :  { %7369 = vmatprep.subr.bf16.mxu0 %v7368_v1  ;;  %7375 = vmatpush3.bf16.msra.mxu1 %v7372_v61 }
  0x4f   :  { %6902 = vmatprep.mubr.msk.f32.mxu0 %vm53_vm0, %v1473_v11  ;;  %7377 = vmatprep.subr.bf16.mxu1 %v7376_v2 }
  0x50   :  { %6913 = vmatprep.mubr.msk.f32.mxu1 %vm53_vm0, %v1473_v11 }
  0x51   :  { %7371 = vmatpush3.bf16.msra.mxu0 %v7368_v1 }
  0x52   :  { %7379 = vmatpush3.bf16.msra.mxu1 %v7376_v2  ;;  %6916 = vmatprep.subr.mxu0 %v7575_v15 }
  0x53   :  { %6931 = vmatprep.subr.mxu1 %v7575_v15 }
  0x54   :  { %6903 = vmatmul.mubr.msk.f32.vlgmr.msra.gmra.mrb[18].mxu0 %vm53_vm0, %v1474_v62 }
  0x55   :  { %6914 = vmatmul.mubr.msk.f32.vlgmr.msra.gmra.mrb[18].mxu1 %vm53_vm0, %v1474_v62  ;;  %6918 = vmatprep.mubr.msk.f32.mxu0 %vm7576_vm1, %v7575_v15 }
  0x56   :  { %6933 = vmatprep.mubr.msk.f32.mxu1 %vm7576_vm1, %v7575_v15 }
  0xdf   :  { %v6706_v5 = vpop.f32.mrb[0].mxu0 }
  0xe0   :  { %v132_v6 = vadd.f32 %v6706_v5, %v6132_v3  ;;  %v126_v7 = vpop.f32.mrb[1].mxu0  ;;  %v6717_v8 = vpop.f32.mrb[0].mxu1 }
  0xe1   :  { %v127_v9 = vadd.f32 %v6132_v3, %v126_v7  ;;  %v220_v10 = vadd.f32 %v6717_v8, %v6140_v4  ;;  %v214_v12 = vpop.f32.mrb[1].mxu1 }
  0xe2   :  { %v7991_v17 = vadd.f32 %v6140_v4, %v214_v12 }
  0xe3   :  { %6917 = vmatpush3.xpose.msk.msra.mxu0 %vm1831_vm2, %v127_v9  ;;  %6932 = vmatpush3.xpose.msk.msra.mxu1 %vm1831_vm2, %v220_v10 }
  0xe4   :  { %6941 = vmatprep.subr.mxu1 %v7575_v15  ;;  %6921 = vmatprep.subr.mxu0 %v7575_v15 }
  0xe7   :  { %v6728_v18 = vpop.f32.mrb[2].mxu0 }
  0xe8   :  { %v7997_v19 = vpop.f32.mrb[3].mxu0  ;;  %v6739_v20 = vpop.f32.mrb[2].mxu1  ;;  %v308_v58 = vadd.f32 %v6728_v18, %v6148_v51 }
  0xe9   :  { %v7999_v21 = vpop.f32.mrb[3].mxu1  ;;  %v396_v3 = vadd.f32 %v6739_v20, %v6156_v14  ;;  %v303_v5 = vadd.f32 %v6148_v51, %v7997_v19 }
  0xea   :  { %v391_v10 = vadd.f32 %v6156_v14, %v7999_v21 }
  0xef   :  { %v8001_v22 = vpop.f32.mrb[4].mxu0 }
  0xf0   :  { %v8003_v23 = vpop.f32.mrb[5].mxu0  ;;  %v8005_v24 = vpop.f32.mrb[4].mxu1 }
  0xf1   :  { %v8007_v26 = vpop.f32.mrb[5].mxu1 }
  0xf7   :  { %v8009_v27 = vpop.f32.mrb[6].mxu0 }
  0xf8   :  { %v8011_v28 = vpop.f32.mrb[7].mxu0  ;;  %v8013_v29 = vpop.f32.mrb[6].mxu1 }
  0xf9   :  { %v8015_v30 = vpop.f32.mrb[7].mxu1 }
  0xff   :  { %v6794_v16 = vpop.f32.mrb[8].mxu0 }
 0x100   :  { %v8028_v33 = vadd.f32 %v6794_v16, %v8020_v31  ;;  %v8030_v34 = vpop.f32.mrb[9].mxu0  ;;  %v6805_v35 = vpop.f32.mrb[8].mxu1 }
 0x101   :  { %v8033_v36 = vadd.f32 %v6805_v35, %v8025_v32  ;;  %v8035_v37 = vpop.f32.mrb[9].mxu1 }
 0x107   :  { %v8037_v38 = vpop.f32.mrb[10].mxu0 }
 0x108   :  { %v8039_v25 = vpop.f32.mrb[11].mxu0  ;;  %v8041_v39 = vpop.f32.mrb[10].mxu1 }
 0x109   :  { %v8043_v40 = vpop.f32.mrb[11].mxu1 }
 0x10f   :  { %v8045_v41 = vpop.f32.mrb[12].mxu0 }
 0x110   :  { %v8047_v42 = vpop.f32.mrb[13].mxu0  ;;  %v8049_v43 = vpop.f32.mrb[12].mxu1 }
 0x111   :  { %v8051_v44 = vpop.f32.mrb[13].mxu1 }
 0x117   :  { %v8053_v45 = vpop.f32.mrb[14].mxu0 }
 0x118   :  { %v8055_v46 = vpop.f32.mrb[15].mxu0  ;;  %v8057_v47 = vpop.f32.mrb[14].mxu1 }
 0x119   :  { %v8059_v48 = vpop.f32.mrb[15].mxu1 }
 0x11f   :  { %v6882_v53 = vpop.f32.mrb[16].mxu0 }
 0x120   :  { %v6893_v54 = vpop.f32.mrb[16].mxu1  ;;  %v1558_v11 = vpop.f32.mrb[17].mxu0  ;;  %v1564_v59 = vadd.f32 %v6882_v53, %v6260_v49 }
 0x121   :  { %v1652_v55 = vadd.f32 %v6893_v54, %v6268_v50  ;;  %v1559_v56 = vadd.f32 %v6260_v49, %v1558_v11  ;;  %v1646_v57 = vpop.f32.mrb[17].mxu1 }
 0x122   :  { %v1647_v61 = vadd.f32 %v6268_v50, %v1646_v57 }
 0x123   :  { %6934 = vmatmul.mubr.msk.f32.vlgmr.msra.gmra.mrb[20].mxu1 %vm1831_vm2, %v1652_v55  ;;  %6919 = vmatmul.mubr.msk.f32.vlgmr.msra.gmra.mrb[20].mxu0 %vm1831_vm2, %v1559_v56 }
 0x124   :  { %6942 = vmatpush3.xpose.msk.msra.mxu1 %vm1831_vm2, %v308_v58  ;;  %6922 = vmatpush3.xpose.msk.msra.mxu0 %vm1831_vm2, %v132_v6  ;;  %v6164_v6 = vld [vmem:[%s8624_s2 + $0x10] ss:$0 sm:$0xff] }
 0x125   :  { %6923 = vmatprep.mubr.msk.f32.mxu0 %vm7576_vm1, %v7575_v15  ;;  %6926 = vmatprep.subr.mxu0 %v7575_v15  ;;  %v490_v9 = vadd.f32 %v8001_v22, %v6164_v6 }
 0x126   :  { %6943 = vmatprep.mubr.msk.f32.mxu1 %vm7576_vm1, %v7575_v15  ;;  %6951 = vmatprep.subr.mxu1 %v7575_v15 }
 0x127   :  { %v6904_v62 = vpop.f32.mrb[18].mxu0  ;;  %6924 = vmatmul.mubr.msk.f32.vlgmr.msra.gmra.mrb[22].mxu0 %vm1831_vm2, %v1564_v59 }
 0x128   :  { %v1740_v0 = vadd.f32 %v6904_v62, %v6276_v60  ;;  %6927 = vmatpush3.xpose.msk.msra.mxu0 %vm1831_vm2, %v7991_v17  ;;  %6928 = vmatprep.mubr.msk.f32.mxu0 %vm7576_vm1, %v7575_v15  ;;  %v6915_v1 = vpop.f32.mrb[18].mxu1  ;;  %v1734_v2 = vpop.f32.mrb[19].mxu0  ;;  %v485_v17 = vadd.f32 %v6164_v6, %v8003_v23 }
 0x129   :  { %6936 = vmatprep.subr.mxu0 %v7575_v15  ;;  %v1822_v4 = vpop.f32.mrb[19].mxu1  ;;  %v1828_v7 = vadd.f32 %v6915_v1, %v6284_v63  ;;  %v1735_v8 = vadd.f32 %v6276_v60, %v1734_v2 }
 0x12a   :  { %6944 = vmatmul.mubr.msk.f32.vlgmr.msra.gmra.mrb[22].mxu1 %vm1831_vm2, %v1740_v0  ;;  %v1823_v12 = vadd.f32 %v6284_v63, %v1822_v4 }
 0x12b   :  { %6952 = vmatpush3.xpose.msk.msra.mxu1 %vm1831_vm2, %v396_v3  ;;  %6929 = vmatmul.mubr.msk.f32.vlgmr.msra.gmra.mrb[24].mxu0 %vm1831_vm2, %v1647_v61 }
 0x12c   :  { %6937 = vmatpush3.xpose.msk.msra.mxu0 %vm1831_vm2, %v303_v5  ;;  %6953 = vmatprep.mubr.msk.f32.mxu1 %vm7576_vm1, %v7575_v15 }
 0x12d   :  { %6961 = vmatprep.subr.mxu1 %v7575_v15  ;;  %6938 = vmatprep.mubr.msk.f32.mxu0 %vm7576_vm1, %v7575_v15 }
 0x12e   :  { %6946 = vmatprep.subr.mxu0 %v7575_v15  ;;  %6954 = vmatmul.mubr.msk.f32.vlgmr.msra.gmra.mrb[24].mxu1 %vm1831_vm2, %v1828_v7 }
 0x12f   :  { %6962 = vmatpush3.msra.mxu1 %v490_v9  ;;  %6939 = vmatmul.mubr.msk.f32.vlgmr.msra.gmra.mrb[26].mxu0 %vm1831_vm2, %v1735_v8 }
 0x130   :  { %6947 = vmatpush3.xpose.msk.msra.mxu0 %vm1831_vm2, %v391_v10  ;;  %6948 = vmatprep.mubr.msk.f32.mxu0 %vm7576_vm1, %v7575_v15 }
 0x131   :  { %6956 = vmatprep.subr.mxu0 %v7575_v15  ;;  %6963 = vmatprep.mubr.msk.f32.mxu1 %vm7576_vm1, %v7575_v15 }
 0x132   :  { %6971 = vmatprep.subr.mxu1 %v7575_v15 }
 0x133   :  { %6949 = vmatmul.mubr.msk.f32.vlgmr.msra.gmra.mrb[28].mxu0 %vm1831_vm2, %v1823_v12 }
 0x134   :  { %6957 = vmatpush3.msra.mxu0 %v485_v17  ;;  %6958 = vmatprep.mubr.msk.f32.mxu0 %vm7576_vm1, %v7575_v15 }
 0x135   :  { %6966 = vmatprep.subr.mxu0 %v7575_v15 }
 0x1f6   :  { %v1904_v18 = vpop.f32.mrb[20].mxu0  ;;  %v2132_v19 = vpop.f32.mrb[20].mxu1 }
 0x1f7   :  { %v2440_v20 = vmul.f32 0.35355338, %v1904_v18  ;;  %v6920_v21 = vpop.f32.mrb[21].mxu0  ;;  %v6935_v22 = vpop.f32.mrb[21].mxu1  ;;  %v2443_v56 = vmul.f32 0.35355338, %v2132_v19 }
 0x1f9   :  { %v2448_v16 = vsel %vm1831_vm2, %v2440_v20, -inf  ;;  %v2457_v63 = vsel %vm1831_vm2, %v2443_v56, -inf }
 0x1fa   :  { %2449 = vmax.xlane.f32.xlu0 %v2448_v16  ;;  %v1980_v35 = vpop.f32.mrb[22].mxu0 }
 0x1fb   :  { %v2441_v23 = vmul.f32 0.35355338, %v1980_v35  ;;  %v6925_v49 = vpop.f32.mrb[23].mxu0 }
 0x1fd   :  { %v2451_v50 = vsel %vm1831_vm2, %v2441_v23, -inf  ;;  %v2284_v51 = vpop.f32.mrb[22].mxu1 }
 0x1fe   :  { %2452 = vmax.xlane.f32.xlu0 %v2451_v50  ;;  %v2056_v53 = vpop.f32.mrb[24].mxu0  ;;  %v6945_v54 = vpop.f32.mrb[23].mxu1  ;;  %v2445_v62 = vmul.f32 0.35355338, %v2284_v51 }
 0x1ff   :  { %v2442_v11 = vmul.f32 0.35355338, %v2056_v53  ;;  %v6930_v55 = vpop.f32.mrb[25].mxu0 }
 0x200   :  { %v2463_v5 = vsel %vm1831_vm2, %v2445_v62, -inf }
 0x201   :  { %v2454_v57 = vsel %vm1831_vm2, %v2442_v11, -inf  ;;  %v2436_v58 = vpop.f32.mrb[24].mxu1 }
 0x202   :  { %2455 = vmax.xlane.f32.xlu1 %v2454_v57  ;;  %v2208_v59 = vpop.f32.mrb[26].mxu0  ;;  %v6955_v60 = vpop.f32.mrb[25].mxu1  ;;  %v2447_v4 = vmul.f32 0.35355338, %v2436_v58 }
 0x203   :  { %v2444_v14 = vmul.f32 0.35355338, %v2208_v59  ;;  %v6940_v61 = vpop.f32.mrb[27].mxu0 }
 0x204   :  { %v2469_v7 = vsel %vm1831_vm2, %v2447_v4, -inf }
 0x205   :  { %v2460_v0 = vsel %vm1831_vm2, %v2444_v14, -inf }
 0x206   :  { %2458 = vmax.xlane.f32.xlu1 %v2457_v63  ;;  %2461 = vmax.xlane.f32.xlu0 %v2460_v0  ;;  %v2360_v1 = vpop.f32.mrb[28].mxu0 }
 0x207   :  { %v2446_v2 = vmul.f32 0.35355338, %v2360_v1  ;;  %v6950_v3 = vpop.f32.mrb[29].mxu0 }
 0x209   :  { %v2466_v6 = vsel %vm1831_vm2, %v2446_v2, -inf }
 0x20a   :  { %2464 = vmax.xlane.f32.xlu1 %v2463_v5  ;;  %2467 = vmax.xlane.f32.xlu0 %v2466_v6 }
 0x20e   :  { %2470 = vmax.xlane.f32.xlu1 %v2469_v7 }
 0x287   :  { %v2450_v8 = vpop.xlane.xlu0 %2449 }
 0x288   :  { %v2472_v9 = vsub.f32 %v2440_v20, %v2450_v8 }
 0x28a   :  { %v2480_v10 = vmul.f32 1.442695, %v2472_v9 }
 0x28b   :  { %v2453_v12 = vpop.xlane.xlu0 %2452 }
 0x28c   :  { %7465 = vpow2.f32 %v2480_v10  ;;  %v2473_v17 = vsub.f32 %v2441_v23, %v2453_v12 }
 0x28e   :  { %v2482_v18 = vmul.f32 1.442695, %v2473_v17 }
 0x28f   :  { %v2456_v19 = vpop.xlane.xlu1 %2455 }
 0x290   :  { %7467 = vpow2.f32 %v2482_v18  ;;  %v2474_v21 = vsub.f32 %v2442_v11, %v2456_v19  ;;  %v6172_v19 = vld [vmem:[%s8624_s2 + $0x11] ss:$0 sm:$0xff] }
 0x292   :  { %v2484_v22 = vmul.f32 1.442695, %v2474_v21 }
 0x293   :  { %v2459_v16 = vpop.xlane.xlu1 %2458  ;;  %v2462_v35 = vpop.xlane.xlu0 %2461 }
 0x294   :  { %7469 = vpow2.f32 %v2484_v22  ;;  %v2475_v49 = vsub.f32 %v2443_v56, %v2459_v16  ;;  %v2476_v50 = vsub.f32 %v2444_v14, %v2462_v35  ;;  %v573_v35 = vadd.f32 %v6172_v19, %v8007_v26  ;;  %v6180_v26 = vld [vmem:[%s8624_s2 + $0x12] ss:$0 sm:$0xff] }
 0x296   :  { %v7466_v51 = vpop.eup %7465  ;;  %v2486_v53 = vmul.f32 1.442695, %v2475_v49  ;;  %v2488_v54 = vmul.f32 1.442695, %v2476_v50 }
 0x297   :  { %v2465_v55 = vpop.xlane.xlu1 %2464  ;;  %v2468_v57 = vpop.xlane.xlu0 %2467  ;;  %v2496_v20 = vsel %vm1831_vm2, %v7466_v51, 0.0 }
 0x298   :  { %7471 = vpow2.f32 %v2486_v53  ;;  %v2477_v58 = vsub.f32 %v2445_v62, %v2465_v55  ;;  %v2478_v23 = vsub.f32 %v2446_v2, %v2468_v57  ;;  %2497 = vadd.xlane.f32.xlu0 %v2496_v20  ;;  %v578_v55 = vadd.f32 %v8005_v24, %v6172_v19 }
 0x299   :  { %7473 = vpow2.f32 %v2488_v54  ;;  %v661_v24 = vadd.f32 %v6180_v26, %v8011_v28 }
 0x29a   :  { %v7468_v59 = vpop.eup %7467  ;;  %v2490_v11 = vmul.f32 1.442695, %v2477_v58  ;;  %v2492_v60 = vmul.f32 1.442695, %v2478_v23 }
 0x29b   :  { %v2471_v61 = vpop.xlane.xlu1 %2470  ;;  %v2499_v63 = vsel %vm1831_vm2, %v7468_v59, 0.0 }
 0x29c   :  { %7475 = vpow2.f32 %v2490_v11  ;;  %v2479_v56 = vsub.f32 %v2447_v4, %v2471_v61  ;;  %2500 = vadd.xlane.f32.xlu1 %v2499_v63  ;;  %v666_v61 = vadd.f32 %v8009_v27, %v6180_v26 }
 0x29d   :  { %7477 = vpow2.f32 %v2492_v60 }
 0x29e   :  { %v7470_v14 = vpop.eup %7469  ;;  %v2494_v0 = vmul.f32 1.442695, %v2479_v56 }
 0x29f   :  { %v2502_v1 = vsel %vm1831_vm2, %v7470_v14, 0.0 }
 0x2a0   :  { %7479 = vpow2.f32 %v2494_v0  ;;  %2503 = vadd.xlane.f32.xlu0 %v2502_v1 }
 0x2a2   :  { %v7472_v62 = vpop.eup %7471 }
 0x2a3   :  { %v7474_v2 = vpop.eup %7473  ;;  %v2505_v3 = vsel %vm1831_vm2, %v7472_v62, 0.0 }
 0x2a4   :  { %2506 = vadd.xlane.f32.xlu1 %v2505_v3  ;;  %v2508_v5 = vsel %vm1831_vm2, %v7474_v2, 0.0  ;;  %v3122_v3 = vld [vmem:[%s8625_s3 + $0x10] sm:$0xff] }
 0x2a5   :  { %2509 = vadd.xlane.f32.xlu0 %v2508_v5  ;;  %v3123_v5 = vld [vmem:[%s8625_s3 + $0x18] sm:$0xff] }
 0x2a6   :  { %v7476_v6 = vpop.eup %7475 }
 0x2a7   :  { %v8138_v7 = vpop.eup %7477  ;;  %v2511_v4 = vsel %vm1831_vm2, %v7476_v6, 0.0 }
 0x2a8   :  { %2512 = vadd.xlane.f32.xlu1 %v2511_v4  ;;  %v2514_v8 = vsel %vm1831_vm2, %v8138_v7, 0.0 }
 0x2a9   :  { %2515 = vadd.xlane.f32.xlu0 %v2514_v8 }
 0x2aa   :  { %v8143_v9 = vpop.eup %7479 }
 0x2ab   :  { %v2517_v10 = vsel %vm1831_vm2, %v8143_v9, 0.0 }
 0x2ac   :  { %2518 = vadd.xlane.f32.xlu1 %v2517_v10 }
 0x325   :  { %v2498_v12 = vpop.xlane.xlu0 %2497 }
 0x326   :  { %7481 = vrcp.f32 %v2498_v12 }
 0x329   :  { %v2501_v17 = vpop.xlane.xlu1 %2500 }
 0x32a   :  { %7483 = vrcp.f32 %v2501_v17 }
 0x32d   :  { %v2504_v18 = vpop.xlane.xlu0 %2503 }
 0x32e   :  { %7485 = vrcp.f32 %v2504_v18 }
 0x330   :  { %v7482_v21 = vpop.eup %7481 }
 0x331   :  { %v2521_v22 = vmul.f32 %v7482_v21, %v7466_v51  ;;  %v2507_v16 = vpop.xlane.xlu1 %2506 }
 0x332   :  { %7487 = vrcp.f32 %v2507_v16  ;;  %v2510_v49 = vpop.xlane.xlu0 %2509 }
 0x333   :  { %7489 = vrcp.f32 %v2510_v49  ;;  %6959 = vmatmul.mubr.msk.f32.vlgmr.msra.gmra.mrb[30].mxu0 %vm1831_vm2, %v2521_v22 }
 0x334   :  { %v7484_v50 = vpop.eup %7483  ;;  %6967 = vmatpush3.msra.mxu0 %v573_v35  ;;  %6968 = vmatprep.mubr.msk.f32.mxu0 %vm7576_vm1, %v7575_v15 }
 0x335   :  { %v2523_v53 = vmul.f32 %v7484_v50, %v7468_v59  ;;  %v2513_v54 = vpop.xlane.xlu1 %2512  ;;  %6976 = vmatprep.subr.mxu0 %v7575_v15  ;;  %v6188_v59 = vld [vmem:[%s8624_s2 + $0x13] ss:$0 sm:$0xff] }
 0x336   :  { %7491 = vrcp.f32 %v2513_v54  ;;  %v2516_v51 = vpop.xlane.xlu0 %2515  ;;  %v749_v28 = vadd.f32 %v6188_v59, %v8015_v30  ;;  %v754_v1 = vadd.f32 %v8013_v29, %v6188_v59  ;;  %v3120_v29 = vld [vmem:[%s8625_s3] sm:$0xff] }
 0x337   :  { %7493 = vrcp.f32 %v2516_v51  ;;  %6964 = vmatmul.mubr.msk.f32.vlgmr.msra.gmra.mrb[26].mxu1 %vm1831_vm2, %v2523_v53 }
 0x338   :  { %v7486_v57 = vpop.eup %7485  ;;  %6972 = vmatpush3.msra.mxu1 %v578_v55  ;;  %6973 = vmatprep.mubr.msk.f32.mxu1 %vm7576_vm1, %v7575_v15 }
 0x339   :  { %v2525_v20 = vmul.f32 %v7486_v57, %v7470_v14  ;;  %v2519_v58 = vpop.xlane.xlu1 %2518  ;;  %6981 = vmatprep.subr.mxu1 %v7575_v15 }
 0x33a   :  { %7495 = vrcp.f32 %v2519_v58 }
 0x33b   :  { %6969 = vmatmul.mubr.msk.f32.vlgmr.msra.gmra.mrb[32].mxu0 %vm1831_vm2, %v2525_v20 }
 0x33c   :  { %v7488_v23 = vpop.eup %7487  ;;  %6977 = vmatpush3.msra.mxu0 %v661_v24  ;;  %6978 = vmatprep.mubr.msk.f32.mxu0 %vm7576_vm1, %v7575_v15 }
 0x33d   :  { %v7490_v11 = vpop.eup %7489  ;;  %v2527_v60 = vmul.f32 %v7488_v23, %v7472_v62  ;;  %6986 = vmatprep.subr.mxu0 %v7575_v15 }
 0x33e   :  { %v2529_v63 = vmul.f32 %v7490_v11, %v7474_v2  ;;  %v3121_v2 = vld [vmem:[%s8625_s3 + $0x8] sm:$0xff] }
 0x33f   :  { %6974 = vmatmul.mubr.msk.f32.vlgmr.msra.gmra.mrb[28].mxu1 %vm1831_vm2, %v2527_v60 }
 0x340   :  { %v7492_v56 = vpop.eup %7491  ;;  %6979 = vmatmul.mubr.msk.f32.vlgmr.msra.gmra.mrb[34].mxu0 %vm1831_vm2, %v2529_v63  ;;  %6982 = vmatpush3.msra.mxu1 %v666_v61 }
 0x341   :  { %v7494_v14 = vpop.eup %7493  ;;  %v2531_v0 = vmul.f32 %v7492_v56, %v7476_v6  ;;  %6987 = vmatpush3.msra.mxu0 %v749_v28  ;;  %6983 = vmatprep.mubr.msk.f32.mxu1 %vm7576_vm1, %v7575_v15 }
 0x342   :  { %v2533_v62 = vmul.f32 %v7494_v14, %v8138_v7  ;;  %6988 = vmatprep.mubr.msk.f32.mxu0 %vm7576_vm1, %v7575_v15  ;;  %6991 = vmatprep.subr.mxu1 %v7575_v15  ;;  %v6319_v14 = vld [vmem:[%s8629_s7] ss:$0 sm:$0xff] }
 0x343   :  { %6984 = vmatmul.mubr.msk.f32.vlgmr.msra.gmra.mrb[30].mxu1 %vm1831_vm2, %v2531_v0  ;;  %6996 = vmatprep.subr.mxu0 %v3120_v29 }
 0x344   :  { %v7496_v27 = vpop.eup %7495  ;;  %6989 = vmatmul.mubr.msk.f32.vlgmr.msra.gmra.mrb[36].mxu0 %vm1831_vm2, %v2533_v62  ;;  %6992 = vmatpush3.msra.mxu1 %v754_v1 }
 0x345   :  { %v2535_v30 = vmul.f32 %v7496_v27, %v8143_v9  ;;  %6993 = vmatprep.mubr.msk.f32.mxu1 %vm7576_vm1, %v7575_v15  ;;  %6997 = vmatpush3.msra.mxu0 %v3120_v29 }
 0x346   :  { %7001 = vmatprep.subr.mxu1 %v3121_v2  ;;  %7006 = vmatprep.subr.mxu0 %v3122_v3 }
 0x347   :  { %6994 = vmatmul.mubr.msk.f32.vlgmr.msra.gmra.mrb[32].mxu1 %vm1831_vm2, %v2535_v30 }
 0x348   :  { %7002 = vmatpush3.msra.mxu1 %v3121_v2 }
 0x349   :  { %7011 = vmatprep.subr.mxu1 %v3123_v5 }
 0x406   :  { %v2605_v6 = vpop.f32.mrb[30].mxu0 }
 0x407   :  { %v6960_v7 = vpop.f32.mrb[31].mxu0  ;;  %6998 = vmatprep.mubr.msk.f32.mxu0 %vm1831_vm2, %v2605_v6 }
 0x40a   :  { %v2678_v4 = vpop.f32.mrb[26].mxu1 }
 0x40b   :  { %v6965_v8 = vpop.f32.mrb[27].mxu1  ;;  %6999 = vmatmul.mubr.msk.f32.vlgmr.msra.gmra.mrb[38].mxu0 %vm1831_vm2, %v2678_v4 }
 0x40c   :  { %7007 = vmatpush3.msra.mxu0 %v3122_v3 }
 0x40e   :  { %v2751_v9 = vpop.f32.mrb[32].mxu0 }
 0x40f   :  { %v6970_v10 = vpop.f32.mrb[33].mxu0  ;;  %7003 = vmatprep.mubr.msk.f32.mxu1 %vm1831_vm2, %v2751_v9 }
 0x412   :  { %v2824_v12 = vpop.f32.mrb[28].mxu1 }
 0x413   :  { %v2897_v17 = vpop.f32.mrb[34].mxu0  ;;  %v6975_v18 = vpop.f32.mrb[29].mxu1  ;;  %7004 = vmatmul.mubr.msk.f32.vlgmr.msra.gmra.mrb[34].mxu1 %vm1831_vm2, %v2824_v12  ;;  %v3521_v12 = vld [vmem:[%s8626_s4 + $0x10] sm:$0xff] }
 0x414   :  { %v6980_v19 = vpop.f32.mrb[35].mxu0  ;;  %7008 = vmatprep.mubr.msk.f32.mxu0 %vm1831_vm2, %v2897_v17  ;;  %7012 = vmatpush3.msra.mxu1 %v3123_v5  ;;  %v3522_v18 = vld [vmem:[%s8626_s4 + $0x18] sm:$0xff] }
 0x415   :  { %v7384_v19 = vpack.c.bf16 %v3522_v18, %v3521_v12 }
 0x416   :  { %v2970_v21 = vpop.f32.mrb[30].mxu1 }
 0x417   :  { %v3043_v22 = vpop.f32.mrb[36].mxu0  ;;  %v6985_v16 = vpop.f32.mrb[31].mxu1  ;;  %7009 = vmatmul.mubr.msk.f32.vlgmr.msra.gmra.mrb[40].mxu0 %vm1831_vm2, %v2970_v21  ;;  %v3612_v21 = vld [vmem:[%s8627_s5] sm:$0xff] }
 0x418   :  { %v6990_v35 = vpop.f32.mrb[37].mxu0  ;;  %7013 = vmatprep.mubr.msk.f32.mxu1 %vm1831_vm2, %v3043_v22  ;;  %v3613_v22 = vld [vmem:[%s8627_s5 + $0x8] sm:$0xff]  ;;  %v3614_v16 = vld [vmem:[%s8627_s5 + $0x10] sm:$0xff] }
 0x419   :  { %v7388_v35 = vpack.c.bf16 %v3613_v22, %v3612_v21  ;;  %v6325_v21 = vld [vmem:[%s8629_s7 + $0x3] ss:$0 sm:$0xff] }
 0x41a   :  { %v3116_v49 = vpop.f32.mrb[32].mxu1 }
 0x41b   :  { %v6995_v50 = vpop.f32.mrb[33].mxu1  ;;  %7014 = vmatmul.mubr.msk.f32.vlgmr.msra.gmra.mrb[36].mxu1 %vm1831_vm2, %v3116_v49  ;;  %v3615_v49 = vld [vmem:[%s8627_s5 + $0x18] sm:$0xff]  ;;  %7389 = vmatprep.subr.bf16.mxu1 %v7388_v35 }
 0x41c   :  { %v7392_v50 = vpack.c.bf16 %v3615_v49, %v3614_v16  ;;  %7391 = vmatpush3.bf16.msra.mxu1 %v7388_v35 }
 0x41e   :  { %7393 = vmatprep.subr.bf16.mxu1 %v7392_v50 }
 0x420   :  { %7395 = vmatpush3.bf16.msra.mxu1 %v7392_v50 }
 0x4de   :  { %v7000_v53 = vpop.f32.mrb[38].mxu0 }
 0x4df   :  { %v3196_v54 = vpop.f32.mrb[39].mxu0  ;;  %v3455_v51 = vsel %vm53_vm0, %v7000_v53, 0.0  ;;  %v3616_v53 = vld [vmem:[%s8627_s5 + $0x20] sm:$0xff] }
 0x4e0   :  { %v3448_v20 = vsel %vm53_vm0, %v3196_v54, 0.0  ;;  %v3617_v54 = vld [vmem:[%s8627_s5 + $0x28] sm:$0xff] }
 0x4e6   :  { %v7005_v55 = vpop.f32.mrb[34].mxu1 }
 0x4e7   :  { %v3456_v26 = vsel %vm53_vm0, %v7005_v55, 0.0  ;;  %v3277_v57 = vpop.f32.mrb[35].mxu1  ;;  %v7396_v55 = vpack.c.bf16 %v3617_v54, %v3616_v53 }
 0x4e8   :  { %v3457_v58 = vadd.f32 %v3456_v26, %v3455_v51  ;;  %v3449_v24 = vsel %vm53_vm0, %v3277_v57, 0.0 }
 0x4e9   :  { %v3450_v23 = vadd.f32 %v3449_v24, %v3448_v20  ;;  %7397 = vmatprep.subr.bf16.mxu1 %v7396_v55 }
 0x4ea   :  { %v7010_v59 = vpop.f32.mrb[40].mxu0  ;;  %7399 = vmatpush3.bf16.msra.mxu1 %v7396_v55 }
 0x4eb   :  { %v3458_v11 = vsel %vm53_vm0, %v7010_v59, 0.0  ;;  %v3358_v60 = vpop.f32.mrb[41].mxu0 }
 0x4ec   :  { %v3459_v61 = vadd.f32 %v3458_v11, %v3457_v58  ;;  %v3451_v63 = vsel %vm53_vm0, %v3358_v60, 0.0 }
 0x4ed   :  { %v3452_v28 = vadd.f32 %v3451_v63, %v3450_v23 }
 0x4ee   :  { %v7015_v56 = vpop.f32.mrb[36].mxu1 }
 0x4ef   :  { %v3460_v0 = vsel %vm53_vm0, %v7015_v56, 0.0  ;;  %v3439_v1 = vpop.f32.mrb[37].mxu1 }
 0x4f0   :  { %v3461_v62 = vadd.f32 %v3460_v0, %v3459_v61  ;;  %v3453_v27 = vsel %vm53_vm0, %v3439_v1, 0.0 }
 0x4f1   :  { %v3454_v30 = vadd.f32 %v3453_v27, %v3452_v28 }
 0x4f2   :  { %v3469_v29 = vadd.f32 %v6319_v14, %v3461_v62  ;;  %v6320_v62 = vld [vmem:[%s8629_s7 + $0x1] ss:$0 sm:$0xff] }
 0x4f3   :  { %v3468_v2 = vadd.f32 %v6319_v14, %v3454_v30 }
 0x4f4   :  { %v3471_v3 = vadd.f32 %v3469_v29, %v7955_v13  ;;  %v3519_v13 = vld [vmem:[%s8626_s4] sm:$0xff] }
 0x4f5   :  { %v3470_v5 = vadd.f32 %v3468_v2, %v7932_v52  ;;  %v3520_v52 = vld [vmem:[%s8626_s4 + $0x8] sm:$0xff]  ;;  %v6321_v2 = vld [vmem:[%s8629_s7 + $0x2] ss:$0 sm:$0xff] }
 0x4f6   :  { %v3475_v6 = vsel %vm53_vm0, %v3471_v3, 0.0  ;;  %v3482_v7 = vmul.f32 %v3471_v3, %v3471_v3  ;;  %v7380_v17 = vpack.c.bf16 %v3520_v52, %v3519_v13 }
 0x4f7   :  { %3476 = vadd.xlane.f32.xlu1 %v3475_v6  ;;  %v3472_v4 = vsel %vm53_vm0, %v3470_v5, 0.0  ;;  %v3481_v8 = vmul.f32 %v3470_v5, %v3470_v5 }
 0x4f8   :  { %3473 = vadd.xlane.f32.xlu0 %v3472_v4  ;;  %v3486_v9 = vsel %vm53_vm0, %v3482_v7, 0.0  ;;  %7381 = vmatprep.subr.bf16.mxu0 %v7380_v17 }
 0x4f9   :  { %v3483_v10 = vsel %vm53_vm0, %v3481_v8, 0.0  ;;  %7383 = vmatpush3.bf16.msra.mxu0 %v7380_v17 }
 0x4fa   :  { %7385 = vmatprep.subr.bf16.mxu0 %v7384_v19 }
 0x4fb   :  { %3487 = vadd.xlane.f32.xlu1 %v3486_v9 }
 0x4fc   :  { %3484 = vadd.xlane.f32.xlu0 %v3483_v10  ;;  %v6322_v10 = vld [vmem:[%s8628_s6] ss:$0 sm:$0xff] }
 0x4fd   :  { %7387 = vmatpush3.bf16.msra.mxu0 %v7384_v19 }
 0x584   :  { %v3477_v51 = vpop.xlane.xlu1 %3476 }
 0x585   :  { %v3480_v26 = vmul.f32 0.03125, %v3477_v51  ;;  %v3474_v57 = vpop.xlane.xlu0 %3473 }
 0x586   :  { %v3479_v20 = vmul.f32 0.03125, %v3474_v57 }
 0x587   :  { %v3492_v24 = vmul.f32 %v3480_v26, %v3480_v26  ;;  %v3496_v14 = vsub.f32 %v3471_v3, %v3480_v26  ;;  %v3618_v3 = vld [vmem:[%s8627_s5 + $0x30] sm:$0xff] }
 0x588   :  { %v3488_v58 = vpop.xlane.xlu1 %3487  ;;  %v3491_v11 = vmul.f32 %v3479_v20, %v3479_v20  ;;  %v3495_v1 = vsub.f32 %v3470_v5, %v3479_v20  ;;  %v3619_v5 = vld [vmem:[%s8627_s5 + $0x38] sm:$0xff] }
 0x589   :  { %v3490_v23 = vmul.f32 0.03125, %v3488_v58  ;;  %v3485_v59 = vpop.xlane.xlu0 %3484  ;;  %v7400_v9 = vpack.c.bf16 %v3619_v5, %v3618_v3  ;;  %v6353_v58 = vld [vmem:[%s8623_s1 + $0xc0] sm:$0xff] }
 0x58a   :  { %v3489_v60 = vmul.f32 0.03125, %v3485_v59  ;;  %v6355_v59 = vld [vmem:[%s8623_s1 + $0xd0] sm:$0xff] }
 0x58b   :  { %v3494_v61 = vsub.f32 %v3490_v23, %v3492_v24  ;;  %7401 = vmatprep.subr.bf16.mxu1 %v7400_v9  ;;  %v6354_v24 = vld [vmem:[%s8623_s1 + $0xc8] sm:$0xff] }
 0x58c   :  { %v3493_v63 = vsub.f32 %v3489_v60, %v3491_v11  ;;  %7403 = vmatpush3.bf16.msra.mxu1 %v7400_v9  ;;  %v7420_v23 = vpack.c.bf16 %v6354_v24, %v6353_v58  ;;  %v6356_v11 = vld [vmem:[%s8623_s1 + $0xd8] sm:$0xff]  ;;  %v7550_v58 = vld [vmem:[%s8622_s0 + $0x28] sm:$0xff] }
 0x58d   :  { %v3498_v28 = vadd.f32 1e-05, %v3494_v61  ;;  %v7424_v60 = vpack.c.bf16 %v6356_v11, %v6355_v59  ;;  %v6337_v61 = vld [vmem:[%s8623_s1 + $0x80] sm:$0xff]  ;;  %v837_v59 = vadd.f32 %v8020_v31, %v8030_v34  ;;  %v6363_v34 = vld [vmem:[%s8623_s1 + $0xf0] sm:$0xff] }
 0x58e   :  { %v3497_v56 = vadd.f32 1e-05, %v3493_v63  ;;  %7421 = vmatprep.subr.bf16.mxu1 %v7420_v23  ;;  %v6338_v63 = vld [vmem:[%s8623_s1 + $0x88] sm:$0xff]  ;;  %v6361_v11 = vld [vmem:[%s8623_s1 + $0xe0] sm:$0xff] }
 0x58f   :  { %7497 = vrsqrt.f32 %v3498_v28  ;;  %v6339_v28 = vld [vmem:[%s8623_s1 + $0x90] sm:$0xff] }
 0x590   :  { %7499 = vrsqrt.f32 %v3497_v56  ;;  %v7404_v56 = vpack.c.bf16 %v6338_v63, %v6337_v61  ;;  %v6364_v61 = vld [vmem:[%s8623_s1 + $0xf8] sm:$0xff] }
 0x591   :  { %v7432_v63 = vpack.c.bf16 %v6364_v61, %v6363_v34 }
 0x592   :  { %7405 = vmatprep.subr.bf16.mxu0 %v7404_v56 }
 0x599   :  { %v7498_v0 = vpop.eup %7497 }
 0x59a   :  { %v7500_v27 = vpop.eup %7499  ;;  %v3502_v30 = vmul.f32 %v7498_v0, %v3496_v14  ;;  %v6340_v14 = vld [vmem:[%s8623_s1 + $0x98] sm:$0xff] }
 0x59b   :  { %v3501_v29 = vmul.f32 %v7500_v27, %v3495_v1  ;;  %v7408_v0 = vpack.c.bf16 %v6340_v14, %v6339_v28  ;;  %v6345_v1 = vld [vmem:[%s8623_s1 + $0xa0] sm:$0xff]  ;;  %v925_v28 = vadd.f32 %v8025_v32, %v8035_v37 }
 0x59c   :  { %v3510_v6 = vmul.f32 %v6320_v62, %v3502_v30  ;;  %v6350_v37 = vld [vmem:[%s8624_s2 + $0x5] ss:$0 sm:$0xff] }
 0x59d   :  { %v3509_v7 = vmul.f32 %v6320_v62, %v3501_v29  ;;  %v6346_v62 = vld [vmem:[%s8623_s1 + $0xa8] sm:$0xff] }
 0x59e   :  { %v3518_v8 = vadd.f32 %v6321_v2, %v3510_v6  ;;  %v7412_v27 = vpack.c.bf16 %v6346_v62, %v6345_v1 }
 0x59f   :  { %v3517_v4 = vadd.f32 %v6321_v2, %v3509_v7 }
 0x5a1   :  { %7024 = vmatprep.mubr.msk.f32.mxu0 %vm53_vm0, %v3517_v4 }
 0x5a2   :  { %7025 = vmatmul.mubr.msk.f32.vlgmr.msra.gmra.mrb[42].mxu0 %vm53_vm0, %v3518_v8 }
 0x5a3   :  { %7407 = vmatpush3.bf16.msra.mxu0 %v7404_v56  ;;  %v6342_v56 = vld [vmem:[%s8624_s2 + $0x4] ss:$0 sm:$0xff] }
 0x5a4   :  { %7409 = vmatprep.subr.bf16.mxu0 %v7408_v0 }
 0x5a7   :  { %7411 = vmatpush3.bf16.msra.mxu0 %v7408_v0 }
 0x5a8   :  { %7413 = vmatprep.subr.bf16.mxu0 %v7412_v27 }
 0x675   :  { %v7026_v13 = vpop.f32.mrb[42].mxu0 }
 0x676   :  { %v3607_v52 = vadd.f32 %v7026_v13, %v6322_v10  ;;  %v3601_v12 = vpop.f32.mrb[43].mxu0 }
 0x677   :  { %v3602_v17 = vadd.f32 %v6322_v10, %v3601_v12 }
 0x678   :  { %v3611_v19 = vmax.f32 %v3607_v52, 0.0 }
 0x679   :  { %v3610_v18 = vmax.f32 %v3602_v17, 0.0 }
 0x67b   :  { %7043 = vmatprep.mubr.msk.f32.mxu1 %vm3626_vm3, %v3610_v18 }
 0x67c   :  { %7044 = vmatmul.mubr.msk.f32.vlgmr.msra.gmra.mrb[38].mxu1 %vm3626_vm3, %v3611_v19 }
 0x67d   :  { %7423 = vmatpush3.bf16.msra.mxu1 %v7420_v23 }
 0x67e   :  { %7425 = vmatprep.subr.bf16.mxu1 %v7424_v60 }
 0x681   :  { %7427 = vmatpush3.bf16.msra.mxu1 %v7424_v60  ;;  %v6362_v60 = vld [vmem:[%s8623_s1 + $0xe8] sm:$0xff] }
 0x682   :  { %7090 = vmatprep.subr.mxu1 %v7575_v15  ;;  %v7428_v31 = vpack.c.bf16 %v6362_v60, %v6361_v11 }
 0x74f   :  { %v7045_v22 = vpop.f32.mrb[38].mxu1 }
 0x750   :  { %v3705_v16 = vadd.f32 %v7045_v22, %v6325_v21  ;;  %v3699_v35 = vpop.f32.mrb[39].mxu1 }
 0x751   :  { %v3700_v49 = vadd.f32 %v6325_v21, %v3699_v35  ;;  %v6328_v21 = vld [vmem:[%s8629_s7 + $0x4] ss:$0 sm:$0xff]  ;;  %v6329_v35 = vld [vmem:[%s8629_s7 + $0x5] ss:$0 sm:$0xff] }
 0x752   :  { %v3709_v50 = vadd.f32 %v3705_v16, %v3518_v8 }
 0x753   :  { %v3708_v53 = vadd.f32 %v3700_v49, %v3517_v4 }
 0x754   :  { %v3713_v54 = vsel %vm53_vm0, %v3709_v50, 0.0  ;;  %v3719_v55 = vmul.f32 %v3709_v50, %v3709_v50 }
 0x755   :  { %3714 = vadd.xlane.f32.xlu1 %v3713_v54  ;;  %v3710_v51 = vsel %vm53_vm0, %v3708_v53, 0.0  ;;  %v3718_v26 = vmul.f32 %v3708_v53, %v3708_v53 }
 0x756   :  { %3711 = vadd.xlane.f32.xlu0 %v3710_v51  ;;  %v3723_v57 = vsel %vm53_vm0, %v3719_v55, 0.0 }
 0x757   :  { %v3720_v20 = vsel %vm53_vm0, %v3718_v26, 0.0 }
 0x759   :  { %3724 = vadd.xlane.f32.xlu1 %v3723_v57  ;;  %v7549_v57 = vld [vmem:[%s8622_s0 + $0x20] sm:$0xff] }
 0x75a   :  { %3721 = vadd.xlane.f32.xlu0 %v3720_v20 }
 0x7e2   :  { %v3715_v30 = vpop.xlane.xlu1 %3714 }
 0x7e3   :  { %v3717_v29 = vmul.f32 0.03125, %v3715_v30  ;;  %v3712_v2 = vpop.xlane.xlu0 %3711  ;;  %v6212_v30 = vld [vmem:[%s8624_s2 + $0xe] ss:$0 sm:$0xff] }
 0x7e4   :  { %v3716_v6 = vmul.f32 0.03125, %v3712_v2 }
 0x7e5   :  { %v3729_v4 = vmul.f32 %v3717_v29, %v3717_v29  ;;  %v3733_v17 = vsub.f32 %v3709_v50, %v3717_v29  ;;  %v6347_v50 = vld [vmem:[%s8623_s1 + $0xb0] sm:$0xff] }
 0x7e6   :  { %v3725_v7 = vpop.xlane.xlu1 %3724  ;;  %v3728_v5 = vmul.f32 %v3716_v6, %v3716_v6  ;;  %v3732_v19 = vsub.f32 %v3708_v53, %v3716_v6  ;;  %v6348_v53 = vld [vmem:[%s8623_s1 + $0xb8] sm:$0xff] }
 0x7e7   :  { %v3727_v8 = vmul.f32 0.03125, %v3725_v7  ;;  %v3722_v3 = vpop.xlane.xlu0 %3721  ;;  %v7416_v23 = vpack.c.bf16 %v6348_v53, %v6347_v50  ;;  %v1018_v7 = vadd.f32 %v8037_v38, %v6212_v30 }
 0x7e8   :  { %v3726_v9 = vmul.f32 0.03125, %v3722_v3  ;;  %v6220_v3 = vld [vmem:[%s8624_s2 + $0xf] ss:$0 sm:$0xff] }
 0x7e9   :  { %v3731_v10 = vsub.f32 %v3727_v8, %v3729_v4  ;;  %v1013_v4 = vadd.f32 %v6212_v30, %v8039_v25  ;;  %v6358_v8 = vld [vmem:[%s8624_s2 + $0x6] ss:$0 sm:$0xff]  ;;  %v1106_v25 = vadd.f32 %v8041_v39, %v6220_v3 }
 0x7ea   :  { %v3730_v13 = vsub.f32 %v3726_v9, %v3728_v5  ;;  %v1101_v5 = vadd.f32 %v6220_v3, %v8043_v40  ;;  %v6366_v9 = vld [vmem:[%s8624_s2 + $0x7] ss:$0 sm:$0xff] }
 0x7eb   :  { %v3735_v52 = vadd.f32 1e-05, %v3731_v10  ;;  %v6228_v10 = vld [vmem:[%s8624_s2 + $0x14] ss:$0 sm:$0xff] }
 0x7ec   :  { %v3734_v12 = vadd.f32 1e-05, %v3730_v13 }
 0x7ed   :  { %7501 = vrsqrt.f32 %v3735_v52 }
 0x7ee   :  { %7503 = vrsqrt.f32 %v3734_v12  ;;  %v1194_v12 = vadd.f32 %v8045_v41, %v6228_v10 }
 0x7f7   :  { %v7502_v18 = vpop.eup %7501 }
 0x7f8   :  { %v7504_v22 = vpop.eup %7503  ;;  %v3739_v16 = vmul.f32 %v7502_v18, %v3733_v17  ;;  %v1189_v17 = vadd.f32 %v6228_v10, %v8047_v42 }
 0x7f9   :  { %v3738_v49 = vmul.f32 %v7504_v22, %v3732_v19 }
 0x7fa   :  { %v3747_v54 = vmul.f32 %v6328_v21, %v3739_v16 }
 0x7fb   :  { %v3746_v55 = vmul.f32 %v6328_v21, %v3738_v49 }
 0x7fc   :  { %v8318_v51 = vadd.f32 %v6329_v35, %v3747_v54 }
 0x7fd   :  { %v8320_v26 = vadd.f32 %v6329_v35, %v3746_v55 }
 0x7fe   :  { %v3771_v24 = vadd.f32 %v7550_v58, %v8318_v51 }
 0x7ff   :  { %v3770_v20 = vadd.f32 %v7549_v57, %v8320_v26 }
 0x801   :  { %7054 = vmatprep.mubr.msk.f32.mxu0 %vm53_vm0, %v3770_v20  ;;  %7076 = vmatprep.mubr.msk.f32.mxu1 %vm53_vm0, %v3770_v20 }
 0x802   :  { %7055 = vmatmul.mubr.msk.f32.vlgmr.msra.gmra.mrb[44].mxu0 %vm53_vm0, %v3771_v24  ;;  %7077 = vmatmul.mubr.msk.f32.vlgmr.msra.gmra.mrb[40].mxu1 %vm53_vm0, %v3771_v24 }
 0x803   :  { %7415 = vmatpush3.bf16.msra.mxu0 %v7412_v27  ;;  %7091 = vmatpush3.xpose.msk.msra.mxu1 %vm1831_vm2, %v837_v59 }
 0x804   :  { %7065 = vmatprep.mubr.msk.f32.mxu0 %vm53_vm0, %v3770_v20  ;;  %7417 = vmatprep.subr.bf16.mxu0 %v7416_v23 }
 0x805   :  { %7092 = vmatprep.mubr.msk.f32.mxu1 %vm7576_vm1, %v7575_v15  ;;  %7095 = vmatprep.subr.mxu1 %v7575_v15 }
 0x807   :  { %7419 = vmatpush3.bf16.msra.mxu0 %v7416_v23 }
 0x808   :  { %7429 = vmatprep.subr.bf16.mxu0 %v7428_v31 }
 0x80a   :  { %7066 = vmatmul.mubr.msk.f32.vlgmr.msra.gmra.mrb[46].mxu0 %vm53_vm0, %v3771_v24 }
 0x80b   :  { %7431 = vmatpush3.bf16.msra.mxu0 %v7428_v31  ;;  %7087 = vmatprep.mubr.msk.f32.mxu0 %vm53_vm0, %v3770_v20 }
 0x80c   :  { %7433 = vmatprep.subr.bf16.mxu0 %v7432_v63 }
 0x80f   :  { %7435 = vmatpush3.bf16.msra.mxu0 %v7432_v63 }
 0x810   :  { %7100 = vmatprep.subr.mxu0 %v7575_v15 }
 0x812   :  { %7088 = vmatmul.mubr.msk.f32.vlgmr.msra.gmra.mrb[48].mxu0 %vm53_vm0, %v3771_v24 }
 0x813   :  { %7102 = vmatprep.mubr.msk.f32.mxu0 %vm7576_vm1, %v7575_v15 }
 0x818   :  { %7101 = vmatpush3.xpose.msk.msra.mxu0 %vm1831_vm2, %v925_v28 }
 0x819   :  { %7110 = vmatprep.subr.mxu0 %v7575_v15 }
 0x8d5   :  { %v7056_v14 = vpop.f32.mrb[44].mxu0  ;;  %v7078_v0 = vpop.f32.mrb[40].mxu1 }
 0x8d6   :  { %v3857_v1 = vpop.f32.mrb[45].mxu0  ;;  %v4033_v62 = vpop.f32.mrb[41].mxu1  ;;  %v3863_v32 = vadd.f32 %v7056_v14, %v6342_v56 }
 0x8d7   :  { %v3858_v27 = vadd.f32 %v6342_v56, %v3857_v1  ;;  %v4034_v38 = vadd.f32 %v6358_v8, %v4033_v62 }
 0x8d9   :  { %7093 = vmatmul.mubr.msk.f32.vlgmr.msra.gmra.mrb[42].mxu1 %vm1831_vm2, %v3858_v27 }
 0x8da   :  { %7096 = vmatpush3.xpose.msk.msra.mxu1 %vm1831_vm2, %v8028_v33  ;;  %7097 = vmatprep.mubr.msk.f32.mxu1 %vm7576_vm1, %v7575_v15 }
 0x8db   :  { %7105 = vmatprep.subr.mxu1 %v7575_v15 }
 0x8dd   :  { %v7067_v29 = vpop.f32.mrb[46].mxu0  ;;  %7098 = vmatmul.mubr.msk.f32.vlgmr.msra.gmra.mrb[44].mxu1 %vm1831_vm2, %v3863_v32 }
 0x8de   :  { %v3945_v2 = vpop.f32.mrb[47].mxu0  ;;  %7106 = vmatpush3.xpose.msk.msra.mxu1 %vm1831_vm2, %v8033_v36  ;;  %7107 = vmatprep.mubr.msk.f32.mxu1 %vm7576_vm1, %v7575_v15  ;;  %v3951_v33 = vadd.f32 %v7067_v29, %v6350_v37  ;;  %v4039_v36 = vadd.f32 %v7078_v0, %v6358_v8 }
 0x8df   :  { %v3946_v6 = vadd.f32 %v6350_v37, %v3945_v2  ;;  %7115 = vmatprep.subr.mxu1 %v7575_v15 }
 0x8e1   :  { %7103 = vmatmul.mubr.msk.f32.vlgmr.msra.gmra.mrb[50].mxu0 %vm1831_vm2, %v3946_v6  ;;  %7108 = vmatmul.mubr.msk.f32.vlgmr.msra.gmra.mrb[46].mxu1 %vm1831_vm2, %v3951_v33 }
 0x8e2   :  { %7111 = vmatpush3.xpose.msk.msra.mxu0 %vm1831_vm2, %v1013_v4  ;;  %7116 = vmatpush3.xpose.msk.msra.mxu1 %vm1831_vm2, %v1018_v7 }
 0x8e3   :  { %7112 = vmatprep.mubr.msk.f32.mxu0 %vm7576_vm1, %v7575_v15  ;;  %7120 = vmatprep.subr.mxu0 %v7575_v15 }
 0x8e4   :  { %7117 = vmatprep.mubr.msk.f32.mxu1 %vm7576_vm1, %v7575_v15  ;;  %7125 = vmatprep.subr.mxu1 %v7575_v15 }
 0x8e5   :  { %v7089_v13 = vpop.f32.mrb[48].mxu0  ;;  %7113 = vmatmul.mubr.msk.f32.vlgmr.msra.gmra.mrb[52].mxu0 %vm1831_vm2, %v4034_v38  ;;  %7118 = vmatmul.mubr.msk.f32.vlgmr.msra.gmra.mrb[48].mxu1 %vm1831_vm2, %v4039_v36 }
 0x8e6   :  { %7121 = vmatpush3.xpose.msk.msra.mxu0 %vm1831_vm2, %v1101_v5  ;;  %v4121_v39 = vpop.f32.mrb[49].mxu0  ;;  %7126 = vmatpush3.xpose.msk.msra.mxu1 %vm1831_vm2, %v1106_v25  ;;  %v4127_v40 = vadd.f32 %v7089_v13, %v6366_v9 }
 0x8e7   :  { %v4122_v52 = vadd.f32 %v6366_v9, %v4121_v39  ;;  %7122 = vmatprep.mubr.msk.f32.mxu0 %vm7576_vm1, %v7575_v15  ;;  %7130 = vmatprep.subr.mxu0 %v7575_v15 }
 0x8e8   :  { %7127 = vmatprep.mubr.msk.f32.mxu1 %vm7576_vm1, %v7575_v15  ;;  %7135 = vmatprep.subr.mxu1 %v7575_v15 }
 0x8e9   :  { %7123 = vmatmul.mubr.msk.f32.vlgmr.msra.gmra.mrb[54].mxu0 %vm1831_vm2, %v4122_v52  ;;  %7128 = vmatmul.mubr.msk.f32.vlgmr.msra.gmra.mrb[50].mxu1 %vm1831_vm2, %v4127_v40 }
 0x8ea   :  { %7131 = vmatpush3.msra.mxu0 %v1189_v17  ;;  %7136 = vmatpush3.msra.mxu1 %v1194_v12 }
 0x8eb   :  { %7132 = vmatprep.mubr.msk.f32.mxu0 %vm7576_vm1, %v7575_v15  ;;  %7140 = vmatprep.subr.mxu0 %v7575_v15 }
 0x8ec   :  { %7137 = vmatprep.mubr.msk.f32.mxu1 %vm7576_vm1, %v7575_v15  ;;  %7145 = vmatprep.subr.mxu1 %v7575_v15 }
 0x9ac   :  { %v4202_v41 = vpop.f32.mrb[42].mxu1 }
 0x9ad   :  { %v4738_v42 = vmul.f32 0.35355338, %v4202_v41  ;;  %v7094_v18 = vpop.f32.mrb[43].mxu1 }
 0x9af   :  { %v4746_v19 = vsel %vm1831_vm2, %v4738_v42, -inf }
 0x9b0   :  { %4747 = vmax.xlane.f32.xlu0 %v4746_v19  ;;  %v4278_v21 = vpop.f32.mrb[44].mxu1 }
 0x9b1   :  { %v4739_v22 = vmul.f32 0.35355338, %v4278_v21  ;;  %v7099_v16 = vpop.f32.mrb[45].mxu1 }
 0x9b3   :  { %v4749_v35 = vsel %vm1831_vm2, %v4739_v22, -inf }
 0x9b4   :  { %v4354_v49 = vpop.f32.mrb[50].mxu0  ;;  %4750 = vmax.xlane.f32.xlu1 %v4749_v35  ;;  %v4430_v54 = vpop.f32.mrb[46].mxu1 }
 0x9b5   :  { %v4740_v55 = vmul.f32 0.35355338, %v4354_v49  ;;  %v7104_v50 = vpop.f32.mrb[51].mxu0  ;;  %v4741_v53 = vmul.f32 0.35355338, %v4430_v54  ;;  %v7109_v57 = vpop.f32.mrb[47].mxu1 }
 0x9b7   :  { %v4752_v20 = vsel %vm1831_vm2, %v4740_v55, -inf  ;;  %v4755_v58 = vsel %vm1831_vm2, %v4741_v53, -inf }
 0x9b8   :  { %v4506_v24 = vpop.f32.mrb[52].mxu0  ;;  %4753 = vmax.xlane.f32.xlu0 %v4752_v20  ;;  %4756 = vmax.xlane.f32.xlu1 %v4755_v58  ;;  %v4582_v23 = vpop.f32.mrb[48].mxu1 }
 0x9b9   :  { %v4742_v59 = vmul.f32 0.35355338, %v4506_v24  ;;  %v7114_v11 = vpop.f32.mrb[53].mxu0  ;;  %v4743_v60 = vmul.f32 0.35355338, %v4582_v23  ;;  %v7119_v31 = vpop.f32.mrb[49].mxu1 }
 0x9ba   :  { %v6236_v31 = vld [vmem:[%s8624_s2 + $0x15] ss:$0 sm:$0xff] }
 0x9bb   :  { %v4758_v34 = vsel %vm1831_vm2, %v4742_v59, -inf  ;;  %v4761_v61 = vsel %vm1831_vm2, %v4743_v60, -inf }
 0x9bc   :  { %v4658_v63 = vpop.f32.mrb[54].mxu0  ;;  %4759 = vmax.xlane.f32.xlu0 %v4758_v34  ;;  %4762 = vmax.xlane.f32.xlu1 %v4761_v61  ;;  %v4734_v28 = vpop.f32.mrb[50].mxu1 }
 0x9bd   :  { %v4744_v56 = vmul.f32 0.35355338, %v4658_v63  ;;  %v7124_v14 = vpop.f32.mrb[55].mxu0  ;;  %v4745_v0 = vmul.f32 0.35355338, %v4734_v28  ;;  %v7129_v1 = vpop.f32.mrb[51].mxu1  ;;  %v1277_v28 = vadd.f32 %v6236_v31, %v8051_v44 }
 0x9be   :  { %v6244_v44 = vld [vmem:[%s8624_s2 + $0x16] ss:$0 sm:$0xff] }
 0x9bf   :  { %v4764_v62 = vsel %vm1831_vm2, %v4744_v56, -inf  ;;  %v4767_v27 = vsel %vm1831_vm2, %v4745_v0, -inf }
 0x9c0   :  { %4765 = vmax.xlane.f32.xlu0 %v4764_v62  ;;  %4768 = vmax.xlane.f32.xlu1 %v4767_v27  ;;  %v1282_v62 = vadd.f32 %v8049_v43, %v6236_v31  ;;  %v1365_v43 = vadd.f32 %v6244_v44, %v8055_v46 }
 0xa3d   :  { %v4748_v32 = vpop.xlane.xlu0 %4747 }
 0xa3e   :  { %v4770_v37 = vsub.f32 %v4738_v42, %v4748_v32 }
 0xa40   :  { %v4778_v30 = vmul.f32 1.442695, %v4770_v37 }
 0xa41   :  { %v4751_v29 = vpop.xlane.xlu1 %4750 }
 0xa42   :  { %7505 = vpow2.f32 %v4778_v30  ;;  %v4771_v2 = vsub.f32 %v4739_v22, %v4751_v29 }
 0xa44   :  { %v4780_v33 = vmul.f32 1.442695, %v4771_v2  ;;  %v1370_v2 = vadd.f32 %v8053_v45, %v6244_v44 }
 0xa45   :  { %v4754_v6 = vpop.xlane.xlu0 %4753  ;;  %v4757_v7 = vpop.xlane.xlu1 %4756 }
 0xa46   :  { %7507 = vpow2.f32 %v4780_v33  ;;  %v4772_v4 = vsub.f32 %v4740_v55, %v4754_v6  ;;  %v4773_v8 = vsub.f32 %v4741_v53, %v4757_v7  ;;  %v6252_v33 = vld [vmem:[%s8624_s2 + $0x17] ss:$0 sm:$0xff] }
 0xa47   :  { %v1453_v46 = vadd.f32 %v6252_v33, %v8059_v48  ;;  %v1458_v45 = vadd.f32 %v8057_v47, %v6252_v33  ;;  %v6393_v47 = vld [vmem:[%s8625_s3 + $0x20] sm:$0xff] }
 0xa48   :  { %v4782_v3 = vmul.f32 1.442695, %v4772_v4  ;;  %v4784_v36 = vmul.f32 1.442695, %v4773_v8 }
 0xa49   :  { %v4760_v38 = vpop.xlane.xlu0 %4759  ;;  %v4763_v25 = vpop.xlane.xlu1 %4762 }
 0xa4a   :  { %7509 = vpow2.f32 %v4782_v3  ;;  %v4774_v5 = vsub.f32 %v4742_v59, %v4760_v38  ;;  %v4775_v9 = vsub.f32 %v4743_v60, %v4763_v25  ;;  %v6394_v25 = vld [vmem:[%s8625_s3 + $0x28] sm:$0xff] }
 0xa4b   :  { %7511 = vpow2.f32 %v4784_v36 }
 0xa4c   :  { %v7506_v10 = vpop.eup %7505  ;;  %v4786_v13 = vmul.f32 1.442695, %v4774_v5  ;;  %v4788_v39 = vmul.f32 1.442695, %v4775_v9  ;;  %v6396_v5 = vld [vmem:[%s8625_s3 + $0x38] sm:$0xff] }
 0xa4d   :  { %v4766_v40 = vpop.xlane.xlu0 %4765  ;;  %v4769_v52 = vpop.xlane.xlu1 %4768  ;;  %v4794_v12 = vsel %vm1831_vm2, %v7506_v10, 0.0 }
 0xa4e   :  { %7513 = vpow2.f32 %v4786_v13  ;;  %v4776_v17 = vsub.f32 %v4744_v56, %v4766_v40  ;;  %v4777_v41 = vsub.f32 %v4745_v0, %v4769_v52  ;;  %4795 = vadd.xlane.f32.xlu0 %v4794_v12 }
 0xa4f   :  { %7515 = vpow2.f32 %v4788_v39 }
 0xa50   :  { %v7508_v42 = vpop.eup %7507  ;;  %v4790_v18 = vmul.f32 1.442695, %v4776_v17  ;;  %v4792_v19 = vmul.f32 1.442695, %v4777_v41 }
 0xa51   :  { %v4797_v21 = vsel %vm1831_vm2, %v7508_v42, 0.0 }
 0xa52   :  { %7517 = vpow2.f32 %v4790_v18  ;;  %4798 = vadd.xlane.f32.xlu1 %v4797_v21 }
 0xa53   :  { %7519 = vpow2.f32 %v4792_v19 }
 0xa54   :  { %v7510_v22 = vpop.eup %7509 }
 0xa55   :  { %v7512_v16 = vpop.eup %7511  ;;  %v4800_v35 = vsel %vm1831_vm2, %v7510_v22, 0.0 }
 0xa56   :  { %4801 = vadd.xlane.f32.xlu0 %v4800_v35  ;;  %v4803_v49 = vsel %vm1831_vm2, %v7512_v16, 0.0 }
 0xa57   :  { %4804 = vadd.xlane.f32.xlu1 %v4803_v49 }
 0xa58   :  { %v7514_v54 = vpop.eup %7513 }
 0xa59   :  { %v7516_v55 = vpop.eup %7515  ;;  %v4806_v50 = vsel %vm1831_vm2, %v7514_v54, 0.0 }
 0xa5a   :  { %4807 = vadd.xlane.f32.xlu0 %v4806_v50  ;;  %v4809_v53 = vsel %vm1831_vm2, %v7516_v55, 0.0 }
 0xa5b   :  { %4810 = vadd.xlane.f32.xlu1 %v4809_v53 }
 0xa5c   :  { %v8450_v57 = vpop.eup %7517 }
 0xa5d   :  { %v8452_v20 = vpop.eup %7519  ;;  %v4812_v58 = vsel %vm1831_vm2, %v8450_v57, 0.0 }
 0xa5e   :  { %4813 = vadd.xlane.f32.xlu0 %v4812_v58  ;;  %v4815_v24 = vsel %vm1831_vm2, %v8452_v20, 0.0 }
 0xa5f   :  { %4816 = vadd.xlane.f32.xlu1 %v4815_v24 }
 0xadb   :  { %v4796_v23 = vpop.xlane.xlu0 %4795 }
 0xadc   :  { %7521 = vrcp.f32 %v4796_v23 }
 0xadf   :  { %v4799_v59 = vpop.xlane.xlu1 %4798 }
 0xae0   :  { %7523 = vrcp.f32 %v4799_v59 }
 0xae3   :  { %v4802_v11 = vpop.xlane.xlu0 %4801 }
 0xae4   :  { %7525 = vrcp.f32 %v4802_v11  ;;  %v4805_v60 = vpop.xlane.xlu1 %4804 }
 0xae5   :  { %7527 = vrcp.f32 %v4805_v60 }
 0xae6   :  { %v7522_v34 = vpop.eup %7521 }
 0xae7   :  { %v4819_v61 = vmul.f32 %v7522_v34, %v7506_v10  ;;  %v4808_v63 = vpop.xlane.xlu0 %4807 }
 0xae8   :  { %7529 = vrcp.f32 %v4808_v63  ;;  %v4811_v56 = vpop.xlane.xlu1 %4810 }
 0xae9   :  { %7531 = vrcp.f32 %v4811_v56  ;;  %7133 = vmatmul.mubr.msk.f32.vlgmr.msra.gmra.mrb[56].mxu0 %vm1831_vm2, %v4819_v61 }
 0xaea   :  { %v7524_v14 = vpop.eup %7523  ;;  %7141 = vmatpush3.msra.mxu0 %v1277_v28  ;;  %7142 = vmatprep.mubr.msk.f32.mxu0 %vm7576_vm1, %v7575_v15  ;;  %v6405_v28 = vld [vmem:[%s8629_s7 + $0x6] ss:$0 sm:$0xff] }
 0xaeb   :  { %v4821_v0 = vmul.f32 %v7524_v14, %v7508_v42  ;;  %v4814_v1 = vpop.xlane.xlu0 %4813  ;;  %7150 = vmatprep.subr.mxu0 %v7575_v15 }
 0xaec   :  { %7533 = vrcp.f32 %v4814_v1  ;;  %v4817_v27 = vpop.xlane.xlu1 %4816 }
 0xaed   :  { %7535 = vrcp.f32 %v4817_v27  ;;  %7138 = vmatmul.mubr.msk.f32.vlgmr.msra.gmra.mrb[52].mxu1 %vm1831_vm2, %v4821_v0 }
 0xaee   :  { %v7526_v32 = vpop.eup %7525  ;;  %7146 = vmatpush3.msra.mxu1 %v1282_v62  ;;  %7147 = vmatprep.mubr.msk.f32.mxu1 %vm7576_vm1, %v7575_v15 }
 0xaef   :  { %v7528_v37 = vpop.eup %7527  ;;  %v4823_v30 = vmul.f32 %v7526_v32, %v7510_v22  ;;  %7155 = vmatprep.subr.mxu1 %v7575_v15 }
 0xaf0   :  { %v4825_v29 = vmul.f32 %v7528_v37, %v7512_v16 }
 0xaf1   :  { %7143 = vmatmul.mubr.msk.f32.vlgmr.msra.gmra.mrb[58].mxu0 %vm1831_vm2, %v4823_v30 }
 0xaf2   :  { %v7530_v6 = vpop.eup %7529  ;;  %7151 = vmatpush3.msra.mxu0 %v1365_v43  ;;  %7148 = vmatmul.mubr.msk.f32.vlgmr.msra.gmra.mrb[54].mxu1 %vm1831_vm2, %v4825_v29 }
 0xaf3   :  { %v7532_v7 = vpop.eup %7531  ;;  %v4827_v4 = vmul.f32 %v7530_v6, %v7514_v54  ;;  %7156 = vmatpush3.msra.mxu1 %v1370_v2  ;;  %7152 = vmatprep.mubr.msk.f32.mxu0 %vm7576_vm1, %v7575_v15 }
 0xaf4   :  { %v4829_v8 = vmul.f32 %v7532_v7, %v7516_v55  ;;  %7160 = vmatprep.subr.mxu0 %v7575_v15  ;;  %7157 = vmatprep.mubr.msk.f32.mxu1 %vm7576_vm1, %v7575_v15  ;;  %v6410_v7 = vld [vmem:[%s8626_s4 + $0x30] sm:$0xff] }
 0xaf5   :  { %7153 = vmatmul.mubr.msk.f32.vlgmr.msra.gmra.mrb[60].mxu0 %vm1831_vm2, %v4827_v4  ;;  %7165 = vmatprep.subr.mxu1 %v7575_v15 }
 0xaf6   :  { %v7534_v3 = vpop.eup %7533  ;;  %7161 = vmatpush3.msra.mxu0 %v1453_v46  ;;  %7158 = vmatmul.mubr.msk.f32.vlgmr.msra.gmra.mrb[56].mxu1 %vm1831_vm2, %v4829_v8  ;;  %v6411_v46 = vld [vmem:[%s8626_s4 + $0x38] sm:$0xff] }
 0xaf7   :  { %v7536_v36 = vpop.eup %7535  ;;  %v4831_v38 = vmul.f32 %v7534_v3, %v8450_v57  ;;  %7166 = vmatpush3.msra.mxu1 %v1458_v45  ;;  %7162 = vmatprep.mubr.msk.f32.mxu0 %vm7576_vm1, %v7575_v15  ;;  %v7440_v8 = vpack.c.bf16 %v6411_v46, %v6410_v7  ;;  %v6415_v45 = vld [vmem:[%s8627_s5 + $0x40] sm:$0xff]  ;;  %v6416_v3 = vld [vmem:[%s8627_s5 + $0x48] sm:$0xff] }
 0xaf8   :  { %v4833_v48 = vmul.f32 %v7536_v36, %v8452_v20  ;;  %7167 = vmatprep.mubr.msk.f32.mxu1 %vm7576_vm1, %v7575_v15  ;;  %7170 = vmatprep.subr.mxu0 %v6393_v47  ;;  %v6395_v15 = vld [vmem:[%s8625_s3 + $0x30] sm:$0xff] }
 0xaf9   :  { %7163 = vmatmul.mubr.msk.f32.vlgmr.msra.gmra.mrb[62].mxu0 %vm1831_vm2, %v4831_v38  ;;  %7175 = vmatprep.subr.mxu1 %v6394_v25  ;;  %v6417_v36 = vld [vmem:[%s8627_s5 + $0x50] sm:$0xff]  ;;  %v7444_v38 = vpack.c.bf16 %v6416_v3, %v6415_v45 }
 0xafa   :  { %7168 = vmatmul.mubr.msk.f32.vlgmr.msra.gmra.mrb[58].mxu1 %vm1831_vm2, %v4833_v48  ;;  %7171 = vmatpush3.msra.mxu0 %v6393_v47  ;;  %v6418_v48 = vld [vmem:[%s8627_s5 + $0x58] sm:$0xff] }
 0xafb   :  { %7176 = vmatpush3.msra.mxu1 %v6394_v25  ;;  %7180 = vmatprep.subr.mxu0 %v6395_v15  ;;  %v7448_v47 = vpack.c.bf16 %v6418_v48, %v6417_v36  ;;  %v6419_v25 = vld [vmem:[%s8627_s5 + $0x60] sm:$0xff] }
 0xafc   :  { %7185 = vmatprep.subr.mxu1 %v6396_v5 }
 0xbbc   :  { %v4903_v9 = vpop.f32.mrb[56].mxu0 }
 0xbbd   :  { %v7134_v10 = vpop.f32.mrb[57].mxu0  ;;  %7172 = vmatprep.mubr.msk.f32.mxu0 %vm1831_vm2, %v4903_v9 }
 0xbc0   :  { %v4976_v13 = vpop.f32.mrb[52].mxu1 }
 0xbc1   :  { %v7139_v39 = vpop.f32.mrb[53].mxu1  ;;  %7173 = vmatmul.mubr.msk.f32.vlgmr.msra.gmra.mrb[64].mxu0 %vm1831_vm2, %v4976_v13 }
 0xbc2   :  { %7181 = vmatpush3.msra.mxu0 %v6395_v15  ;;  %v6420_v15 = vld [vmem:[%s8627_s5 + $0x68] sm:$0xff] }
 0xbc4   :  { %v5049_v40 = vpop.f32.mrb[58].mxu0 }
 0xbc5   :  { %v7144_v52 = vpop.f32.mrb[59].mxu0  ;;  %v5122_v12 = vpop.f32.mrb[54].mxu1  ;;  %7177 = vmatprep.mubr.msk.f32.mxu1 %vm1831_vm2, %v5049_v40 }
 0xbc6   :  { %v7149_v17 = vpop.f32.mrb[55].mxu1  ;;  %7178 = vmatmul.mubr.msk.f32.vlgmr.msra.gmra.mrb[60].mxu1 %vm1831_vm2, %v5122_v12 }
 0xbc7   :  { %7186 = vmatpush3.msra.mxu1 %v6396_v5  ;;  %v7452_v5 = vpack.c.bf16 %v6420_v15, %v6419_v25 }
 0xbc8   :  { %v5195_v41 = vpop.f32.mrb[60].mxu0  ;;  %7445 = vmatprep.subr.bf16.mxu1 %v7444_v38 }
 0xbc9   :  { %v7154_v42 = vpop.f32.mrb[61].mxu0  ;;  %v5268_v18 = vpop.f32.mrb[56].mxu1  ;;  %7182 = vmatprep.mubr.msk.f32.mxu0 %vm1831_vm2, %v5195_v41 }
 0xbca   :  { %v7159_v19 = vpop.f32.mrb[57].mxu1  ;;  %7183 = vmatmul.mubr.msk.f32.vlgmr.msra.gmra.mrb[66].mxu0 %vm1831_vm2, %v5268_v18 }
 0xbcc   :  { %v5341_v21 = vpop.f32.mrb[62].mxu0 }
 0xbcd   :  { %v7164_v22 = vpop.f32.mrb[63].mxu0  ;;  %v5414_v16 = vpop.f32.mrb[58].mxu1  ;;  %7187 = vmatprep.mubr.msk.f32.mxu1 %vm1831_vm2, %v5341_v21 }
 0xbce   :  { %v7169_v35 = vpop.f32.mrb[59].mxu1  ;;  %7188 = vmatmul.mubr.msk.f32.vlgmr.msra.gmra.mrb[62].mxu1 %vm1831_vm2, %v5414_v16 }
 0xbcf   :  { %7447 = vmatpush3.bf16.msra.mxu1 %v7444_v38 }
 0xbd0   :  { %7449 = vmatprep.subr.bf16.mxu1 %v7448_v47 }
 0xbd3   :  { %7451 = vmatpush3.bf16.msra.mxu1 %v7448_v47 }
 0xbd4   :  { %7453 = vmatprep.subr.bf16.mxu1 %v7452_v5 }
 0xbd7   :  { %7455 = vmatpush3.bf16.msra.mxu1 %v7452_v5 }
 0xc94   :  { %v7174_v49 = vpop.f32.mrb[64].mxu0 }
 0xc95   :  { %v5495_v54 = vpop.f32.mrb[65].mxu0  ;;  %v5754_v50 = vsel %vm53_vm0, %v7174_v49, 0.0 }
 0xc96   :  { %v5747_v20 = vsel %vm53_vm0, %v5495_v54, 0.0  ;;  %v6406_v54 = vld [vmem:[%s8629_s7 + $0x7] ss:$0 sm:$0xff] }
 0xc99   :  { %v7179_v55 = vpop.f32.mrb[60].mxu1 }
 0xc9a   :  { %v5755_v53 = vsel %vm53_vm0, %v7179_v55, 0.0  ;;  %v5576_v57 = vpop.f32.mrb[61].mxu1 }
 0xc9b   :  { %v5756_v58 = vadd.f32 %v5755_v53, %v5754_v50  ;;  %v5748_v24 = vsel %vm53_vm0, %v5576_v57, 0.0  ;;  %v6407_v57 = vld [vmem:[%s8629_s7 + $0x8] ss:$0 sm:$0xff] }
 0xc9c   :  { %v5749_v23 = vadd.f32 %v5748_v24, %v5747_v20 }
 0xc9d   :  { %v7184_v59 = vpop.f32.mrb[66].mxu0 }
 0xc9e   :  { %v5757_v11 = vsel %vm53_vm0, %v7184_v59, 0.0  ;;  %v5657_v60 = vpop.f32.mrb[67].mxu0  ;;  %v6421_v59 = vld [vmem:[%s8627_s5 + $0x70] sm:$0xff] }
 0xc9f   :  { %v5758_v31 = vadd.f32 %v5757_v11, %v5756_v58  ;;  %v5750_v34 = vsel %vm53_vm0, %v5657_v60, 0.0  ;;  %v6422_v11 = vld [vmem:[%s8627_s5 + $0x78] sm:$0xff] }
 0xca0   :  { %v5751_v61 = vadd.f32 %v5750_v34, %v5749_v23  ;;  %v7456_v60 = vpack.c.bf16 %v6422_v11, %v6421_v59 }
 0xca1   :  { %v7189_v63 = vpop.f32.mrb[62].mxu1 }
 0xca2   :  { %v5759_v56 = vsel %vm53_vm0, %v7189_v63, 0.0  ;;  %v5738_v14 = vpop.f32.mrb[63].mxu1  ;;  %7457 = vmatprep.subr.bf16.mxu1 %v7456_v60 }
 0xca3   :  { %v5760_v0 = vadd.f32 %v5759_v56, %v5758_v31  ;;  %v5752_v1 = vsel %vm53_vm0, %v5738_v14, 0.0  ;;  %7459 = vmatpush3.bf16.msra.mxu1 %v7456_v60  ;;  %v6412_v31 = vld [vmem:[%s8628_s6 + $0x1] ss:$0 sm:$0xff] }
 0xca4   :  { %v5753_v62 = vadd.f32 %v5752_v1, %v5751_v61 }
 0xca5   :  { %v5768_v27 = vadd.f32 %v6405_v28, %v5760_v0  ;;  %v6423_v0 = vld [vmem:[%s8629_s7 + $0x9] ss:$0 sm:$0xff] }
 0xca6   :  { %v5767_v44 = vadd.f32 %v6405_v28, %v5753_v62 }
 0xca7   :  { %v5770_v32 = vadd.f32 %v5768_v27, %v8318_v51  ;;  %v6408_v51 = vld [vmem:[%s8626_s4 + $0x20] sm:$0xff] }
 0xca8   :  { %v5769_v37 = vadd.f32 %v5767_v44, %v8320_v26  ;;  %v6409_v26 = vld [vmem:[%s8626_s4 + $0x28] sm:$0xff] }
 0xca9   :  { %v5774_v30 = vsel %vm53_vm0, %v5770_v32, 0.0  ;;  %v5780_v43 = vmul.f32 %v5770_v32, %v5770_v32  ;;  %v7436_v4 = vpack.c.bf16 %v6409_v26, %v6408_v51 }
 0xcaa   :  { %5775 = vadd.xlane.f32.xlu1 %v5774_v30  ;;  %v5771_v29 = vsel %vm53_vm0, %v5769_v37, 0.0  ;;  %v5779_v2 = vmul.f32 %v5769_v37, %v5769_v37 }
 0xcab   :  { %5772 = vadd.xlane.f32.xlu0 %v5771_v29  ;;  %v5784_v33 = vsel %vm53_vm0, %v5780_v43, 0.0  ;;  %7437 = vmatprep.subr.bf16.mxu0 %v7436_v4 }
 0xcac   :  { %v5781_v6 = vsel %vm53_vm0, %v5779_v2, 0.0  ;;  %7439 = vmatpush3.bf16.msra.mxu0 %v7436_v4 }
 0xcad   :  { %7441 = vmatprep.subr.bf16.mxu0 %v7440_v8 }
 0xcae   :  { %5785 = vadd.xlane.f32.xlu1 %v5784_v33 }
 0xcaf   :  { %5782 = vadd.xlane.f32.xlu0 %v5781_v6 }
 0xcb0   :  { %7443 = vmatpush3.bf16.msra.mxu0 %v7440_v8 }
 0xd37   :  { %v5776_v9 = vpop.xlane.xlu1 %5775 }
 0xd38   :  { %v5778_v10 = vmul.f32 0.03125, %v5776_v9  ;;  %v5773_v13 = vpop.xlane.xlu0 %5772 }
 0xd39   :  { %v5777_v39 = vmul.f32 0.03125, %v5773_v13  ;;  %v6426_v13 = vld [vmem:[%s8629_s7 + $0xa] ss:$0 sm:$0xff] }
 0xd3a   :  { %v5790_v52 = vmul.f32 %v5778_v10, %v5778_v10  ;;  %v5794_v16 = vsub.f32 %v5770_v32, %v5778_v10 }
 0xd3b   :  { %v5786_v40 = vpop.xlane.xlu1 %5785  ;;  %v5789_v41 = vmul.f32 %v5777_v39, %v5777_v39  ;;  %v5793_v49 = vsub.f32 %v5769_v37, %v5777_v39 }
 0xd3c   :  { %v5788_v12 = vmul.f32 0.03125, %v5786_v40  ;;  %v5783_v17 = vpop.xlane.xlu0 %5782 }
 0xd3d   :  { %v5787_v42 = vmul.f32 0.03125, %v5783_v17 }
 0xd3e   :  { %v5792_v18 = vsub.f32 %v5788_v12, %v5790_v52  ;;  %v6427_v52 = vld [vmem:[%s8629_s7 + $0xb] ss:$0 sm:$0xff] }
 0xd3f   :  { %v5791_v19 = vsub.f32 %v5787_v42, %v5789_v41 }
 0xd40   :  { %v5796_v21 = vadd.f32 1e-05, %v5792_v18 }
 0xd41   :  { %v5795_v22 = vadd.f32 1e-05, %v5791_v19 }
 0xd42   :  { %7537 = vrsqrt.f32 %v5796_v21 }
 0xd43   :  { %7539 = vrsqrt.f32 %v5795_v22 }
 0xd4c   :  { %v7538_v35 = vpop.eup %7537 }
 0xd4d   :  { %v7540_v55 = vpop.eup %7539  ;;  %v5800_v50 = vmul.f32 %v7538_v35, %v5794_v16 }
 0xd4e   :  { %v5799_v53 = vmul.f32 %v7540_v55, %v5793_v49 }
 0xd4f   :  { %v5808_v20 = vmul.f32 %v6406_v54, %v5800_v50 }
 0xd50   :  { %v5807_v58 = vmul.f32 %v6406_v54, %v5799_v53 }
 0xd51   :  { %v5816_v23 = vadd.f32 %v6407_v57, %v5808_v20 }
 0xd52   :  { %v5815_v24 = vadd.f32 %v6407_v57, %v5807_v58 }
 0xd54   :  { %7198 = vmatprep.mubr.msk.f32.mxu0 %vm53_vm0, %v5815_v24 }
 0xd55   :  { %7199 = vmatmul.mubr.msk.f32.vlgmr.msra.gmra.mrb[68].mxu0 %vm53_vm0, %v5816_v23 }
 0xe28   :  { %v7200_v34 = vpop.f32.mrb[68].mxu0 }
 0xe29   :  { %v5906_v61 = vadd.f32 %v7200_v34, %v6412_v31  ;;  %v5900_v63 = vpop.f32.mrb[69].mxu0 }
 0xe2a   :  { %v5901_v28 = vadd.f32 %v6412_v31, %v5900_v63 }
 0xe2b   :  { %v5910_v14 = vmax.f32 %v5906_v61, 0.0 }
 0xe2c   :  { %v5909_v56 = vmax.f32 %v5901_v28, 0.0 }
 0xe2e   :  { %7217 = vmatprep.mubr.msk.f32.mxu1 %vm3626_vm3, %v5909_v56  ;;  %v6430_v56 = vld [vmem:[%s8629_s7 + $0xc] ss:$0 sm:$0xff] }
 0xe2f   :  { %7218 = vmatmul.mubr.msk.f32.vlgmr.msra.gmra.mrb[64].mxu1 %vm3626_vm3, %v5910_v14 }
 0xf02   :  { %v7219_v1 = vpop.f32.mrb[64].mxu1 }
 0xf03   :  { %v6004_v62 = vadd.f32 %v7219_v1, %v6423_v0  ;;  %v5998_v27 = vpop.f32.mrb[65].mxu1 }
 0xf04   :  { %v5999_v44 = vadd.f32 %v6423_v0, %v5998_v27 }
 0xf05   :  { %v6008_v32 = vadd.f32 %v6004_v62, %v5816_v23  ;;  %v6431_v62 = vld [vmem:[%s8629_s7 + $0xd] ss:$0 sm:$0xff] }
 0xf06   :  { %v6007_v37 = vadd.f32 %v5999_v44, %v5815_v24 }
 0xf07   :  { %v6012_v30 = vsel %vm53_vm0, %v6008_v32, 0.0  ;;  %v6018_v43 = vmul.f32 %v6008_v32, %v6008_v32 }
 0xf08   :  { %6013 = vadd.xlane.f32.xlu1 %v6012_v30  ;;  %v6009_v29 = vsel %vm53_vm0, %v6007_v37, 0.0  ;;  %v6017_v2 = vmul.f32 %v6007_v37, %v6007_v37 }
 0xf09   :  { %6010 = vadd.xlane.f32.xlu0 %v6009_v29  ;;  %v6022_v33 = vsel %vm53_vm0, %v6018_v43, 0.0 }
 0xf0a   :  { %v6019_v6 = vsel %vm53_vm0, %v6017_v2, 0.0 }
 0xf0c   :  { %6023 = vadd.xlane.f32.xlu1 %v6022_v33 }
 0xf0d   :  { %6020 = vadd.xlane.f32.xlu0 %v6019_v6 }
 0xf95   :  { %v6014_v51 = vpop.xlane.xlu1 %6013 }
 0xf96   :  { %v6016_v26 = vmul.f32 0.03125, %v6014_v51  ;;  %v6011_v7 = vpop.xlane.xlu0 %6010 }
 0xf97   :  { %v6015_v4 = vmul.f32 0.03125, %v6011_v7 }
 0xf98   :  { %v6028_v8 = vmul.f32 %v6016_v26, %v6016_v26  ;;  %v6032_v5 = vsub.f32 %v6008_v32, %v6016_v26 }
 0xf99   :  { %v6024_v46 = vpop.xlane.xlu1 %6023  ;;  %v6027_v36 = vmul.f32 %v6015_v4, %v6015_v4  ;;  %v6031_v10 = vsub.f32 %v6007_v37, %v6015_v4 }
 0xf9a   :  { %v6026_v45 = vmul.f32 0.03125, %v6024_v46  ;;  %v6021_v3 = vpop.xlane.xlu0 %6020 }
 0xf9b   :  { %v6025_v38 = vmul.f32 0.03125, %v6021_v3 }
 0xf9c   :  { %v6030_v48 = vsub.f32 %v6026_v45, %v6028_v8 }
 0xf9d   :  { %v6029_v47 = vsub.f32 %v6025_v38, %v6027_v36 }
 0xf9e   :  { %v6034_v25 = vadd.f32 1e-05, %v6030_v48 }
 0xf9f   :  { %v6033_v15 = vadd.f32 1e-05, %v6029_v47 }
 0xfa0   :  { %7541 = vrsqrt.f32 %v6034_v25 }
 0xfa1   :  { %7543 = vrsqrt.f32 %v6033_v15 }
 0xfaa   :  { %v7542_v9 = vpop.eup %7541 }
 0xfab   :  { %v7544_v39 = vpop.eup %7543  ;;  %v6038_v40 = vmul.f32 %v7542_v9, %v6032_v5 }
 0xfac   :  { %v6037_v12 = vmul.f32 %v7544_v39, %v6031_v10 }
 0xfad   :  { %v6046_v17 = vmul.f32 %v6426_v13, %v6038_v40 }
 0xfae   :  { %v6045_v41 = vmul.f32 %v6426_v13, %v6037_v12 }
 0xfaf   :  { %v6054_v42 = vadd.f32 %v6427_v52, %v6046_v17 }
 0xfb0   :  { %v6053_v18 = vadd.f32 %v6427_v52, %v6045_v41 }
 0xfb1   :  { %v6062_v19 = vsel %vm53_vm0, %v6054_v42, 0.0  ;;  %v6068_v21 = vmul.f32 %v6054_v42, %v6054_v42 }
 0xfb2   :  { %6063 = vadd.xlane.f32.xlu1 %v6062_v19  ;;  %v6059_v22 = vsel %vm53_vm0, %v6053_v18, 0.0  ;;  %v6067_v16 = vmul.f32 %v6053_v18, %v6053_v18 }
 0xfb3   :  { %6060 = vadd.xlane.f32.xlu0 %v6059_v22  ;;  %v6072_v35 = vsel %vm53_vm0, %v6068_v21, 0.0 }
 0xfb4   :  { %v6069_v49 = vsel %vm53_vm0, %v6067_v16, 0.0 }
 0xfb6   :  { %6073 = vadd.xlane.f32.xlu1 %v6072_v35 }
 0xfb7   :  { %6070 = vadd.xlane.f32.xlu0 %v6069_v49 }
0x103f   :  { %v6064_v54 = vpop.xlane.xlu1 %6063 }
0x1040   :  { %v6066_v55 = vmul.f32 0.03125, %v6064_v54  ;;  %v6061_v50 = vpop.xlane.xlu0 %6060 }
0x1041   :  { %v6065_v53 = vmul.f32 0.03125, %v6061_v50 }
0x1042   :  { %v6078_v20 = vmul.f32 %v6066_v55, %v6066_v55  ;;  %v6082_v61 = vsub.f32 %v6054_v42, %v6066_v55 }
0x1043   :  { %v6074_v57 = vpop.xlane.xlu1 %6073  ;;  %v6077_v23 = vmul.f32 %v6065_v53, %v6065_v53  ;;  %v6081_v28 = vsub.f32 %v6053_v18, %v6065_v53 }
0x1044   :  { %v6076_v58 = vmul.f32 0.03125, %v6074_v57  ;;  %v6071_v24 = vpop.xlane.xlu0 %6070 }
0x1045   :  { %v6075_v59 = vmul.f32 0.03125, %v6071_v24 }
0x1046   :  { %v6080_v11 = vsub.f32 %v6076_v58, %v6078_v20 }
0x1047   :  { %v6079_v60 = vsub.f32 %v6075_v59, %v6077_v23 }
0x1048   :  { %v6084_v31 = vadd.f32 1e-05, %v6080_v11 }
0x1049   :  { %v6083_v34 = vadd.f32 1e-05, %v6079_v60 }
0x104a   :  { %7545 = vrsqrt.f32 %v6084_v31 }
0x104b   :  { %7547 = vrsqrt.f32 %v6083_v34 }
0x1054   :  { %v7546_v63 = vpop.eup %7545 }
0x1055   :  { %v7548_v14 = vpop.eup %7547  ;;  %v6088_v0 = vmul.f32 %v7546_v63, %v6082_v61 }
0x1056   :  { %v6087_v1 = vmul.f32 %v7548_v14, %v6081_v28 }
0x1057   :  { %v6096_v27 = vmul.f32 %v6430_v56, %v6088_v0 }
0x1058   :  { %v6095_v44 = vmul.f32 %v6430_v56, %v6087_v1 }
0x1059   :  { %v6104_v32 = vadd.f32 %v6431_v62, %v6096_v27 }
0x105a   :  { %v6103_v37 = vadd.f32 %v6431_v62, %v6095_v44 }
0x105b   :  { %6106 = vst.msk [vmem:[#allocation2 + $0x8] sm:$0xff] %vm53_vm0, %v6104_v32 }
0x105c   :  { %6105 = vst.msk [vmem:[#allocation2] sm:$0xff] %vm53_vm0, %v6103_v37 }
0x105d   :  { %7562 = shalt.err (!%p7559_p4)
}
0x105e   :  { %s7563_s4 = scalar_lea.hbm %s8630_s8, 256 }
0x105f   :  { %p7564_p5 = scmp.ne.s32.totalorder %s8630_s8, %s7563_s4  ;;  %p7567_p6 = scmp.lt.u32.totalorder %s7563_s4, %s8630_s8 }
0x1061   :  { %p7569_p7 = pnand %p7567_p6, %p7564_p5 }
0x1063   :  { %7572 = shalt.err (!%p7569_p7)
}
0x1064   :  { %s7578_s20 = smov 128   ;;  %s7579_s21 = smov 8  }
0x1065   :  { %6118 = dma.vmem_to_hbm [thread:$0]  %s6113_s15, 256, %s8630_s8, [#allocation3], %s7578_s20, %s7578_s20, %s7579_s21  }
0x1066   :  { %7573 = dma.done.wait [#allocation3], 256  }
0x1067   :  { %7574 = vsyncadd [#allocation3], 4294967040 }
0x1068   :  { %6122 = vsyncpa [#allocation3], 1 }

</bundles_post_ra>
